<compile_context>
chip_gen: v6e
topology: v6e:2x2x1
jax: 0.10.0
libtpu: 0.0.40
codegen_flags: <defaults>
</compile_context>

<pallas_src>
import functools

import jax
import jax.numpy as jnp
from jax import lax
from jax.experimental import pallas as pl
from jax.experimental.pallas import tpu as pltpu

EPS = 1e-5
LANE = 128


def _round_up(v, m):
    return (v + m - 1) // m * m


# ----------------------------- Pallas kernels ---------------------------------


def _make_conv1_kernel(stride, ho, wo, with_ds):
    """3x3/stride conv (+ optional fused 1x1/stride downsample conv) + BN partial stats.

    Inputs : stride*stride phase blocks of the spatially padded NHWC image (f32),
             w1 (9, Cin_p, Cout_p) bf16 [, wd (Cin_p, Cout_p) bf16].
    Outputs: y1_raw (1, Ho, Wo, Cout_p) f32 [, yd_raw], per-image (sum, sumsq) per channel.
    """
    s = stride
    nph = s * s

    def kernel(*refs):
        x_refs = refs[:nph]
        if with_ds:
            w_ref, wd_ref = refs[nph], refs[nph + 1]
            y_ref, yd_ref, st_ref, std_ref = refs[nph + 2:]
        else:
            w_ref = refs[nph]
            y_ref, st_ref = refs[nph + 1:]
        cpad = y_ref.shape[-1]

        def tap(kh, kw):
            # xp[kh + s*i, kw + s*j, :] == phase[kh%s, kw%s][kh//s + i, kw//s + j, :]
            ph = x_refs[(kh % s) * s + (kw % s)]
            return ph[0, kh // s:kh // s + ho, kw // s:kw // s + wo, :]

        acc = jnp.zeros((ho * wo, cpad), jnp.float32)
        for kh in range(3):
            for kw in range(3):
                p = tap(kh, kw).reshape(ho * wo, -1).astype(jnp.bfloat16)
                acc = acc + jnp.dot(p, w_ref[kh * 3 + kw],
                                    preferred_element_type=jnp.float32)
        y_ref[...] = acc.reshape(1, ho, wo, cpad)
        st_ref[0, 0:1, :] = jnp.sum(acc, axis=0, keepdims=True)
        st_ref[0, 1:2, :] = jnp.sum(acc * acc, axis=0, keepdims=True)

        if with_ds:
            c = tap(1, 1).reshape(ho * wo, -1).astype(jnp.bfloat16)
            yd = jnp.dot(c, wd_ref[...], preferred_element_type=jnp.float32)
            yd_ref[...] = yd.reshape(1, ho, wo, cpad)
            std_ref[0, 0:1, :] = jnp.sum(yd, axis=0, keepdims=True)
            std_ref[0, 1:2, :] = jnp.sum(yd * yd, axis=0, keepdims=True)

    return kernel


def _make_conv2_kernel(ho, wo):
    """Apply folded bn1 (scale/shift) + ReLU to one image's conv1 output, zero-pad it
    spatially in a VMEM scratch slab, run the 3x3/stride-1 conv as 9 shifted bf16
    matmuls, and emit the raw conv2 output plus per-channel (sum, sumsq)."""

    def kernel(y1_ref, prm_ref, w_ref, y_ref, st_ref, pad_ref):
        cpad = y_ref.shape[-1]
        sc = prm_ref[0:1, :].reshape(1, 1, cpad)
        sh = prm_ref[1:2, :].reshape(1, 1, cpad)
        y1n = jnp.maximum(y1_ref[0] * sc + sh, 0.0)

        # zero halo + interior each grid step (scratch persists across iterations / cores)
        pad_ref[...] = jnp.zeros((ho + 2, wo + 2, cpad), jnp.float32)
        pad_ref[1:ho + 1, 1:wo + 1, :] = y1n

        acc = jnp.zeros((ho * wo, cpad), jnp.float32)
        for kh in range(3):
            for kw in range(3):
                p = pad_ref[kh:kh + ho, kw:kw + wo, :]
                p = p.reshape(ho * wo, -1).astype(jnp.bfloat16)
                acc = acc + jnp.dot(p, w_ref[kh * 3 + kw],
                                    preferred_element_type=jnp.float32)
        y_ref[...] = acc.reshape(1, ho, wo, cpad)
        st_ref[0, 0:1, :] = jnp.sum(acc, axis=0, keepdims=True)
        st_ref[0, 1:2, :] = jnp.sum(acc * acc, axis=0, keepdims=True)

    return kernel


def _apply_kernel(y2_ref, id_ref, prm_ref, o_ref):
    """Row-tiled epilogue: out = relu(y2*scale2 + shift2 + identity*scale_d + shift_d)."""
    out = (y2_ref[...] * prm_ref[0:1, :] + prm_ref[1:2, :]
           + id_ref[...] * prm_ref[2:3, :] + prm_ref[3:4, :])
    o_ref[...] = jnp.maximum(out, 0.0)


# --------------------------------- glue ---------------------------------------


def _phase_split(xp, stride):
    """Split the spatially padded NHWC image into stride*stride phase images so the
    conv kernel only needs contiguous (unstrided) slices for every 3x3 tap."""
    if stride == 1:
        return [xp]
    return [xp[:, p::stride, q::stride, :]
            for p in range(stride) for q in range(stride)]


def _bn_affine(st, gamma, beta, count, cout, cout_p):
    """Fold training-mode BN (batch statistics, biased variance) into per-channel
    scale/shift from the per-image (sum, sumsq) partials emitted by the conv kernels."""
    s = jnp.sum(st[:, 0, :], axis=0)
    ss = jnp.sum(st[:, 1, :], axis=0)
    mean = s / count
    var = jnp.maximum(ss / count - mean * mean, 0.0)   # guard tiny cancellation
    g = jnp.pad(gamma.astype(jnp.float32), (0, cout_p - cout), constant_values=1.0)
    b = jnp.pad(beta.astype(jnp.float32), (0, cout_p - cout))
    scale = g * lax.rsqrt(var + EPS)
    shift = b - mean * scale
    return scale, shift


@functools.partial(jax.jit, static_argnames=("stride", "downsample"))
def residual_forward(x_nchw, params, stride=1, downsample=False):
    """Pallas implementation of Residual.forward. x is NCHW; output is NCHW."""
    x = jnp.transpose(x_nchw, (0, 2, 3, 1)).astype(jnp.float32)  # -> NHWC
    n, h, w, cin = x.shape
    cout = params["w1"].shape[-1]
    cin_p = _round_up(cin, LANE)      # lane-dense channel padding
    cout_p = _round_up(cout, LANE)
    ho = (h + 2 - 3) // stride + 1
    wo = (w + 2 - 3) // stride + 1
    m = n * ho * wo

    if not downsample:
        # identity skip requires matching shapes (same constraint as the PyTorch module)
        assert cin == cout and stride == 1, "identity skip needs cin==cout and stride==1"

    # spatial halo for the 3x3 conv + channel padding, then phase split (no im2col)
    xp = jnp.pad(x, ((0, 0), (1, 1), (1, 1), (0, cin_p - cin)))
    phases = _phase_split(xp, stride)

    # weights HWIO -> (9, Cin_p, Cout_p), bf16 for the MXU.  Conv biases dropped:
    # a per-channel constant before training-mode BN is cancelled by mean subtraction.
    w1 = jnp.pad(params["w1"], ((0, 0), (0, 0), (0, cin_p - cin), (0, cout_p - cout)))
    w1 = w1.reshape(9, cin_p, cout_p).astype(jnp.bfloat16)
    w2 = jnp.pad(params["w2"], ((0, 0), (0, 0), (0, cout_p - cout), (0, cout_p - cout)))
    w2 = w2.reshape(9, cout_p, cout_p).astype(jnp.bfloat16)

    cp = pltpu.CompilerParams(dimension_semantics=("parallel",),
                              vmem_limit_bytes=48 * 1024 * 1024)

    phase_specs = [pl.BlockSpec((1,) + p.shape[1:], lambda i: (i, 0, 0, 0)) for p in phases]
    img_spec = pl.BlockSpec((1, ho, wo, cout_p), lambda i: (i, 0, 0, 0))
    st_spec = pl.BlockSpec((1, 2, cout_p), lambda i: (i, 0, 0))
    w1_spec = pl.BlockSpec((9, cin_p, cout_p), lambda i: (0, 0, 0))   # resident weights
    w2_spec = pl.BlockSpec((9, cout_p, cout_p), lambda i: (0, 0, 0))
    wd_spec = pl.BlockSpec((cin_p, cout_p), lambda i: (0, 0))
    prm_spec = pl.BlockSpec((8, cout_p), lambda i: (0, 0))

    img_shape = jax.ShapeDtypeStruct((n, ho, wo, cout_p), jnp.float32)
    st_shape = jax.ShapeDtypeStruct((n, 2, cout_p), jnp.float32)

    flops1 = 2 * m * 9 * cin_p * cout_p + (2 * m * cin_p * cout_p if downsample else 0)
    bytes1 = xp.size * 4 + w1.size * 2 + (2 if downsample else 1) * m * cout_p * 4

    # ---- pass 1: conv1 (3x3/stride) [+ fused 1x1/stride downsample conv] + BN partials
    if downsample:
        wd = jnp.pad(params["wd"].reshape(cin, cout),
                     ((0, cin_p - cin), (0, cout_p - cout))).astype(jnp.bfloat16)
        y1_raw, yd_raw, st1, std = pl.pallas_call(
            _make_conv1_kernel(stride, ho, wo, True),
            grid=(n,),
            in_specs=phase_specs + [w1_spec, wd_spec],
            out_specs=(img_spec, img_spec, st_spec, st_spec),
            out_shape=(img_shape, img_shape, st_shape, st_shape),
            compiler_params=cp,
            cost_estimate=pl.CostEstimate(flops=flops1, transcendentals=0,
                                          bytes_accessed=bytes1),
        )(*phases, w1, wd)
    else:
        y1_raw, st1 = pl.pallas_call(
            _make_conv1_kernel(stride, ho, wo, False),
            grid=(n,),
            in_specs=phase_specs + [w1_spec],
            out_specs=(img_spec, st_spec),
            out_shape=(img_shape, st_shape),
            compiler_params=cp,
            cost_estimate=pl.CostEstimate(flops=flops1, transcendentals=0,
                                          bytes_accessed=bytes1),
        )(*phases, w1)

    # fold bn1 (global batch statistics) into scale/shift; pack into one (8, C) slab
    scale1, shift1 = _bn_affine(st1, params["g1"], params["be1"], m, cout, cout_p)
    prm1 = jnp.zeros((8, cout_p), jnp.float32).at[0].set(scale1).at[1].set(shift1)

    # ---- pass 2: relu(bn1(y1)) fused with conv2 (3x3/1) + BN partials for bn2
    y2_raw, st2 = pl.pallas_call(
        _make_conv2_kernel(ho, wo),
        grid=(n,),
        in_specs=[img_spec, prm_spec, w2_spec],
        out_specs=(img_spec, st_spec),
        out_shape=(img_shape, st_shape),
        scratch_shapes=[pltpu.VMEM((ho + 2, wo + 2, cout_p), jnp.float32)],
        compiler_params=cp,
        cost_estimate=pl.CostEstimate(flops=2 * m * 9 * cout_p * cout_p,
                                      transcendentals=0,
                                      bytes_accessed=2 * m * cout_p * 4 + w2.size * 2),
    )(y1_raw, prm1, w2)

    scale2, shift2 = _bn_affine(st2, params["g2"], params["be2"], m, cout, cout_p)
    if downsample:
        scaled, shiftd = _bn_affine(std, params["gd"], params["bed"], m, cout, cout_p)
        id_rows = yd_raw.reshape(m, cout_p)
    else:
        scaled = jnp.ones((cout_p,), jnp.float32)
        shiftd = jnp.zeros((cout_p,), jnp.float32)
        id_rows = jnp.pad(x, ((0, 0), (0, 0), (0, 0), (0, cout_p - cin))).reshape(m, cout_p)

    prm2 = (jnp.zeros((8, cout_p), jnp.float32)
            .at[0].set(scale2).at[1].set(shift2).at[2].set(scaled).at[3].set(shiftd))

    # ---- pass 3: row-tiled epilogue  relu(bn2(y2) + (bn_d(yd) or identity))
    tm = min(256, _round_up(m, 8))
    m_pad = _round_up(m, tm)
    y2_rows = jnp.pad(y2_raw.reshape(m, cout_p), ((0, m_pad - m), (0, 0)))
    id_rows = jnp.pad(id_rows, ((0, m_pad - m), (0, 0)))

    out_rows = pl.pallas_call(
        _apply_kernel,
        grid=(m_pad // tm,),
        in_specs=[pl.BlockSpec((tm, cout_p), lambda i: (i, 0)),
                  pl.BlockSpec((tm, cout_p), lambda i: (i, 0)),
                  prm_spec],
        out_specs=pl.BlockSpec((tm, cout_p), lambda i: (i, 0)),
        out_shape=jax.ShapeDtypeStruct((m_pad, cout_p), jnp.float32),
        compiler_params=cp,
        cost_estimate=pl.CostEstimate(flops=4 * m_pad * cout_p, transcendentals=0,
                                      bytes_accessed=3 * m_pad * cout_p * 4),
    )(y2_rows, id_rows, prm2)

    out = out_rows[:m, :cout].reshape(n, ho, wo, cout)
    return jnp.transpose(out, (0, 3, 1, 2))  # back to NCHW


# ------------------------------ reference -------------------------------------


def residual_reference(x_nchw, params, stride, downsample):
    x = jnp.transpose(x_nchw, (0, 2, 3, 1)).astype(jnp.float32)

    def conv(xx, ww, bb, s, pad):
        y = lax.conv_general_dilated(xx, ww, (s, s), [(pad, pad), (pad, pad)],
                                     dimension_numbers=("NHWC", "HWIO", "NHWC"))
        return y + bb.reshape(1, 1, 1, -1)

    def bn(y, g, b):
        mean = y.mean(axis=(0, 1, 2), keepdims=True)
        var = ((y - mean) ** 2).mean(axis=(0, 1, 2), keepdims=True)
        return (y - mean) * lax.rsqrt(var + EPS) * g.reshape(1, 1, 1, -1) + b.reshape(1, 1, 1, -1)

    out = jax.nn.relu(bn(conv(x, params["w1"], params["b1"], stride, 1),
                         params["g1"], params["be1"]))
    out = bn(conv(out, params["w2"], params["b2"], 1, 1), params["g2"], params["be2"])
    identity = x
    if downsample:
        identity = bn(conv(x, params["wd"], params["bd"], stride, 0),
                      params["gd"], params["bed"])
    return jnp.transpose(jax.nn.relu(identity + out), (0, 3, 1, 2))


# --------------------------------- main ----------------------------------------


def _make_params(key, cin, cout, downsample):
    ks = jax.random.split(key, 12)
    p = {
        "w1": 0.1 * jax.random.normal(ks[0], (3, 3, cin, cout), jnp.float32),
        "b1": 0.05 * jax.random.normal(ks[1], (cout,), jnp.float32),
        "g1": 1.0 + 0.1 * jax.random.normal(ks[2], (cout,), jnp.float32),
        "be1": 0.1 * jax.random.normal(ks[3], (cout,), jnp.float32),
        "w2": 0.1 * jax.random.normal(ks[4], (3, 3, cout, cout), jnp.float32),
        "b2": 0.05 * jax.random.normal(ks[5], (cout,), jnp.float32),
        "g2": 1.0 + 0.1 * jax.random.normal(ks[6], (cout,), jnp.float32),
        "be2": 0.1 * jax.random.normal(ks[7], (cout,), jnp.float32),
    }
    if downsample:
        p.update({
            "wd": 0.1 * jax.random.normal(ks[8], (1, 1, cin, cout), jnp.float32),
            "bd": 0.05 * jax.random.normal(ks[9], (cout,), jnp.float32),
            "gd": 1.0 + 0.1 * jax.random.normal(ks[10], (cout,), jnp.float32),
            "bed": 0.1 * jax.random.normal(ks[11], (cout,), jnp.float32),
        })
    return p


if __name__ == "__main__":
    key = jax.random.PRNGKey(0)
    kx, kp1, kp2 = jax.random.split(key, 3)

    N, Cin, H, W = 2, 4, 16, 16
    x = jax.random.normal(kx, (N, Cin, H, W), jnp.float32)

    # tolerance reflects bf16 MXU inputs (f32 accumulation) vs. the all-f32 reference
    TOL = 4e-2

    # case 1: identity skip (in_channels == out_channels, stride 1, downsample=False)
    params1 = _make_params(kp1, Cin, Cin, downsample=False)
    out1 = jax.block_until_ready(residual_forward(x, params1, stride=1, downsample=False))
    ref1 = residual_reference(x, params1, stride=1, downsample=False)
    assert out1.shape == (N, Cin, H, W)
    assert jnp.allclose(out1, ref1, atol=TOL, rtol=TOL), float(jnp.max(jnp.abs(out1 - ref1)))

    # case 2: projection skip (out_channels = 8, stride 2, downsample=True)
    Cout = 8
    params2 = _make_params(kp2, Cin, Cout, downsample=True)
    out2 = jax.block_until_ready(residual_forward(x, params2, stride=2, downsample=True))
    ref2 = residual_reference(x, params2, stride=2, downsample=True)
    assert out2.shape == (N, Cout, H // 2, W // 2)
    assert jnp.allclose(out2, ref2, atol=TOL, rtol=TOL), float(jnp.max(jnp.abs(out2 - ref2)))

    print("KERNEL_OK")
</pallas_src>

<mosaic_0001>
module attributes {stable_mosaic.version = 11 : i64} {
  func.func @kernel(%arg0: i32, %arg1: memref<1x18x18x128xf32, #tpu.memory_space<vmem>>, %arg2: memref<9x128x128xbf16, #tpu.memory_space<vmem>>, %arg3: memref<1x16x16x128xf32, #tpu.memory_space<vmem>>, %arg4: memref<1x2x128xf32, #tpu.memory_space<vmem>>) attributes {dimension_semantics = [#tpu.dimension_semantics<parallel>], iteration_bounds = array<i64: 2>, scalar_prefetch = 0 : i64, scratch_operands = 0 : i64, tpu.core_type = #tpu.core_type<tc>, window_params = [{transform_indices = @transform_0, window_bounds = array<i64: 1, 18, 18, 128>}, {pipeline_mode = #tpu.pipeline_mode<synchronous>, transform_indices = @transform_1, window_bounds = array<i64: 9, 128, 128>}, {transform_indices = @transform_2, window_bounds = array<i64: 1, 16, 16, 128>}, {transform_indices = @transform_3, window_bounds = array<i64: 1, 2, 128>}]} {
    %cst = arith.constant 0.000000e+00 : f32
    %0 = vector.broadcast %cst : f32 to vector<256x128xf32>
    %c0 = arith.constant 0 : index
    %c0_0 = arith.constant 0 : index
    %c0_1 = arith.constant 0 : index
    %c0_2 = arith.constant 0 : index
    %1 = vector.load %arg1[%c0, %c0_0, %c0_1, %c0_2] : memref<1x18x18x128xf32, #tpu.memory_space<vmem>>, vector<1x16x16x128xf32>
    %2 = vector.shape_cast %1 : vector<1x16x16x128xf32> to vector<16x16x128xf32>
    %3 = vector.shape_cast %2 : vector<16x16x128xf32> to vector<256x128xf32>
    %4 = arith.truncf %3 : vector<256x128xf32> to vector<256x128xbf16>
    %c0_3 = arith.constant 0 : index
    %c0_4 = arith.constant 0 : index
    %c0_5 = arith.constant 0 : index
    %5 = vector.load %arg2[%c0_3, %c0_4, %c0_5] : memref<9x128x128xbf16, #tpu.memory_space<vmem>>, vector<1x128x128xbf16>
    %6 = vector.shape_cast %5 : vector<1x128x128xbf16> to vector<128x128xbf16>
    %cst_6 = arith.constant dense<0.000000e+00> : vector<256x128xf32>
    %7 = tpu.matmul %4, %6, %cst_6 {dimension_numbers = #tpu.dot_dimension_numbers<[1], [0], [0], [1], [0, 0, 1, 1], [], []>} : vector<256x128xbf16>, vector<128x128xbf16>, vector<256x128xf32> -> vector<256x128xf32>
    %8 = arith.addf %0, %7 : vector<256x128xf32>
    %c0_7 = arith.constant 0 : index
    %c0_8 = arith.constant 0 : index
    %c1 = arith.constant 1 : index
    %c0_9 = arith.constant 0 : index
    %9 = vector.load %arg1[%c0_7, %c0_8, %c1, %c0_9] : memref<1x18x18x128xf32, #tpu.memory_space<vmem>>, vector<1x16x16x128xf32>
    %10 = vector.shape_cast %9 : vector<1x16x16x128xf32> to vector<16x16x128xf32>
    %11 = vector.shape_cast %10 : vector<16x16x128xf32> to vector<256x128xf32>
    %12 = arith.truncf %11 : vector<256x128xf32> to vector<256x128xbf16>
    %c1_10 = arith.constant 1 : index
    %c0_11 = arith.constant 0 : index
    %c0_12 = arith.constant 0 : index
    %13 = vector.load %arg2[%c1_10, %c0_11, %c0_12] : memref<9x128x128xbf16, #tpu.memory_space<vmem>>, vector<1x128x128xbf16>
    %14 = vector.shape_cast %13 : vector<1x128x128xbf16> to vector<128x128xbf16>
    %cst_13 = arith.constant dense<0.000000e+00> : vector<256x128xf32>
    %15 = tpu.matmul %12, %14, %cst_13 {dimension_numbers = #tpu.dot_dimension_numbers<[1], [0], [0], [1], [0, 0, 1, 1], [], []>} : vector<256x128xbf16>, vector<128x128xbf16>, vector<256x128xf32> -> vector<256x128xf32>
    %16 = arith.addf %8, %15 : vector<256x128xf32>
    %c0_14 = arith.constant 0 : index
    %c0_15 = arith.constant 0 : index
    %c2 = arith.constant 2 : index
    %c0_16 = arith.constant 0 : index
    %17 = vector.load %arg1[%c0_14, %c0_15, %c2, %c0_16] : memref<1x18x18x128xf32, #tpu.memory_space<vmem>>, vector<1x16x16x128xf32>
    %18 = vector.shape_cast %17 : vector<1x16x16x128xf32> to vector<16x16x128xf32>
    %19 = vector.shape_cast %18 : vector<16x16x128xf32> to vector<256x128xf32>
    %20 = arith.truncf %19 : vector<256x128xf32> to vector<256x128xbf16>
    %c2_17 = arith.constant 2 : index
    %c0_18 = arith.constant 0 : index
    %c0_19 = arith.constant 0 : index
    %21 = vector.load %arg2[%c2_17, %c0_18, %c0_19] : memref<9x128x128xbf16, #tpu.memory_space<vmem>>, vector<1x128x128xbf16>
    %22 = vector.shape_cast %21 : vector<1x128x128xbf16> to vector<128x128xbf16>
    %cst_20 = arith.constant dense<0.000000e+00> : vector<256x128xf32>
    %23 = tpu.matmul %20, %22, %cst_20 {dimension_numbers = #tpu.dot_dimension_numbers<[1], [0], [0], [1], [0, 0, 1, 1], [], []>} : vector<256x128xbf16>, vector<128x128xbf16>, vector<256x128xf32> -> vector<256x128xf32>
    %24 = arith.addf %16, %23 : vector<256x128xf32>
    %c0_21 = arith.constant 0 : index
    %c1_22 = arith.constant 1 : index
    %c0_23 = arith.constant 0 : index
    %c0_24 = arith.constant 0 : index
    %25 = vector.load %arg1[%c0_21, %c1_22, %c0_23, %c0_24] : memref<1x18x18x128xf32, #tpu.memory_space<vmem>>, vector<1x16x16x128xf32>
    %26 = vector.shape_cast %25 : vector<1x16x16x128xf32> to vector<16x16x128xf32>
    %27 = vector.shape_cast %26 : vector<16x16x128xf32> to vector<256x128xf32>
    %28 = arith.truncf %27 : vector<256x128xf32> to vector<256x128xbf16>
    %c3 = arith.constant 3 : index
    %c0_25 = arith.constant 0 : index
    %c0_26 = arith.constant 0 : index
    %29 = vector.load %arg2[%c3, %c0_25, %c0_26] : memref<9x128x128xbf16, #tpu.memory_space<vmem>>, vector<1x128x128xbf16>
    %30 = vector.shape_cast %29 : vector<1x128x128xbf16> to vector<128x128xbf16>
    %cst_27 = arith.constant dense<0.000000e+00> : vector<256x128xf32>
    %31 = tpu.matmul %28, %30, %cst_27 {dimension_numbers = #tpu.dot_dimension_numbers<[1], [0], [0], [1], [0, 0, 1, 1], [], []>} : vector<256x128xbf16>, vector<128x128xbf16>, vector<256x128xf32> -> vector<256x128xf32>
    %32 = arith.addf %24, %31 : vector<256x128xf32>
    %c0_28 = arith.constant 0 : index
    %c1_29 = arith.constant 1 : index
    %c1_30 = arith.constant 1 : index
    %c0_31 = arith.constant 0 : index
    %33 = vector.load %arg1[%c0_28, %c1_29, %c1_30, %c0_31] : memref<1x18x18x128xf32, #tpu.memory_space<vmem>>, vector<1x16x16x128xf32>
    %34 = vector.shape_cast %33 : vector<1x16x16x128xf32> to vector<16x16x128xf32>
    %35 = vector.shape_cast %34 : vector<16x16x128xf32> to vector<256x128xf32>
    %36 = arith.truncf %35 : vector<256x128xf32> to vector<256x128xbf16>
    %c4 = arith.constant 4 : index
    %c0_32 = arith.constant 0 : index
    %c0_33 = arith.constant 0 : index
    %37 = vector.load %arg2[%c4, %c0_32, %c0_33] : memref<9x128x128xbf16, #tpu.memory_space<vmem>>, vector<1x128x128xbf16>
    %38 = vector.shape_cast %37 : vector<1x128x128xbf16> to vector<128x128xbf16>
    %cst_34 = arith.constant dense<0.000000e+00> : vector<256x128xf32>
    %39 = tpu.matmul %36, %38, %cst_34 {dimension_numbers = #tpu.dot_dimension_numbers<[1], [0], [0], [1], [0, 0, 1, 1], [], []>} : vector<256x128xbf16>, vector<128x128xbf16>, vector<256x128xf32> -> vector<256x128xf32>
    %40 = arith.addf %32, %39 : vector<256x128xf32>
    %c0_35 = arith.constant 0 : index
    %c1_36 = arith.constant 1 : index
    %c2_37 = arith.constant 2 : index
    %c0_38 = arith.constant 0 : index
    %41 = vector.load %arg1[%c0_35, %c1_36, %c2_37, %c0_38] : memref<1x18x18x128xf32, #tpu.memory_space<vmem>>, vector<1x16x16x128xf32>
    %42 = vector.shape_cast %41 : vector<1x16x16x128xf32> to vector<16x16x128xf32>
    %43 = vector.shape_cast %42 : vector<16x16x128xf32> to vector<256x128xf32>
    %44 = arith.truncf %43 : vector<256x128xf32> to vector<256x128xbf16>
    %c5 = arith.constant 5 : index
    %c0_39 = arith.constant 0 : index
    %c0_40 = arith.constant 0 : index
    %45 = vector.load %arg2[%c5, %c0_39, %c0_40] : memref<9x128x128xbf16, #tpu.memory_space<vmem>>, vector<1x128x128xbf16>
    %46 = vector.shape_cast %45 : vector<1x128x128xbf16> to vector<128x128xbf16>
    %cst_41 = arith.constant dense<0.000000e+00> : vector<256x128xf32>
    %47 = tpu.matmul %44, %46, %cst_41 {dimension_numbers = #tpu.dot_dimension_numbers<[1], [0], [0], [1], [0, 0, 1, 1], [], []>} : vector<256x128xbf16>, vector<128x128xbf16>, vector<256x128xf32> -> vector<256x128xf32>
    %48 = arith.addf %40, %47 : vector<256x128xf32>
    %c0_42 = arith.constant 0 : index
    %c2_43 = arith.constant 2 : index
    %c0_44 = arith.constant 0 : index
    %c0_45 = arith.constant 0 : index
    %49 = vector.load %arg1[%c0_42, %c2_43, %c0_44, %c0_45] : memref<1x18x18x128xf32, #tpu.memory_space<vmem>>, vector<1x16x16x128xf32>
    %50 = vector.shape_cast %49 : vector<1x16x16x128xf32> to vector<16x16x128xf32>
    %51 = vector.shape_cast %50 : vector<16x16x128xf32> to vector<256x128xf32>
    %52 = arith.truncf %51 : vector<256x128xf32> to vector<256x128xbf16>
    %c6 = arith.constant 6 : index
    %c0_46 = arith.constant 0 : index
    %c0_47 = arith.constant 0 : index
    %53 = vector.load %arg2[%c6, %c0_46, %c0_47] : memref<9x128x128xbf16, #tpu.memory_space<vmem>>, vector<1x128x128xbf16>
    %54 = vector.shape_cast %53 : vector<1x128x128xbf16> to vector<128x128xbf16>
    %cst_48 = arith.constant dense<0.000000e+00> : vector<256x128xf32>
    %55 = tpu.matmul %52, %54, %cst_48 {dimension_numbers = #tpu.dot_dimension_numbers<[1], [0], [0], [1], [0, 0, 1, 1], [], []>} : vector<256x128xbf16>, vector<128x128xbf16>, vector<256x128xf32> -> vector<256x128xf32>
    %56 = arith.addf %48, %55 : vector<256x128xf32>
    %c0_49 = arith.constant 0 : index
    %c2_50 = arith.constant 2 : index
    %c1_51 = arith.constant 1 : index
    %c0_52 = arith.constant 0 : index
    %57 = vector.load %arg1[%c0_49, %c2_50, %c1_51, %c0_52] : memref<1x18x18x128xf32, #tpu.memory_space<vmem>>, vector<1x16x16x128xf32>
    %58 = vector.shape_cast %57 : vector<1x16x16x128xf32> to vector<16x16x128xf32>
    %59 = vector.shape_cast %58 : vector<16x16x128xf32> to vector<256x128xf32>
    %60 = arith.truncf %59 : vector<256x128xf32> to vector<256x128xbf16>
    %c7 = arith.constant 7 : index
    %c0_53 = arith.constant 0 : index
    %c0_54 = arith.constant 0 : index
    %61 = vector.load %arg2[%c7, %c0_53, %c0_54] : memref<9x128x128xbf16, #tpu.memory_space<vmem>>, vector<1x128x128xbf16>
    %62 = vector.shape_cast %61 : vector<1x128x128xbf16> to vector<128x128xbf16>
    %cst_55 = arith.constant dense<0.000000e+00> : vector<256x128xf32>
    %63 = tpu.matmul %60, %62, %cst_55 {dimension_numbers = #tpu.dot_dimension_numbers<[1], [0], [0], [1], [0, 0, 1, 1], [], []>} : vector<256x128xbf16>, vector<128x128xbf16>, vector<256x128xf32> -> vector<256x128xf32>
    %64 = arith.addf %56, %63 : vector<256x128xf32>
    %c0_56 = arith.constant 0 : index
    %c2_57 = arith.constant 2 : index
    %c2_58 = arith.constant 2 : index
    %c0_59 = arith.constant 0 : index
    %65 = vector.load %arg1[%c0_56, %c2_57, %c2_58, %c0_59] : memref<1x18x18x128xf32, #tpu.memory_space<vmem>>, vector<1x16x16x128xf32>
    %66 = vector.shape_cast %65 : vector<1x16x16x128xf32> to vector<16x16x128xf32>
    %67 = vector.shape_cast %66 : vector<16x16x128xf32> to vector<256x128xf32>
    %68 = arith.truncf %67 : vector<256x128xf32> to vector<256x128xbf16>
    %c8 = arith.constant 8 : index
    %c0_60 = arith.constant 0 : index
    %c0_61 = arith.constant 0 : index
    %69 = vector.load %arg2[%c8, %c0_60, %c0_61] : memref<9x128x128xbf16, #tpu.memory_space<vmem>>, vector<1x128x128xbf16>
    %70 = vector.shape_cast %69 : vector<1x128x128xbf16> to vector<128x128xbf16>
    %cst_62 = arith.constant dense<0.000000e+00> : vector<256x128xf32>
    %71 = tpu.matmul %68, %70, %cst_62 {dimension_numbers = #tpu.dot_dimension_numbers<[1], [0], [0], [1], [0, 0, 1, 1], [], []>} : vector<256x128xbf16>, vector<128x128xbf16>, vector<256x128xf32> -> vector<256x128xf32>
    %72 = arith.addf %64, %71 : vector<256x128xf32>
    %73 = vector.shape_cast %72 : vector<256x128xf32> to vector<1x16x16x128xf32>
    %c0_63 = arith.constant 0 : index
    %c0_64 = arith.constant 0 : index
    %c0_65 = arith.constant 0 : index
    %c0_66 = arith.constant 0 : index
    %74 = vector.load %arg3[%c0_63, %c0_64, %c0_65, %c0_66] : memref<1x16x16x128xf32, #tpu.memory_space<vmem>>, vector<1x16x16x128xf32>
    tpu.vector_store %arg3[%c0_63, %c0_64, %c0_65, %c0_66], %73 {strides = array<i32>} : memref<1x16x16x128xf32, #tpu.memory_space<vmem>>, vector<1x16x16x128xf32>,
    %cst_67 = arith.constant dense<0.000000e+00> : vector<128xf32>
    %75 = vector.multi_reduction <add>, %72, %cst_67 [0] : vector<256x128xf32> to vector<128xf32>
    %76 = vector.shape_cast %75 : vector<128xf32> to vector<1x128xf32>
    %c0_68 = arith.constant 0 : index
    %c0_69 = arith.constant 0 : index
    %c0_70 = arith.constant 0 : index
    %77 = vector.load %arg4[%c0_68, %c0_69, %c0_70] : memref<1x2x128xf32, #tpu.memory_space<vmem>>, vector<1x1x128xf32>
    %78 = vector.shape_cast %77 : vector<1x1x128xf32> to vector<1x128xf32>
    %79 = vector.shape_cast %76 : vector<1x128xf32> to vector<1x1x128xf32>
    tpu.vector_store %arg4[%c0_68, %c0_69, %c0_70], %79 {strides = array<i32>} : memref<1x2x128xf32, #tpu.memory_space<vmem>>, vector<1x1x128xf32>,
    %80 = arith.mulf %72, %72 : vector<256x128xf32>
    %cst_71 = arith.constant dense<0.000000e+00> : vector<128xf32>
    %81 = vector.multi_reduction <add>, %80, %cst_71 [0] : vector<256x128xf32> to vector<128xf32>
    %82 = vector.shape_cast %81 : vector<128xf32> to vector<1x128xf32>
    %c0_72 = arith.constant 0 : index
    %c1_73 = arith.constant 1 : index
    %c0_74 = arith.constant 0 : index
    %83 = vector.load %arg4[%c0_72, %c1_73, %c0_74] : memref<1x2x128xf32, #tpu.memory_space<vmem>>, vector<1x1x128xf32>
    %84 = vector.shape_cast %83 : vector<1x1x128xf32> to vector<1x128xf32>
    %85 = vector.shape_cast %82 : vector<1x128xf32> to vector<1x1x128xf32>
    tpu.vector_store %arg4[%c0_72, %c1_73, %c0_74], %85 {strides = array<i32>} : memref<1x2x128xf32, #tpu.memory_space<vmem>>, vector<1x1x128xf32>,
    return
  }
  func.func @transform_0(%arg0: i32) -> (i32, i32, i32, i32) {
    %c0_i32 = arith.constant 0 : i32
    %c0_i32_0 = arith.constant 0 : i32
    %c0_i32_1 = arith.constant 0 : i32
    %c0_i32_2 = arith.constant 0 : i32
    return %arg0, %c0_i32, %c0_i32_0, %c0_i32_1 : i32, i32, i32, i32
  }
  func.func @transform_1(%arg0: i32) -> (i32, i32, i32) {
    %c0_i32 = arith.constant 0 : i32
    %c0_i32_0 = arith.constant 0 : i32
    %c0_i32_1 = arith.constant 0 : i32
    %c0_i32_2 = arith.constant 0 : i32
    return %c0_i32, %c0_i32_0, %c0_i32_1 : i32, i32, i32
  }
  func.func @transform_2(%arg0: i32) -> (i32, i32, i32, i32) {
    %c0_i32 = arith.constant 0 : i32
    %c0_i32_0 = arith.constant 0 : i32
    %c0_i32_1 = arith.constant 0 : i32
    %c0_i32_2 = arith.constant 0 : i32
    return %arg0, %c0_i32, %c0_i32_0, %c0_i32_1 : i32, i32, i32, i32
  }
  func.func @transform_3(%arg0: i32) -> (i32, i32, i32) {
    %c0_i32 = arith.constant 0 : i32
    %c0_i32_0 = arith.constant 0 : i32
    %c0_i32_1 = arith.constant 0 : i32
    return %arg0, %c0_i32, %c0_i32_0 : i32, i32, i32
  }
}

module attributes {stable_mosaic.version = 11 : i64} {
  func.func @kernel(%arg0: i32, %arg1: memref<1x16x16x128xf32, #tpu.memory_space<vmem>>, %arg2: memref<8x128xf32, #tpu.memory_space<vmem>>, %arg3: memref<9x128x128xbf16, #tpu.memory_space<vmem>>, %arg4: memref<1x16x16x128xf32, #tpu.memory_space<vmem>>, %arg5: memref<1x2x128xf32, #tpu.memory_space<vmem>>, %arg6: memref<18x18x128xf32, #tpu.memory_space<vmem>>) attributes {dimension_semantics = [#tpu.dimension_semantics<parallel>], iteration_bounds = array<i64: 2>, scalar_prefetch = 0 : i64, scratch_operands = 1 : i64, tpu.core_type = #tpu.core_type<tc>, window_params = [{transform_indices = @transform_0, window_bounds = array<i64: 1, 16, 16, 128>}, {pipeline_mode = #tpu.pipeline_mode<synchronous>, transform_indices = @transform_1, window_bounds = array<i64: 8, 128>}, {pipeline_mode = #tpu.pipeline_mode<synchronous>, transform_indices = @transform_2, window_bounds = array<i64: 9, 128, 128>}, {transform_indices = @transform_3, window_bounds = array<i64: 1, 16, 16, 128>}, {transform_indices = @transform_4, window_bounds = array<i64: 1, 2, 128>}]} {
    %c0 = arith.constant 0 : index
    %c0_0 = arith.constant 0 : index
    %0 = vector.load %arg2[%c0, %c0_0] : memref<8x128xf32, #tpu.memory_space<vmem>>, vector<1x128xf32>
    %1 = vector.shape_cast %0 : vector<1x128xf32> to vector<1x1x128xf32>
    %c1 = arith.constant 1 : index
    %c0_1 = arith.constant 0 : index
    %2 = vector.load %arg2[%c1, %c0_1] : memref<8x128xf32, #tpu.memory_space<vmem>>, vector<1x128xf32>
    %3 = vector.shape_cast %2 : vector<1x128xf32> to vector<1x1x128xf32>
    %c0_2 = arith.constant 0 : index
    %c0_3 = arith.constant 0 : index
    %c0_4 = arith.constant 0 : index
    %c0_5 = arith.constant 0 : index
    %4 = vector.load %arg1[%c0_2, %c0_3, %c0_4, %c0_5] : memref<1x16x16x128xf32, #tpu.memory_space<vmem>>, vector<1x16x16x128xf32>
    %5 = vector.shape_cast %4 : vector<1x16x16x128xf32> to vector<16x16x128xf32>
    %6 = vector.broadcast %1 : vector<1x1x128xf32> to vector<16x16x128xf32>
    %7 = arith.mulf %5, %6 : vector<16x16x128xf32>
    %8 = vector.broadcast %3 : vector<1x1x128xf32> to vector<16x16x128xf32>
    %9 = arith.addf %7, %8 : vector<16x16x128xf32>
    %cst = arith.constant 0.000000e+00 : f32
    %10 = vector.broadcast %cst : f32 to vector<16x16x128xf32>
    %11 = arith.maximumf %9, %10 : vector<16x16x128xf32>
    %cst_6 = arith.constant 0.000000e+00 : f32
    %12 = vector.broadcast %cst_6 : f32 to vector<18x18x128xf32>
    %c0_7 = arith.constant 0 : index
    %c0_8 = arith.constant 0 : index
    %c0_9 = arith.constant 0 : index
    %13 = vector.load %arg6[%c0_7, %c0_8, %c0_9] : memref<18x18x128xf32, #tpu.memory_space<vmem>>, vector<18x18x128xf32>
    tpu.vector_store %arg6[%c0_7, %c0_8, %c0_9], %12 {strides = array<i32>} : memref<18x18x128xf32, #tpu.memory_space<vmem>>, vector<18x18x128xf32>,
    %c1_10 = arith.constant 1 : index
    %c1_11 = arith.constant 1 : index
    %c0_12 = arith.constant 0 : index
    %14 = vector.load %arg6[%c1_10, %c1_11, %c0_12] : memref<18x18x128xf32, #tpu.memory_space<vmem>>, vector<16x16x128xf32>
    tpu.vector_store %arg6[%c1_10, %c1_11, %c0_12], %11 {strides = array<i32>} : memref<18x18x128xf32, #tpu.memory_space<vmem>>, vector<16x16x128xf32>,
    %cst_13 = arith.constant 0.000000e+00 : f32
    %15 = vector.broadcast %cst_13 : f32 to vector<256x128xf32>
    %c0_14 = arith.constant 0 : index
    %c0_15 = arith.constant 0 : index
    %c0_16 = arith.constant 0 : index
    %16 = vector.load %arg6[%c0_14, %c0_15, %c0_16] : memref<18x18x128xf32, #tpu.memory_space<vmem>>, vector<16x16x128xf32>
    %17 = vector.shape_cast %16 : vector<16x16x128xf32> to vector<256x128xf32>
    %18 = arith.truncf %17 : vector<256x128xf32> to vector<256x128xbf16>
    %c0_17 = arith.constant 0 : index
    %c0_18 = arith.constant 0 : index
    %c0_19 = arith.constant 0 : index
    %19 = vector.load %arg3[%c0_17, %c0_18, %c0_19] : memref<9x128x128xbf16, #tpu.memory_space<vmem>>, vector<1x128x128xbf16>
    %20 = vector.shape_cast %19 : vector<1x128x128xbf16> to vector<128x128xbf16>
    %cst_20 = arith.constant dense<0.000000e+00> : vector<256x128xf32>
    %21 = tpu.matmul %18, %20, %cst_20 {dimension_numbers = #tpu.dot_dimension_numbers<[1], [0], [0], [1], [0, 0, 1, 1], [], []>} : vector<256x128xbf16>, vector<128x128xbf16>, vector<256x128xf32> -> vector<256x128xf32>
    %22 = arith.addf %15, %21 : vector<256x128xf32>
    %c0_21 = arith.constant 0 : index
    %c1_22 = arith.constant 1 : index
    %c0_23 = arith.constant 0 : index
    %23 = vector.load %arg6[%c0_21, %c1_22, %c0_23] : memref<18x18x128xf32, #tpu.memory_space<vmem>>, vector<16x16x128xf32>
    %24 = vector.shape_cast %23 : vector<16x16x128xf32> to vector<256x128xf32>
    %25 = arith.truncf %24 : vector<256x128xf32> to vector<256x128xbf16>
    %c1_24 = arith.constant 1 : index
    %c0_25 = arith.constant 0 : index
    %c0_26 = arith.constant 0 : index
    %26 = vector.load %arg3[%c1_24, %c0_25, %c0_26] : memref<9x128x128xbf16, #tpu.memory_space<vmem>>, vector<1x128x128xbf16>
    %27 = vector.shape_cast %26 : vector<1x128x128xbf16> to vector<128x128xbf16>
    %cst_27 = arith.constant dense<0.000000e+00> : vector<256x128xf32>
    %28 = tpu.matmul %25, %27, %cst_27 {dimension_numbers = #tpu.dot_dimension_numbers<[1], [0], [0], [1], [0, 0, 1, 1], [], []>} : vector<256x128xbf16>, vector<128x128xbf16>, vector<256x128xf32> -> vector<256x128xf32>
    %29 = arith.addf %22, %28 : vector<256x128xf32>
    %c0_28 = arith.constant 0 : index
    %c2 = arith.constant 2 : index
    %c0_29 = arith.constant 0 : index
    %30 = vector.load %arg6[%c0_28, %c2, %c0_29] : memref<18x18x128xf32, #tpu.memory_space<vmem>>, vector<16x16x128xf32>
    %31 = vector.shape_cast %30 : vector<16x16x128xf32> to vector<256x128xf32>
    %32 = arith.truncf %31 : vector<256x128xf32> to vector<256x128xbf16>
    %c2_30 = arith.constant 2 : index
    %c0_31 = arith.constant 0 : index
    %c0_32 = arith.constant 0 : index
    %33 = vector.load %arg3[%c2_30, %c0_31, %c0_32] : memref<9x128x128xbf16, #tpu.memory_space<vmem>>, vector<1x128x128xbf16>
    %34 = vector.shape_cast %33 : vector<1x128x128xbf16> to vector<128x128xbf16>
    %cst_33 = arith.constant dense<0.000000e+00> : vector<256x128xf32>
    %35 = tpu.matmul %32, %34, %cst_33 {dimension_numbers = #tpu.dot_dimension_numbers<[1], [0], [0], [1], [0, 0, 1, 1], [], []>} : vector<256x128xbf16>, vector<128x128xbf16>, vector<256x128xf32> -> vector<256x128xf32>
    %36 = arith.addf %29, %35 : vector<256x128xf32>
    %c1_34 = arith.constant 1 : index
    %c0_35 = arith.constant 0 : index
    %c0_36 = arith.constant 0 : index
    %37 = vector.load %arg6[%c1_34, %c0_35, %c0_36] : memref<18x18x128xf32, #tpu.memory_space<vmem>>, vector<16x16x128xf32>
    %38 = vector.shape_cast %37 : vector<16x16x128xf32> to vector<256x128xf32>
    %39 = arith.truncf %38 : vector<256x128xf32> to vector<256x128xbf16>
    %c3 = arith.constant 3 : index
    %c0_37 = arith.constant 0 : index
    %c0_38 = arith.constant 0 : index
    %40 = vector.load %arg3[%c3, %c0_37, %c0_38] : memref<9x128x128xbf16, #tpu.memory_space<vmem>>, vector<1x128x128xbf16>
    %41 = vector.shape_cast %40 : vector<1x128x128xbf16> to vector<128x128xbf16>
    %cst_39 = arith.constant dense<0.000000e+00> : vector<256x128xf32>
    %42 = tpu.matmul %39, %41, %cst_39 {dimension_numbers = #tpu.dot_dimension_numbers<[1], [0], [0], [1], [0, 0, 1, 1], [], []>} : vector<256x128xbf16>, vector<128x128xbf16>, vector<256x128xf32> -> vector<256x128xf32>
    %43 = arith.addf %36, %42 : vector<256x128xf32>
    %c1_40 = arith.constant 1 : index
    %c1_41 = arith.constant 1 : index
    %c0_42 = arith.constant 0 : index
    %44 = vector.load %arg6[%c1_40, %c1_41, %c0_42] : memref<18x18x128xf32, #tpu.memory_space<vmem>>, vector<16x16x128xf32>
    %45 = vector.shape_cast %44 : vector<16x16x128xf32> to vector<256x128xf32>
    %46 = arith.truncf %45 : vector<256x128xf32> to vector<256x128xbf16>
    %c4 = arith.constant 4 : index
    %c0_43 = arith.constant 0 : index
    %c0_44 = arith.constant 0 : index
    %47 = vector.load %arg3[%c4, %c0_43, %c0_44] : memref<9x128x128xbf16, #tpu.memory_space<vmem>>, vector<1x128x128xbf16>
    %48 = vector.shape_cast %47 : vector<1x128x128xbf16> to vector<128x128xbf16>
    %cst_45 = arith.constant dense<0.000000e+00> : vector<256x128xf32>
    %49 = tpu.matmul %46, %48, %cst_45 {dimension_numbers = #tpu.dot_dimension_numbers<[1], [0], [0], [1], [0, 0, 1, 1], [], []>} : vector<256x128xbf16>, vector<128x128xbf16>, vector<256x128xf32> -> vector<256x128xf32>
    %50 = arith.addf %43, %49 : vector<256x128xf32>
    %c1_46 = arith.constant 1 : index
    %c2_47 = arith.constant 2 : index
    %c0_48 = arith.constant 0 : index
    %51 = vector.load %arg6[%c1_46, %c2_47, %c0_48] : memref<18x18x128xf32, #tpu.memory_space<vmem>>, vector<16x16x128xf32>
    %52 = vector.shape_cast %51 : vector<16x16x128xf32> to vector<256x128xf32>
    %53 = arith.truncf %52 : vector<256x128xf32> to vector<256x128xbf16>
    %c5 = arith.constant 5 : index
    %c0_49 = arith.constant 0 : index
    %c0_50 = arith.constant 0 : index
    %54 = vector.load %arg3[%c5, %c0_49, %c0_50] : memref<9x128x128xbf16, #tpu.memory_space<vmem>>, vector<1x128x128xbf16>
    %55 = vector.shape_cast %54 : vector<1x128x128xbf16> to vector<128x128xbf16>
    %cst_51 = arith.constant dense<0.000000e+00> : vector<256x128xf32>
    %56 = tpu.matmul %53, %55, %cst_51 {dimension_numbers = #tpu.dot_dimension_numbers<[1], [0], [0], [1], [0, 0, 1, 1], [], []>} : vector<256x128xbf16>, vector<128x128xbf16>, vector<256x128xf32> -> vector<256x128xf32>
    %57 = arith.addf %50, %56 : vector<256x128xf32>
    %c2_52 = arith.constant 2 : index
    %c0_53 = arith.constant 0 : index
    %c0_54 = arith.constant 0 : index
    %58 = vector.load %arg6[%c2_52, %c0_53, %c0_54] : memref<18x18x128xf32, #tpu.memory_space<vmem>>, vector<16x16x128xf32>
    %59 = vector.shape_cast %58 : vector<16x16x128xf32> to vector<256x128xf32>
    %60 = arith.truncf %59 : vector<256x128xf32> to vector<256x128xbf16>
    %c6 = arith.constant 6 : index
    %c0_55 = arith.constant 0 : index
    %c0_56 = arith.constant 0 : index
    %61 = vector.load %arg3[%c6, %c0_55, %c0_56] : memref<9x128x128xbf16, #tpu.memory_space<vmem>>, vector<1x128x128xbf16>
    %62 = vector.shape_cast %61 : vector<1x128x128xbf16> to vector<128x128xbf16>
    %cst_57 = arith.constant dense<0.000000e+00> : vector<256x128xf32>
    %63 = tpu.matmul %60, %62, %cst_57 {dimension_numbers = #tpu.dot_dimension_numbers<[1], [0], [0], [1], [0, 0, 1, 1], [], []>} : vector<256x128xbf16>, vector<128x128xbf16>, vector<256x128xf32> -> vector<256x128xf32>
    %64 = arith.addf %57, %63 : vector<256x128xf32>
    %c2_58 = arith.constant 2 : index
    %c1_59 = arith.constant 1 : index
    %c0_60 = arith.constant 0 : index
    %65 = vector.load %arg6[%c2_58, %c1_59, %c0_60] : memref<18x18x128xf32, #tpu.memory_space<vmem>>, vector<16x16x128xf32>
    %66 = vector.shape_cast %65 : vector<16x16x128xf32> to vector<256x128xf32>
    %67 = arith.truncf %66 : vector<256x128xf32> to vector<256x128xbf16>
    %c7 = arith.constant 7 : index
    %c0_61 = arith.constant 0 : index
    %c0_62 = arith.constant 0 : index
    %68 = vector.load %arg3[%c7, %c0_61, %c0_62] : memref<9x128x128xbf16, #tpu.memory_space<vmem>>, vector<1x128x128xbf16>
    %69 = vector.shape_cast %68 : vector<1x128x128xbf16> to vector<128x128xbf16>
    %cst_63 = arith.constant dense<0.000000e+00> : vector<256x128xf32>
    %70 = tpu.matmul %67, %69, %cst_63 {dimension_numbers = #tpu.dot_dimension_numbers<[1], [0], [0], [1], [0, 0, 1, 1], [], []>} : vector<256x128xbf16>, vector<128x128xbf16>, vector<256x128xf32> -> vector<256x128xf32>
    %71 = arith.addf %64, %70 : vector<256x128xf32>
    %c2_64 = arith.constant 2 : index
    %c2_65 = arith.constant 2 : index
    %c0_66 = arith.constant 0 : index
    %72 = vector.load %arg6[%c2_64, %c2_65, %c0_66] : memref<18x18x128xf32, #tpu.memory_space<vmem>>, vector<16x16x128xf32>
    %73 = vector.shape_cast %72 : vector<16x16x128xf32> to vector<256x128xf32>
    %74 = arith.truncf %73 : vector<256x128xf32> to vector<256x128xbf16>
    %c8 = arith.constant 8 : index
    %c0_67 = arith.constant 0 : index
    %c0_68 = arith.constant 0 : index
    %75 = vector.load %arg3[%c8, %c0_67, %c0_68] : memref<9x128x128xbf16, #tpu.memory_space<vmem>>, vector<1x128x128xbf16>
    %76 = vector.shape_cast %75 : vector<1x128x128xbf16> to vector<128x128xbf16>
    %cst_69 = arith.constant dense<0.000000e+00> : vector<256x128xf32>
    %77 = tpu.matmul %74, %76, %cst_69 {dimension_numbers = #tpu.dot_dimension_numbers<[1], [0], [0], [1], [0, 0, 1, 1], [], []>} : vector<256x128xbf16>, vector<128x128xbf16>, vector<256x128xf32> -> vector<256x128xf32>
    %78 = arith.addf %71, %77 : vector<256x128xf32>
    %79 = vector.shape_cast %78 : vector<256x128xf32> to vector<1x16x16x128xf32>
    %c0_70 = arith.constant 0 : index
    %c0_71 = arith.constant 0 : index
    %c0_72 = arith.constant 0 : index
    %c0_73 = arith.constant 0 : index
    %80 = vector.load %arg4[%c0_70, %c0_71, %c0_72, %c0_73] : memref<1x16x16x128xf32, #tpu.memory_space<vmem>>, vector<1x16x16x128xf32>
    tpu.vector_store %arg4[%c0_70, %c0_71, %c0_72, %c0_73], %79 {strides = array<i32>} : memref<1x16x16x128xf32, #tpu.memory_space<vmem>>, vector<1x16x16x128xf32>,
    %cst_74 = arith.constant dense<0.000000e+00> : vector<128xf32>
    %81 = vector.multi_reduction <add>, %78, %cst_74 [0] : vector<256x128xf32> to vector<128xf32>
    %82 = vector.shape_cast %81 : vector<128xf32> to vector<1x128xf32>
    %c0_75 = arith.constant 0 : index
    %c0_76 = arith.constant 0 : index
    %c0_77 = arith.constant 0 : index
    %83 = vector.load %arg5[%c0_75, %c0_76, %c0_77] : memref<1x2x128xf32, #tpu.memory_space<vmem>>, vector<1x1x128xf32>
    %84 = vector.shape_cast %83 : vector<1x1x128xf32> to vector<1x128xf32>
    %85 = vector.shape_cast %82 : vector<1x128xf32> to vector<1x1x128xf32>
    tpu.vector_store %arg5[%c0_75, %c0_76, %c0_77], %85 {strides = array<i32>} : memref<1x2x128xf32, #tpu.memory_space<vmem>>, vector<1x1x128xf32>,
    %86 = arith.mulf %78, %78 : vector<256x128xf32>
    %cst_78 = arith.constant dense<0.000000e+00> : vector<128xf32>
    %87 = vector.multi_reduction <add>, %86, %cst_78 [0] : vector<256x128xf32> to vector<128xf32>
    %88 = vector.shape_cast %87 : vector<128xf32> to vector<1x128xf32>
    %c0_79 = arith.constant 0 : index
    %c1_80 = arith.constant 1 : index
    %c0_81 = arith.constant 0 : index
    %89 = vector.load %arg5[%c0_79, %c1_80, %c0_81] : memref<1x2x128xf32, #tpu.memory_space<vmem>>, vector<1x1x128xf32>
    %90 = vector.shape_cast %89 : vector<1x1x128xf32> to vector<1x128xf32>
    %91 = vector.shape_cast %88 : vector<1x128xf32> to vector<1x1x128xf32>
    tpu.vector_store %arg5[%c0_79, %c1_80, %c0_81], %91 {strides = array<i32>} : memref<1x2x128xf32, #tpu.memory_space<vmem>>, vector<1x1x128xf32>,
    return
  }
  func.func @transform_0(%arg0: i32) -> (i32, i32, i32, i32) {
    %c0_i32 = arith.constant 0 : i32
    %c0_i32_0 = arith.constant 0 : i32
    %c0_i32_1 = arith.constant 0 : i32
    %c0_i32_2 = arith.constant 0 : i32
    return %arg0, %c0_i32, %c0_i32_0, %c0_i32_1 : i32, i32, i32, i32
  }
  func.func @transform_1(%arg0: i32) -> (i32, i32) {
    %c0_i32 = arith.constant 0 : i32
    %c0_i32_0 = arith.constant 0 : i32
    %c0_i32_1 = arith.constant 0 : i32
    return %c0_i32, %c0_i32_0 : i32, i32
  }
  func.func @transform_2(%arg0: i32) -> (i32, i32, i32) {
    %c0_i32 = arith.constant 0 : i32
    %c0_i32_0 = arith.constant 0 : i32
    %c0_i32_1 = arith.constant 0 : i32
    %c0_i32_2 = arith.constant 0 : i32
    return %c0_i32, %c0_i32_0, %c0_i32_1 : i32, i32, i32
  }
  func.func @transform_3(%arg0: i32) -> (i32, i32, i32, i32) {
    %c0_i32 = arith.constant 0 : i32
    %c0_i32_0 = arith.constant 0 : i32
    %c0_i32_1 = arith.constant 0 : i32
    %c0_i32_2 = arith.constant 0 : i32
    return %arg0, %c0_i32, %c0_i32_0, %c0_i32_1 : i32, i32, i32, i32
  }
  func.func @transform_4(%arg0: i32) -> (i32, i32, i32) {
    %c0_i32 = arith.constant 0 : i32
    %c0_i32_0 = arith.constant 0 : i32
    %c0_i32_1 = arith.constant 0 : i32
    return %arg0, %c0_i32, %c0_i32_0 : i32, i32, i32
  }
}

module attributes {stable_mosaic.version = 11 : i64} {
  func.func @_apply_kernel(%arg0: i32, %arg1: memref<256x128xf32, #tpu.memory_space<vmem>>, %arg2: memref<256x128xf32, #tpu.memory_space<vmem>>, %arg3: memref<8x128xf32, #tpu.memory_space<vmem>>, %arg4: memref<256x128xf32, #tpu.memory_space<vmem>>) attributes {dimension_semantics = [#tpu.dimension_semantics<parallel>], iteration_bounds = array<i64: 2>, scalar_prefetch = 0 : i64, scratch_operands = 0 : i64, tpu.core_type = #tpu.core_type<tc>, window_params = [{transform_indices = @transform_0, window_bounds = array<i64: 256, 128>}, {transform_indices = @transform_1, window_bounds = array<i64: 256, 128>}, {pipeline_mode = #tpu.pipeline_mode<synchronous>, transform_indices = @transform_2, window_bounds = array<i64: 8, 128>}, {transform_indices = @transform_3, window_bounds = array<i64: 256, 128>}]} {
    %c0 = arith.constant 0 : index
    %c0_0 = arith.constant 0 : index
    %0 = vector.load %arg1[%c0, %c0_0] : memref<256x128xf32, #tpu.memory_space<vmem>>, vector<256x128xf32>
    %c0_1 = arith.constant 0 : index
    %c0_2 = arith.constant 0 : index
    %1 = vector.load %arg3[%c0_1, %c0_2] : memref<8x128xf32, #tpu.memory_space<vmem>>, vector<1x128xf32>
    %2 = vector.broadcast %1 : vector<1x128xf32> to vector<256x128xf32>
    %3 = arith.mulf %0, %2 : vector<256x128xf32>
    %c1 = arith.constant 1 : index
    %c0_3 = arith.constant 0 : index
    %4 = vector.load %arg3[%c1, %c0_3] : memref<8x128xf32, #tpu.memory_space<vmem>>, vector<1x128xf32>
    %5 = vector.broadcast %4 : vector<1x128xf32> to vector<256x128xf32>
    %6 = arith.addf %3, %5 : vector<256x128xf32>
    %c0_4 = arith.constant 0 : index
    %c0_5 = arith.constant 0 : index
    %7 = vector.load %arg2[%c0_4, %c0_5] : memref<256x128xf32, #tpu.memory_space<vmem>>, vector<256x128xf32>
    %c2 = arith.constant 2 : index
    %c0_6 = arith.constant 0 : index
    %8 = vector.load %arg3[%c2, %c0_6] : memref<8x128xf32, #tpu.memory_space<vmem>>, vector<1x128xf32>
    %9 = vector.broadcast %8 : vector<1x128xf32> to vector<256x128xf32>
    %10 = arith.mulf %7, %9 : vector<256x128xf32>
    %11 = arith.addf %6, %10 : vector<256x128xf32>
    %c3 = arith.constant 3 : index
    %c0_7 = arith.constant 0 : index
    %12 = vector.load %arg3[%c3, %c0_7] : memref<8x128xf32, #tpu.memory_space<vmem>>, vector<1x128xf32>
    %13 = vector.broadcast %12 : vector<1x128xf32> to vector<256x128xf32>
    %14 = arith.addf %11, %13 : vector<256x128xf32>
    %cst = arith.constant 0.000000e+00 : f32
    %15 = vector.broadcast %cst : f32 to vector<256x128xf32>
    %16 = arith.maximumf %14, %15 : vector<256x128xf32>
    %c0_8 = arith.constant 0 : index
    %c0_9 = arith.constant 0 : index
    %17 = vector.load %arg4[%c0_8, %c0_9] : memref<256x128xf32, #tpu.memory_space<vmem>>, vector<256x128xf32>
    tpu.vector_store %arg4[%c0_8, %c0_9], %16 {strides = array<i32>} : memref<256x128xf32, #tpu.memory_space<vmem>>, vector<256x128xf32>,
    return
  }
  func.func @transform_0(%arg0: i32) -> (i32, i32) {
    %c0_i32 = arith.constant 0 : i32
    %c0_i32_0 = arith.constant 0 : i32
    return %arg0, %c0_i32 : i32, i32
  }
  func.func @transform_1(%arg0: i32) -> (i32, i32) {
    %c0_i32 = arith.constant 0 : i32
    %c0_i32_0 = arith.constant 0 : i32
    return %arg0, %c0_i32 : i32, i32
  }
  func.func @transform_2(%arg0: i32) -> (i32, i32) {
    %c0_i32 = arith.constant 0 : i32
    %c0_i32_0 = arith.constant 0 : i32
    %c0_i32_1 = arith.constant 0 : i32
    return %c0_i32, %c0_i32_0 : i32, i32
  }
  func.func @transform_3(%arg0: i32) -> (i32, i32) {
    %c0_i32 = arith.constant 0 : i32
    %c0_i32_0 = arith.constant 0 : i32
    return %arg0, %c0_i32 : i32, i32
  }
}

</mosaic_0001>

<bundles_post_ra>
// kernel: residual_forward.5
= control target key start
LH: loop header
LB: loop body
LE: loop exit
PB: predicated region body
PF: predicated region fallthrough
CT: control target
= control target key end

     0   :  { %s625_s12 = smov 0   ;;  %s900_s0 = inlined_call_operand.vmem [shape: f32[512,128], index: 0, kind: input, shape index: {}]   ;;  %s901_s1 = inlined_call_operand.vmem [shape: f32[512,128], index: 1, kind: input, shape index: {}]   ;;  %s902_s2 = inlined_call_operand.vmem [shape: f32[8,128], index: 2, kind: input, shape index: {}]   ;;  %s903_s3 = inlined_call_operand.vmem [shape: f32[512,128], index: 3, kind: output, shape index: {}]  }
   0x1 LB: > { %s572_s13 = sadd.s32 4294967295, %s603_s12   ;;  %p576_p0 = scmp.ge.s32.totalorder %s603_s12, 1  ;;  %s603_s12 = sphi %s625_s12, %s13_s12  }
   0x2   : > { %p149_p1 = scmp.lt.s32.totalorder %s603_s12, 3 }
   0x4   : > { %p150_p2 = pnand %p576_p0, %p149_p1 }
   0x5   : > { %s577_s14 = sshll.u32 (!%p150_p2), %s572_s13, 5 }
   0x6   : > { %153 = sbr.rel (%p150_p2) target bundleno = 70 (0x46), region = 32  ;;  %p179_p3 = scmp.lt.s32.totalorder (!%p150_p2), %s577_s14, 63 }
   0xb   : > { %s905_s14 = smov (!%p179_p3, %s577_s14), 63  ;;  %v638_v0 = vld [vmem:[%s902_s2] ss:$0 sm:$0xff]  ;;  %v643_v1 = vld [vmem:[%s902_s2 + $0x2] ss:$0 sm:$0xff] }
   0xc   : > { %s633_s15 = sshll.u32 %s905_s14, 3  ;;  %v660_v2 = vld [vmem:[%s902_s2 + $0x1] ss:$0 sm:$0xff]  ;;  %v687_v25 = vld [vmem:[%s902_s2 + $0x3] ss:$0 sm:$0xff] }
   0xd   : > { %s649_s22 = scalar_lea.vmem %s900_s0, %s633_s15  ;;  %s655_s25 = scalar_lea.vmem %s901_s1, %s633_s15 }
   0xe   : > { %v196_v3 = vld [vmem:[%s649_s22] sm:$0xff]  ;;  %v197_v5 = vld [vmem:[%s649_s22 + $0x8] sm:$0xff]  ;;  %v198_v10 = vld [vmem:[%s649_s22 + $0x10] sm:$0xff]  ;;  %s708_s5 = scalar_lea.vmem %s903_s3, %s633_s15 }
   0xf   : > { %v302_v4 = vld [vmem:[%s655_s25] sm:$0xff]  ;;  %v233_v6 = vmul.f32 %v638_v0, %v196_v3  ;;  %v234_v8 = vmul.f32 %v638_v0, %v197_v5  ;;  %v303_v9 = vld [vmem:[%s655_s25 + $0x8] sm:$0xff]  ;;  %v304_v11 = vld [vmem:[%s655_s25 + $0x10] sm:$0xff]  ;;  %v235_v13 = vmul.f32 %v638_v0, %v198_v10 }
  0x10   : > { %v339_v7 = vmul.f32 %v643_v1, %v302_v4  ;;  %v340_v12 = vmul.f32 %v643_v1, %v303_v9  ;;  %v341_v14 = vmul.f32 %v643_v1, %v304_v11  ;;  %v199_v15 = vld [vmem:[%s649_s22 + $0x18] sm:$0xff]  ;;  %v200_v17 = vld [vmem:[%s649_s22 + $0x20] sm:$0xff]  ;;  %v201_v23 = vld [vmem:[%s649_s22 + $0x28] sm:$0xff] }
  0x11   : > { %v305_v16 = vld [vmem:[%s655_s25 + $0x18] sm:$0xff]  ;;  %v270_v18 = vadd.f32 %v660_v2, %v233_v6  ;;  %v271_v19 = vadd.f32 %v660_v2, %v234_v8  ;;  %v236_v20 = vmul.f32 %v638_v0, %v199_v15  ;;  %v306_v22 = vld [vmem:[%s655_s25 + $0x20] sm:$0xff]  ;;  %v307_v24 = vld [vmem:[%s655_s25 + $0x28] sm:$0xff]  ;;  %v272_v26 = vadd.f32 %v660_v2, %v235_v13 }
  0x12   : > { %v342_v21 = vmul.f32 %v643_v1, %v305_v16  ;;  %v237_v27 = vmul.f32 %v638_v0, %v200_v17  ;;  %v343_v28 = vmul.f32 %v643_v1, %v306_v22  ;;  %v238_v29 = vmul.f32 %v638_v0, %v201_v23  ;;  %v202_v30 = vld [vmem:[%s649_s22 + $0x30] sm:$0xff]  ;;  %v203_v40 = vld [vmem:[%s649_s22 + $0x38] sm:$0xff]  ;;  %v204_v50 = vld [vmem:[%s649_s22 + $0x40] sm:$0xff] }
  0x13   : > { %v308_v31 = vld [vmem:[%s655_s25 + $0x30] sm:$0xff]  ;;  %v371_v32 = vadd.f32 %v339_v7, %v270_v18  ;;  %v372_v33 = vadd.f32 %v340_v12, %v271_v19  ;;  %v273_v34 = vadd.f32 %v660_v2, %v236_v20  ;;  %v344_v35 = vmul.f32 %v643_v1, %v307_v24  ;;  %v309_v49 = vld [vmem:[%s655_s25 + $0x38] sm:$0xff]  ;;  %v310_v55 = vld [vmem:[%s655_s25 + $0x40] sm:$0xff] }
  0x14   : > { %v373_v36 = vadd.f32 %v341_v14, %v272_v26  ;;  %v274_v37 = vadd.f32 %v660_v2, %v237_v27  ;;  %v275_v38 = vadd.f32 %v660_v2, %v238_v29  ;;  %v239_v39 = vmul.f32 %v638_v0, %v202_v30  ;;  %v205_v60 = vld [vmem:[%s649_s22 + $0x48] sm:$0xff]  ;;  %v206_v5 = vld [vmem:[%s649_s22 + $0x50] sm:$0xff]  ;;  %v207_v7 = vld [vmem:[%s649_s22 + $0x58] sm:$0xff] }
  0x15   : > { %v408_v41 = vadd.f32 %v687_v25, %v371_v32  ;;  %v409_v42 = vadd.f32 %v687_v25, %v372_v33  ;;  %v374_v43 = vadd.f32 %v342_v21, %v273_v34  ;;  %v345_v44 = vmul.f32 %v643_v1, %v308_v31  ;;  %v311_v61 = vld [vmem:[%s655_s25 + $0x48] sm:$0xff]  ;;  %v312_v6 = vld [vmem:[%s655_s25 + $0x50] sm:$0xff]  ;;  %v313_v12 = vld [vmem:[%s655_s25 + $0x58] sm:$0xff] }
  0x16   : > { %v410_v45 = vadd.f32 %v687_v25, %v373_v36  ;;  %v375_v46 = vadd.f32 %v343_v28, %v274_v37  ;;  %v376_v47 = vadd.f32 %v344_v35, %v275_v38  ;;  %v276_v48 = vadd.f32 %v660_v2, %v239_v39  ;;  %v208_v17 = vld [vmem:[%s649_s22 + $0x60] sm:$0xff]  ;;  %v209_v23 = vld [vmem:[%s649_s22 + $0x68] sm:$0xff]  ;;  %v210_v34 = vld [vmem:[%s649_s22 + $0x70] sm:$0xff] }
  0x17   : > { %v440_v51 = vmax.f32 %v408_v41, 0.0  ;;  %v441_v52 = vmax.f32 %v409_v42, 0.0  ;;  %v411_v53 = vadd.f32 %v687_v25, %v374_v43  ;;  %v240_v54 = vmul.f32 %v638_v0, %v203_v40  ;;  %v314_v18 = vld [vmem:[%s655_s25 + $0x60] sm:$0xff]  ;;  %v315_v29 = vld [vmem:[%s655_s25 + $0x68] sm:$0xff]  ;;  %v316_v39 = vld [vmem:[%s655_s25 + $0x70] sm:$0xff] }
  0x18   : > { %v442_v56 = vmax.f32 %v410_v45, 0.0  ;;  %v412_v57 = vadd.f32 %v687_v25, %v375_v46  ;;  %v413_v58 = vadd.f32 %v687_v25, %v376_v47  ;;  %v377_v59 = vadd.f32 %v345_v44, %v276_v48  ;;  %v211_v44 = vld [vmem:[%s649_s22 + $0x78] sm:$0xff] }
  0x19   : > { %472 = vst [vmem:[%s708_s5] sm:$0xff] %v440_v51  ;;  %473 = vst [vmem:[%s708_s5 + $0x8] sm:$0xff] %v441_v52  ;;  %v443_v62 = vmax.f32 %v411_v53, 0.0  ;;  %v277_v63 = vadd.f32 %v660_v2, %v240_v54  ;;  %v346_v3 = vmul.f32 %v643_v1, %v309_v49  ;;  %v241_v4 = vmul.f32 %v638_v0, %v204_v50  ;;  %v317_v49 = vld [vmem:[%s655_s25 + $0x78] sm:$0xff]  ;;  %v212_v54 = vld [vmem:[%s649_s22 + $0x80] sm:$0xff] }
  0x1a   : > { %474 = vst [vmem:[%s708_s5 + $0x10] sm:$0xff] %v442_v56  ;;  %v444_v8 = vmax.f32 %v412_v57, 0.0  ;;  %v445_v9 = vmax.f32 %v413_v58, 0.0  ;;  %v414_v10 = vadd.f32 %v687_v25, %v377_v59  ;;  %v347_v11 = vmul.f32 %v643_v1, %v310_v55  ;;  %v318_v59 = vld [vmem:[%s655_s25 + $0x80] sm:$0xff] }
  0x1b   : > { %475 = vst [vmem:[%s708_s5 + $0x18] sm:$0xff] %v443_v62  ;;  %v378_v13 = vadd.f32 %v346_v3, %v277_v63  ;;  %v278_v14 = vadd.f32 %v660_v2, %v241_v4  ;;  %v242_v15 = vmul.f32 %v638_v0, %v205_v60  ;;  %v348_v16 = vmul.f32 %v643_v1, %v311_v61  ;;  %v213_v60 = vld [vmem:[%s649_s22 + $0x88] sm:$0xff] }
  0x1c   : > { %476 = vst [vmem:[%s708_s5 + $0x20] sm:$0xff] %v444_v8  ;;  %477 = vst [vmem:[%s708_s5 + $0x28] sm:$0xff] %v445_v9  ;;  %v446_v19 = vmax.f32 %v414_v10, 0.0  ;;  %v243_v20 = vmul.f32 %v638_v0, %v206_v5  ;;  %v349_v21 = vmul.f32 %v643_v1, %v312_v6  ;;  %v244_v22 = vmul.f32 %v638_v0, %v207_v7  ;;  %v319_v61 = vld [vmem:[%s655_s25 + $0x88] sm:$0xff]  ;;  %v214_v9 = vld [vmem:[%s649_s22 + $0x90] sm:$0xff] }
  0x1d   : > { %v415_v24 = vadd.f32 %v687_v25, %v378_v13  ;;  %v379_v26 = vadd.f32 %v347_v11, %v278_v14  ;;  %v279_v27 = vadd.f32 %v660_v2, %v242_v15  ;;  %v350_v28 = vmul.f32 %v643_v1, %v313_v12  ;;  %v320_v10 = vld [vmem:[%s655_s25 + $0x90] sm:$0xff]  ;;  %v215_v11 = vld [vmem:[%s649_s22 + $0x98] sm:$0xff] }
  0x1e   : > { %478 = vst [vmem:[%s708_s5 + $0x30] sm:$0xff] %v446_v19  ;;  %v280_v30 = vadd.f32 %v660_v2, %v243_v20  ;;  %v281_v31 = vadd.f32 %v660_v2, %v244_v22  ;;  %v245_v32 = vmul.f32 %v638_v0, %v208_v17  ;;  %v351_v33 = vmul.f32 %v643_v1, %v314_v18 }
  0x1f   : > { %v447_v35 = vmax.f32 %v415_v24, 0.0  ;;  %v416_v36 = vadd.f32 %v687_v25, %v379_v26  ;;  %v380_v37 = vadd.f32 %v348_v16, %v279_v27  ;;  %v246_v38 = vmul.f32 %v638_v0, %v209_v23  ;;  %v321_v16 = vld [vmem:[%s655_s25 + $0x98] sm:$0xff]  ;;  %v322_v27 = vld [vmem:[%s655_s25 + $0xa0] sm:$0xff] }
  0x20   : > { %v381_v40 = vadd.f32 %v349_v21, %v280_v30  ;;  %v382_v41 = vadd.f32 %v350_v28, %v281_v31  ;;  %v282_v42 = vadd.f32 %v660_v2, %v245_v32  ;;  %v352_v43 = vmul.f32 %v643_v1, %v315_v29  ;;  %v216_v21 = vld [vmem:[%s649_s22 + $0xa0] sm:$0xff]  ;;  %v217_v28 = vld [vmem:[%s649_s22 + $0xa8] sm:$0xff] }
  0x21   : > { %479 = vst [vmem:[%s708_s5 + $0x38] sm:$0xff] %v447_v35  ;;  %v448_v45 = vmax.f32 %v416_v36, 0.0  ;;  %v417_v46 = vadd.f32 %v687_v25, %v380_v37  ;;  %v283_v47 = vadd.f32 %v660_v2, %v246_v38  ;;  %v247_v48 = vmul.f32 %v638_v0, %v210_v34  ;;  %v323_v37 = vld [vmem:[%s655_s25 + $0xa8] sm:$0xff]  ;;  %v218_v38 = vld [vmem:[%s649_s22 + $0xb0] sm:$0xff] }
  0x22   : > { %v418_v50 = vadd.f32 %v687_v25, %v381_v40  ;;  %v419_v51 = vadd.f32 %v687_v25, %v382_v41  ;;  %v383_v52 = vadd.f32 %v351_v33, %v282_v42  ;;  %v353_v53 = vmul.f32 %v643_v1, %v316_v39 }
  0x23   : > { %480 = vst [vmem:[%s708_s5 + $0x40] sm:$0xff] %v448_v45  ;;  %v449_v55 = vmax.f32 %v417_v46, 0.0  ;;  %v384_v56 = vadd.f32 %v352_v43, %v283_v47  ;;  %v284_v57 = vadd.f32 %v660_v2, %v247_v48  ;;  %v248_v58 = vmul.f32 %v638_v0, %v211_v44  ;;  %v324_v47 = vld [vmem:[%s655_s25 + $0xb0] sm:$0xff]  ;;  %v219_v48 = vld [vmem:[%s649_s22 + $0xb8] sm:$0xff] }
  0x24   : > { %v450_v62 = vmax.f32 %v418_v50, 0.0  ;;  %v451_v63 = vmax.f32 %v419_v51, 0.0  ;;  %v420_v3 = vadd.f32 %v687_v25, %v383_v52  ;;  %v354_v4 = vmul.f32 %v643_v1, %v317_v49 }
  0x25   : > { %481 = vst [vmem:[%s708_s5 + $0x48] sm:$0xff] %v449_v55  ;;  %v421_v5 = vadd.f32 %v687_v25, %v384_v56  ;;  %v385_v6 = vadd.f32 %v353_v53, %v284_v57  ;;  %v285_v7 = vadd.f32 %v660_v2, %v248_v58  ;;  %v249_v8 = vmul.f32 %v638_v0, %v212_v54  ;;  %v325_v53 = vld [vmem:[%s655_s25 + $0xb8] sm:$0xff]  ;;  %v220_v58 = vld [vmem:[%s649_s22 + $0xc0] sm:$0xff] }
  0x26   : > { %482 = vst [vmem:[%s708_s5 + $0x50] sm:$0xff] %v450_v62  ;;  %483 = vst [vmem:[%s708_s5 + $0x58] sm:$0xff] %v451_v63  ;;  %v452_v12 = vmax.f32 %v420_v3, 0.0  ;;  %v355_v13 = vmul.f32 %v643_v1, %v318_v59  ;;  %v250_v14 = vmul.f32 %v638_v0, %v213_v60  ;;  %v356_v15 = vmul.f32 %v643_v1, %v319_v61  ;;  %v326_v63 = vld [vmem:[%s655_s25 + $0xc0] sm:$0xff]  ;;  %v221_v3 = vld [vmem:[%s649_s22 + $0xc8] sm:$0xff] }
  0x27   : > { %v453_v17 = vmax.f32 %v421_v5, 0.0  ;;  %v422_v18 = vadd.f32 %v687_v25, %v385_v6  ;;  %v386_v19 = vadd.f32 %v354_v4, %v285_v7  ;;  %v286_v20 = vadd.f32 %v660_v2, %v249_v8  ;;  %v327_v4 = vld [vmem:[%s655_s25 + $0xc8] sm:$0xff] }
  0x28   : > { %484 = vst [vmem:[%s708_s5 + $0x60] sm:$0xff] %v452_v12  ;;  %v287_v22 = vadd.f32 %v660_v2, %v250_v14  ;;  %v251_v23 = vmul.f32 %v638_v0, %v214_v9  ;;  %v357_v24 = vmul.f32 %v643_v1, %v320_v10  ;;  %v252_v26 = vmul.f32 %v638_v0, %v215_v11  ;;  %v328_v14 = vld [vmem:[%s655_s25 + $0xd0] sm:$0xff] }
  0x29   : > { %485 = vst [vmem:[%s708_s5 + $0x68] sm:$0xff] %v453_v17  ;;  %v454_v29 = vmax.f32 %v422_v18, 0.0  ;;  %v423_v30 = vadd.f32 %v687_v25, %v386_v19  ;;  %v387_v31 = vadd.f32 %v355_v13, %v286_v20  ;;  %v358_v32 = vmul.f32 %v643_v1, %v321_v16  ;;  %v222_v13 = vld [vmem:[%s649_s22 + $0xd0] sm:$0xff]  ;;  %v329_v20 = vld [vmem:[%s655_s25 + $0xd8] sm:$0xff] }
  0x2a   : > { %v388_v33 = vadd.f32 %v356_v15, %v287_v22  ;;  %v288_v34 = vadd.f32 %v660_v2, %v251_v23  ;;  %v289_v35 = vadd.f32 %v660_v2, %v252_v26  ;;  %v253_v36 = vmul.f32 %v638_v0, %v216_v21  ;;  %v223_v15 = vld [vmem:[%s649_s22 + $0xd8] sm:$0xff]  ;;  %v224_v26 = vld [vmem:[%s649_s22 + $0xe0] sm:$0xff] }
  0x2b   : > { %486 = vst [vmem:[%s708_s5 + $0x70] sm:$0xff] %v454_v29  ;;  %v455_v39 = vmax.f32 %v423_v30, 0.0  ;;  %v424_v40 = vadd.f32 %v687_v25, %v387_v31  ;;  %v359_v41 = vmul.f32 %v643_v1, %v322_v27  ;;  %v254_v42 = vmul.f32 %v638_v0, %v217_v28  ;;  %v330_v31 = vld [vmem:[%s655_s25 + $0xe0] sm:$0xff] }
  0x2c   : > { %v425_v43 = vadd.f32 %v687_v25, %v388_v33  ;;  %v389_v44 = vadd.f32 %v357_v24, %v288_v34  ;;  %v390_v45 = vadd.f32 %v358_v32, %v289_v35  ;;  %v290_v46 = vadd.f32 %v660_v2, %v253_v36  ;;  %v225_v32 = vld [vmem:[%s649_s22 + $0xe8] sm:$0xff] }
  0x2d   : > { %487 = vst [vmem:[%s708_s5 + $0x78] sm:$0xff] %v455_v39  ;;  %v456_v49 = vmax.f32 %v424_v40, 0.0  ;;  %v291_v50 = vadd.f32 %v660_v2, %v254_v42  ;;  %v360_v51 = vmul.f32 %v643_v1, %v323_v37  ;;  %v255_v52 = vmul.f32 %v638_v0, %v218_v38  ;;  %v226_v42 = vld [vmem:[%s649_s22 + $0xf0] sm:$0xff] }
  0x2e   : > { %v457_v54 = vmax.f32 %v425_v43, 0.0  ;;  %v426_v55 = vadd.f32 %v687_v25, %v389_v44  ;;  %v427_v56 = vadd.f32 %v687_v25, %v390_v45  ;;  %v391_v57 = vadd.f32 %v359_v41, %v290_v46  ;;  %v331_v41 = vld [vmem:[%s655_s25 + $0xe8] sm:$0xff] }
  0x2f   : > { %488 = vst [vmem:[%s708_s5 + $0x80] sm:$0xff] %v456_v49  ;;  %v392_v59 = vadd.f32 %v360_v51, %v291_v50  ;;  %v292_v60 = vadd.f32 %v660_v2, %v255_v52  ;;  %v361_v61 = vmul.f32 %v643_v1, %v324_v47  ;;  %v256_v62 = vmul.f32 %v638_v0, %v219_v48  ;;  %v332_v51 = vld [vmem:[%s655_s25 + $0xf0] sm:$0xff]  ;;  %v227_v52 = vld [vmem:[%s649_s22 + $0xf8] sm:$0xff] }
  0x30   : > { %489 = vst [vmem:[%s708_s5 + $0x88] sm:$0xff] %v457_v54  ;;  %v458_v5 = vmax.f32 %v426_v55, 0.0  ;;  %v459_v6 = vmax.f32 %v427_v56, 0.0  ;;  %v428_v7 = vadd.f32 %v687_v25, %v391_v57  ;;  %v362_v8 = vmul.f32 %v643_v1, %v325_v53  ;;  %v333_v57 = vld [vmem:[%s655_s25 + $0xf8] sm:$0xff] }
  0x31   : > { %v429_v9 = vadd.f32 %v687_v25, %v392_v59  ;;  %v393_v10 = vadd.f32 %v361_v61, %v292_v60  ;;  %v293_v11 = vadd.f32 %v660_v2, %v256_v62  ;;  %v257_v12 = vmul.f32 %v638_v0, %v220_v58 }
  0x32   : > { %490 = vst [vmem:[%s708_s5 + $0x90] sm:$0xff] %v458_v5  ;;  %491 = vst [vmem:[%s708_s5 + $0x98] sm:$0xff] %v459_v6  ;;  %v460_v16 = vmax.f32 %v428_v7, 0.0  ;;  %v363_v17 = vmul.f32 %v643_v1, %v326_v63  ;;  %v258_v18 = vmul.f32 %v638_v0, %v221_v3  ;;  %v364_v19 = vmul.f32 %v643_v1, %v327_v4 }
  0x33   : > { %v461_v21 = vmax.f32 %v429_v9, 0.0  ;;  %v430_v22 = vadd.f32 %v687_v25, %v393_v10  ;;  %v394_v23 = vadd.f32 %v362_v8, %v293_v11  ;;  %v294_v24 = vadd.f32 %v660_v2, %v257_v12 }
  0x34   : > { %492 = vst [vmem:[%s708_s5 + $0xa0] sm:$0xff] %v460_v16  ;;  %v295_v27 = vadd.f32 %v660_v2, %v258_v18  ;;  %v259_v28 = vmul.f32 %v638_v0, %v222_v13  ;;  %v365_v29 = vmul.f32 %v643_v1, %v328_v14  ;;  %v260_v30 = vmul.f32 %v638_v0, %v223_v15 }
  0x35   : > { %493 = vst [vmem:[%s708_s5 + $0xa8] sm:$0xff] %v461_v21  ;;  %v462_v33 = vmax.f32 %v430_v22, 0.0  ;;  %v431_v34 = vadd.f32 %v687_v25, %v394_v23  ;;  %v395_v35 = vadd.f32 %v363_v17, %v294_v24  ;;  %v366_v36 = vmul.f32 %v643_v1, %v329_v20 }
  0x36   : > { %v396_v37 = vadd.f32 %v364_v19, %v295_v27  ;;  %v296_v38 = vadd.f32 %v660_v2, %v259_v28  ;;  %v297_v39 = vadd.f32 %v660_v2, %v260_v30  ;;  %v261_v40 = vmul.f32 %v638_v0, %v224_v26 }
  0x37   : > { %494 = vst [vmem:[%s708_s5 + $0xb0] sm:$0xff] %v462_v33  ;;  %v463_v43 = vmax.f32 %v431_v34, 0.0  ;;  %v432_v44 = vadd.f32 %v687_v25, %v395_v35  ;;  %v367_v45 = vmul.f32 %v643_v1, %v330_v31  ;;  %v262_v46 = vmul.f32 %v638_v0, %v225_v32 }
  0x38   : > { %v433_v47 = vadd.f32 %v687_v25, %v396_v37  ;;  %v397_v48 = vadd.f32 %v365_v29, %v296_v38  ;;  %v398_v49 = vadd.f32 %v366_v36, %v297_v39  ;;  %v298_v50 = vadd.f32 %v660_v2, %v261_v40 }
  0x39   : > { %495 = vst [vmem:[%s708_s5 + $0xb8] sm:$0xff] %v463_v43  ;;  %v464_v53 = vmax.f32 %v432_v44, 0.0  ;;  %v299_v54 = vadd.f32 %v660_v2, %v262_v46  ;;  %v368_v55 = vmul.f32 %v643_v1, %v331_v41  ;;  %v263_v56 = vmul.f32 %v638_v0, %v226_v42 }
  0x3a   : > { %v465_v58 = vmax.f32 %v433_v47, 0.0  ;;  %v434_v59 = vadd.f32 %v687_v25, %v397_v48  ;;  %v435_v60 = vadd.f32 %v687_v25, %v398_v49  ;;  %v399_v61 = vadd.f32 %v367_v45, %v298_v50 }
  0x3b   : > { %496 = vst [vmem:[%s708_s5 + $0xc0] sm:$0xff] %v464_v53  ;;  %v400_v62 = vadd.f32 %v368_v55, %v299_v54  ;;  %v300_v63 = vadd.f32 %v660_v2, %v263_v56  ;;  %v369_v3 = vmul.f32 %v643_v1, %v332_v51  ;;  %v264_v4 = vmul.f32 %v638_v0, %v227_v52 }
  0x3c   : > { %497 = vst [vmem:[%s708_s5 + $0xc8] sm:$0xff] %v465_v58  ;;  %v466_v5 = vmax.f32 %v434_v59, 0.0  ;;  %v467_v6 = vmax.f32 %v435_v60, 0.0  ;;  %v436_v7 = vadd.f32 %v687_v25, %v399_v61  ;;  %v370_v8 = vmul.f32 %v643_v1, %v333_v57 }
  0x3d   : > { %v437_v9 = vadd.f32 %v687_v25, %v400_v62  ;;  %v401_v10 = vadd.f32 %v369_v3, %v300_v63  ;;  %v301_v11 = vadd.f32 %v660_v2, %v264_v4 }
  0x3e   : > { %498 = vst [vmem:[%s708_s5 + $0xd0] sm:$0xff] %v466_v5  ;;  %499 = vst [vmem:[%s708_s5 + $0xd8] sm:$0xff] %v467_v6  ;;  %v468_v12 = vmax.f32 %v436_v7, 0.0 }
  0x3f   : > { %v469_v13 = vmax.f32 %v437_v9, 0.0  ;;  %v438_v0 = vadd.f32 %v687_v25, %v401_v10  ;;  %v402_v14 = vadd.f32 %v370_v8, %v301_v11 }
  0x40   : > { %500 = vst [vmem:[%s708_s5 + $0xe0] sm:$0xff] %v468_v12 }
  0x41   : > { %501 = vst [vmem:[%s708_s5 + $0xe8] sm:$0xff] %v469_v13  ;;  %v470_v15 = vmax.f32 %v438_v0, 0.0  ;;  %v439_v16 = vadd.f32 %v687_v25, %v402_v14 }
  0x43   : > { %502 = vst [vmem:[%s708_s5 + $0xf0] sm:$0xff] %v470_v15  ;;  %v471_v1 = vmax.f32 %v439_v16, 0.0 }
  0x45   : > { %503 = vst [vmem:[%s708_s5 + $0xf8] sm:$0xff] %v471_v1 }
  0x46 PF: > { %s13_s12 = sadd.s32 1, %s603_s12  }
  0x47   : > { %p10_p4 = scmp.ge.s32.totalorder %s13_s12, 4  }
  0x49   :  { %12 = sbr.rel (!%p10_p4) target bundleno = 1 (0x1), region = 65 }

// kernel: residual_forward.3
= control target key start
LH: loop header
LB: loop body
LE: loop exit
PB: predicated region body
PF: predicated region fallthrough
CT: control target
= control target key end

     0   :  { %s4277_s12 = smov 0   ;;  %s5398_s0 = inlined_call_operand.vmem [shape: f32[2,18,18,128], index: 0, kind: input, shape index: {}]   ;;  %s5399_s1 = inlined_call_operand.vmem [shape: bf16[9,128,128], index: 1, kind: input, shape index: {}]   ;;  %s5400_s2 = inlined_call_operand.vmem [shape: f32[2,16,16,128], index: 2, kind: output, shape index: {0}]   ;;  %s5401_s3 = inlined_call_operand.vmem [shape: f32[2,2,128], index: 3, kind: output, shape index: {1}]  }
   0x1 LB: > { %s3100_s13 = sadd.s32 4294967295, %s4255_s12   ;;  %p3104_p0 = scmp.ge.s32.totalorder %s4255_s12, 1  ;;  %s4255_s12 = sphi %s4277_s12, %s14_s12  }
   0x2   : > { %p140_p1 = scmp.lt.s32.totalorder %s4255_s12, 3 }
   0x4   : > { %p141_p2 = pnand %p3104_p0, %p140_p1 }
   0x6   : > { %144 = sbr.rel (%p141_p2) target bundleno = 549 (0x225), region = 28 }
   0xb   : > { %v4177_v0 = vld [vmem:[%s5399_s1 + $0x78] sm:$0xff]   ;;  %p168_p3 = scmp.lt.s32.totalorder %s3100_s13, 1  ;;  %v4178_v1 = vld [vmem:[%s5399_s1 + $0x70] sm:$0xff]   ;;  %v4179_v2 = vld [vmem:[%s5399_s1 + $0x68] sm:$0xff]  }
   0xc   : > { %3720 = vmatprep.subr.bf16.mxu0 %v4177_v0  ;;  %4152 = vmatprep.subr.bf16.mxu1 %v4177_v0  ;;  %v4180_v3 = vld [vmem:[%s5399_s1 + $0x60] sm:$0xff]   ;;  %v4181_v10 = vld [vmem:[%s5399_s1 + $0x58] sm:$0xff]   ;;  %v4182_v11 = vld [vmem:[%s5399_s1 + $0x50] sm:$0xff]  }
   0xd   : > { %s5485_s13 = smov (!%p168_p3, %s3100_s13), 1  ;;  %3721 = vmatpush3.bf16.msra.mxu0 %v4177_v0  ;;  %4160 = vmatpush3.bf16.msra.mxu1 %v4177_v0  ;;  %v4183_v12 = vld [vmem:[%s5399_s1 + $0x48] sm:$0xff]   ;;  %v4184_v13 = vld [vmem:[%s5399_s1 + $0x40] sm:$0xff]   ;;  %v4185_v18 = vld [vmem:[%s5399_s1 + $0x38] sm:$0xff]  }
   0xe   : > { %3722 = vmatprep.subr.bf16.mxu0 %v4178_v1  ;;  %4153 = vmatprep.subr.bf16.mxu1 %v4178_v1  ;;  %s4168_s20 = smul.u32 432, %s5485_s13  ;;  %v4186_v19 = vld [vmem:[%s5399_s1 + $0xb8] sm:$0xff]   ;;  %v4187_v26 = vld [vmem:[%s5399_s1 + $0x30] sm:$0xff]   ;;  %v4189_v34 = vld [vmem:[%s5399_s1 + $0x28] sm:$0xff]  }
   0xf   : > { %v4188_v27 = vld [vmem:[%s5399_s1 + $0xb0] sm:$0xff]   ;;  %v4190_v35 = vld [vmem:[%s5399_s1 + $0xa8] sm:$0xff]   ;;  %v4191_v42 = vld [vmem:[%s5399_s1 + $0x20] sm:$0xff]  }
  0x10   : > { %s4300_s23 = scalar_lea.vmem %s5398_s0, %s4168_s20  ;;  %v4192_v43 = vld [vmem:[%s5399_s1 + $0xa0] sm:$0xff]   ;;  %v4193_v50 = vld [vmem:[%s5399_s1 + $0x18] sm:$0xff]   ;;  %v4195_v58 = vld [vmem:[%s5399_s1 + $0x10] sm:$0xff]   ;;  %s3108_s20 = sshll.u32 %s5485_s13, 1 }
  0x11   : > { %3723 = vmatpush3.bf16.msra.mxu0 %v4178_v1  ;;  %4161 = vmatpush3.bf16.msra.mxu1 %v4178_v1  ;;  %v247_v4 = vld [vmem:[%s4300_s23 + $0x1] sm:$0xff]  ;;  %v248_v5 = vld [vmem:[%s4300_s23 + $0x9] sm:$0xff]  ;;  %v249_v14 = vld [vmem:[%s4300_s23 + $0x19] sm:$0xff]  ;;  %s181_s24 = scalar_lea.vmem %s5401_s3, %s3108_s20 }
  0x12   : > { %3724 = vmatprep.subr.bf16.mxu0 %v4179_v2  ;;  %4154 = vmatprep.subr.bf16.mxu1 %v4179_v2  ;;  %v263_v6 = vld [vmem:[%s4300_s23 + $0xc1] sm:$0xff]  ;;  %v279_v7 = vpack.c.bf16 %v248_v5, %v247_v4  ;;  %v264_v8 = vld [vmem:[%s4300_s23 + $0xc9] sm:$0xff]  ;;  %v265_v16 = vld [vmem:[%s4300_s23 + $0xd9] sm:$0xff] }
  0x13   : > { %v4309_v9 = vpack.c.bf16 %v264_v8, %v263_v6  ;;  %v250_v15 = vld [vmem:[%s4300_s23 + $0x21] sm:$0xff]  ;;  %v251_v20 = vld [vmem:[%s4300_s23 + $0x31] sm:$0xff]  ;;  %v252_v21 = vld [vmem:[%s4300_s23 + $0x39] sm:$0xff] }
  0x14   : > { %3736 = vmatprep.mubr.bf16.mxu0 %v279_v7  ;;  %v266_v17 = vld [vmem:[%s4300_s23 + $0xe1] sm:$0xff]  ;;  %v4336_v22 = vpack.c.bf16 %v250_v15, %v249_v14  ;;  %v267_v24 = vld [vmem:[%s4300_s23 + $0xf1] sm:$0xff]  ;;  %v268_v25 = vld [vmem:[%s4300_s23 + $0xf9] sm:$0xff]  ;;  %v4348_v28 = vpack.c.bf16 %v252_v21, %v251_v20 }
  0x15   : > { %3725 = vmatpush3.bf16.msra.mxu0 %v4179_v2  ;;  %4162 = vmatpush3.bf16.msra.mxu1 %v4179_v2  ;;  %v4338_v23 = vpack.c.bf16 %v266_v17, %v265_v16  ;;  %v4350_v29 = vpack.c.bf16 %v268_v25, %v267_v24  ;;  %v253_v30 = vld [vmem:[%s4300_s23 + $0x49] sm:$0xff]  ;;  %v254_v31 = vld [vmem:[%s4300_s23 + $0x51] sm:$0xff]  ;;  %v255_v36 = vld [vmem:[%s4300_s23 + $0x61] sm:$0xff] }
  0x16   : > { %3726 = vmatprep.subr.bf16.mxu0 %v4180_v3  ;;  %4155 = vmatprep.subr.bf16.mxu1 %v4180_v3  ;;  %v269_v32 = vld [vmem:[%s4300_s23 + $0x109] sm:$0xff]  ;;  %v270_v33 = vld [vmem:[%s4300_s23 + $0x111] sm:$0xff]  ;;  %v271_v38 = vld [vmem:[%s4300_s23 + $0x121] sm:$0xff]  ;;  %v4369_v39 = vpack.c.bf16 %v254_v31, %v253_v30 }
  0x17   : > { %3752 = vmatprep.mubr.bf16.mxu1 %v4309_v9  ;;  %v256_v37 = vld [vmem:[%s4300_s23 + $0x69] sm:$0xff]  ;;  %v4371_v40 = vpack.c.bf16 %v270_v33, %v269_v32  ;;  %v257_v46 = vld [vmem:[%s4300_s23 + $0x79] sm:$0xff]  ;;  %v258_v47 = vld [vmem:[%s4300_s23 + $0x81] sm:$0xff] }
  0x18   : > { %v272_v41 = vld [vmem:[%s4300_s23 + $0x129] sm:$0xff]  ;;  %v4380_v44 = vpack.c.bf16 %v256_v37, %v255_v36  ;;  %v273_v48 = vld [vmem:[%s4300_s23 + $0x139] sm:$0xff]  ;;  %v274_v49 = vld [vmem:[%s4300_s23 + $0x141] sm:$0xff]  ;;  %v4400_v54 = vpack.c.bf16 %v258_v47, %v257_v46 }
  0x19   : > { %3727 = vmatpush3.bf16.msra.mxu0 %v4180_v3  ;;  %4163 = vmatpush3.bf16.msra.mxu1 %v4180_v3  ;;  %v4382_v45 = vpack.c.bf16 %v272_v41, %v271_v38  ;;  %v4194_v51 = vld [vmem:[%s5399_s1 + $0x98] sm:$0xff]   ;;  %v4402_v55 = vpack.c.bf16 %v274_v49, %v273_v48  ;;  %v4196_v59 = vld [vmem:[%s5399_s1 + $0x90] sm:$0xff]   ;;  %v4197_v2 = vld [vmem:[%s5399_s1 + $0x8] sm:$0xff]  }
  0x1a   : > { %3728 = vmatprep.subr.bf16.mxu0 %v4181_v10  ;;  %4156 = vmatprep.subr.bf16.mxu1 %v4181_v10  ;;  %v259_v52 = vld [vmem:[%s4300_s23 + $0x91] sm:$0xff]  ;;  %v260_v53 = vld [vmem:[%s4300_s23 + $0x99] sm:$0xff]  ;;  %v261_v62 = vld [vmem:[%s4300_s23 + $0xa9] sm:$0xff] }
  0x1b   : > { %v275_v56 = vld [vmem:[%s4300_s23 + $0x151] sm:$0xff]  ;;  %v276_v57 = vld [vmem:[%s4300_s23 + $0x159] sm:$0xff]  ;;  %v4412_v60 = vpack.c.bf16 %v260_v53, %v259_v52  ;;  %v277_v0 = vld [vmem:[%s4300_s23 + $0x169] sm:$0xff] }
  0x1c   : > { %v4414_v61 = vpack.c.bf16 %v276_v57, %v275_v56  ;;  %v262_v63 = vld [vmem:[%s4300_s23 + $0xb1] sm:$0xff]  ;;  %v4198_v3 = vld [vmem:[%s5399_s1 + $0x88] sm:$0xff]   ;;  %v183_v4 = vld [vmem:[%s4300_s23] sm:$0xff] }
  0x1d   : > { %3729 = vmatpush3.bf16.msra.mxu0 %v4181_v10  ;;  %4164 = vmatpush3.bf16.msra.mxu1 %v4181_v10  ;;  %v278_v1 = vld [vmem:[%s4300_s23 + $0x171] sm:$0xff]  ;;  %v4431_v5 = vpack.c.bf16 %v262_v63, %v261_v62  ;;  %v184_v7 = vld [vmem:[%s4300_s23 + $0x8] sm:$0xff]  ;;  %v186_v16 = vld [vmem:[%s4300_s23 + $0x20] sm:$0xff] }
  0x1e   : > { %3730 = vmatprep.subr.bf16.mxu0 %v4182_v11  ;;  %4157 = vmatprep.subr.bf16.mxu1 %v4182_v11  ;;  %v4433_v6 = vpack.c.bf16 %v278_v1, %v277_v0  ;;  %v730_v8 = vld [vmem:[%s4300_s23 + $0x2] sm:$0xff]  ;;  %v731_v10 = vld [vmem:[%s4300_s23 + $0xa] sm:$0xff]  ;;  %v185_v15 = vld [vmem:[%s4300_s23 + $0x18] sm:$0xff] }
  0x1f   : > { %v762_v14 = vpack.c.bf16 %v731_v10, %v730_v8  ;;  %v732_v17 = vld [vmem:[%s4300_s23 + $0x1a] sm:$0xff]  ;;  %v187_v21 = vld [vmem:[%s4300_s23 + $0x30] sm:$0xff]  ;;  %v4205_v47 = vld [vmem:[%s5399_s1 + $0xe8] sm:$0xff]  }
  0x20   : > { %v4202_v20 = vld [vmem:[%s5399_s1 + $0x138] sm:$0xff]   ;;  %v4203_v33 = vld [vmem:[%s5399_s1 + $0xf0] sm:$0xff]   ;;  %v191_v41 = vld [vmem:[%s4300_s23 + $0x60] sm:$0xff] }
  0x21   : > { %3731 = vmatpush3.bf16.msra.mxu0 %v4182_v11  ;;  %4165 = vmatpush3.bf16.msra.mxu1 %v4182_v11  ;;  %v4199_v11 = vld [vmem:[%s5399_s1] sm:$0xff]   ;;  %v188_v24 = vld [vmem:[%s4300_s23 + $0x38] sm:$0xff]  ;;  %v736_v36 = vld [vmem:[%s4300_s23 + $0x4a] sm:$0xff] }
  0x22   : > { %3732 = vmatprep.subr.bf16.mxu0 %v4183_v12  ;;  %4158 = vmatprep.subr.bf16.mxu1 %v4183_v12  ;;  %v734_v25 = vld [vmem:[%s4300_s23 + $0x32] sm:$0xff]  ;;  %v4464_v31 = vpack.c.bf16 %v188_v24, %v187_v21  ;;  %v739_v46 = vld [vmem:[%s4300_s23 + $0x6a] sm:$0xff]  ;;  %v4207_v53 = vld [vmem:[%s5399_s1 + $0xe0] sm:$0xff]  }
  0x23   : > { %v4204_v37 = vld [vmem:[%s5399_s1 + $0x130] sm:$0xff]   ;;  %v4206_v48 = vld [vmem:[%s5399_s1 + $0x128] sm:$0xff]   ;;  %v193_v56 = vld [vmem:[%s4300_s23 + $0x78] sm:$0xff] }
  0x24   : > { %v737_v38 = vld [vmem:[%s4300_s23 + $0x52] sm:$0xff]  ;;  %v194_v57 = vld [vmem:[%s4300_s23 + $0x80] sm:$0xff]  ;;  %v747_v21 = vld [vmem:[%s4300_s23 + $0xca] sm:$0xff] }
  0x25   : > { %3733 = vmatpush3.bf16.msra.mxu0 %v4183_v12  ;;  %4166 = vmatpush3.bf16.msra.mxu1 %v4183_v12  ;;  %v4200_v12 = vld [vmem:[%s5399_s1 + $0x80] sm:$0xff]   ;;  %v195_v63 = vld [vmem:[%s4300_s23 + $0x90] sm:$0xff]  ;;  %v196_v0 = vld [vmem:[%s4300_s23 + $0x98] sm:$0xff] }
  0x26   : > { %3734 = vmatprep.subr.bf16.mxu0 %v4184_v13  ;;  %4159 = vmatprep.subr.bf16.mxu1 %v4184_v13  ;;  %v4208_v62 = vld [vmem:[%s5399_s1 + $0x120] sm:$0xff]   ;;  %v742_v1 = vld [vmem:[%s4300_s23 + $0x92] sm:$0xff]  ;;  %v4528_v10 = vpack.c.bf16 %v196_v0, %v195_v63  ;;  %v4213_v24 = vld [vmem:[%s5399_s1 + $0xc8] sm:$0xff]  }
  0x27   : > { %v205_v0 = vld [vmem:[%s4300_s23 + $0x108] sm:$0xff] }
  0x29   : > { %3735 = vmatpush3.bf16.msra.mxu0 %v4184_v13  ;;  %4167 = vmatpush3.bf16.msra.mxu1 %v4184_v13  ;;  %v215_v13 = vpack.c.bf16 %v184_v7, %v183_v4  ;;  %v4210_v4 = vld [vmem:[%s5399_s1 + $0x118] sm:$0xff]   ;;  %v4524_v7 = vpack.c.bf16 %v194_v57, %v193_v56 }
  0x2a   : > { %3768 = vmatprep.subr.bf16.mxu1 %v4185_v18  ;;  %3816 = vmatprep.subr.bf16.mxu0 %v4186_v19  ;;  %v4217_v56 = vld [vmem:[%s5399_s1 + $0x178] sm:$0xff]  }
  0x2b   : > { %v4218_v57 = vld [vmem:[%s5399_s1 + $0x1b8] sm:$0xff]  }
  0x2c   : > { %3737 = vmatmul.mubr.bf16.vlgmr.msra.gmra.mxu0 %v4336_v22  ;;  %3753 = vmatmul.mubr.bf16.vlgmr.msra.gmra.mxu1 %v4338_v23 }
  0x2d   : > { %3769 = vmatpush3.bf16.msra.mxu1 %v4185_v18  ;;  %3817 = vmatpush3.bf16.msra.mxu0 %v4186_v19  ;;  %v733_v18 = vld [vmem:[%s4300_s23 + $0x22] sm:$0xff]  ;;  %v4201_v19 = vld [vmem:[%s5399_s1 + $0xf8] sm:$0xff]  }
  0x2e   : > { %3770 = vmatprep.subr.bf16.mxu1 %v4187_v26  ;;  %3818 = vmatprep.subr.bf16.mxu0 %v4188_v27  ;;  %v4462_v30 = vpack.c.bf16 %v733_v18, %v732_v17  ;;  %v4212_v17 = vld [vmem:[%s5399_s1 + $0x110] sm:$0xff]   ;;  %v199_v18 = vld [vmem:[%s4300_s23 + $0xc0] sm:$0xff] }
  0x2f   : > { %3740 = vmatprep.mubr.bf16.mxu0 %v4348_v28  ;;  %3756 = vmatprep.mubr.bf16.mxu1 %v4350_v29 }
  0x31   : > { %3771 = vmatpush3.bf16.msra.mxu1 %v4187_v26  ;;  %3819 = vmatpush3.bf16.msra.mxu0 %v4188_v27  ;;  %v735_v26 = vld [vmem:[%s4300_s23 + $0x3a] sm:$0xff]  ;;  %v4460_v27 = vpack.c.bf16 %v186_v16, %v185_v15  ;;  %v744_v15 = vld [vmem:[%s4300_s23 + $0xaa] sm:$0xff]  ;;  %v745_v16 = vld [vmem:[%s4300_s23 + $0xb2] sm:$0xff] }
  0x32   : > { %3772 = vmatprep.subr.bf16.mxu1 %v4189_v34  ;;  %3820 = vmatprep.subr.bf16.mxu0 %v4190_v35  ;;  %v4466_v32 = vpack.c.bf16 %v735_v26, %v734_v25  ;;  %v4214_v25 = vld [vmem:[%s5399_s1 + $0x108] sm:$0xff]  }
  0x34   : > { %3741 = vmatmul.mubr.bf16.gmra.mxu0 %v4369_v39  ;;  %3757 = vmatmul.mubr.bf16.gmra.mxu1 %v4371_v40 }
  0x35   : > { %3773 = vmatpush3.bf16.msra.mxu1 %v4189_v34  ;;  %3821 = vmatpush3.bf16.msra.mxu0 %v4190_v35  ;;  %v189_v34 = vld [vmem:[%s4300_s23 + $0x48] sm:$0xff]  ;;  %v190_v35 = vld [vmem:[%s4300_s23 + $0x50] sm:$0xff] }
  0x36   : > { %3774 = vmatprep.subr.bf16.mxu1 %v4191_v42  ;;  %3822 = vmatprep.subr.bf16.mxu0 %v4192_v43  ;;  %v4492_v49 = vpack.c.bf16 %v190_v35, %v189_v34 }
  0x37   : > { %3744 = vmatprep.mubr.bf16.mxu0 %v4380_v44  ;;  %3760 = vmatprep.mubr.bf16.mxu1 %v4382_v45 }
  0x39   : > { %3775 = vmatpush3.bf16.msra.mxu1 %v4191_v42  ;;  %3823 = vmatpush3.bf16.msra.mxu0 %v4192_v43  ;;  %v192_v42 = vld [vmem:[%s4300_s23 + $0x68] sm:$0xff] }
  0x3a   : > { %3776 = vmatprep.subr.bf16.mxu1 %v4193_v50  ;;  %3824 = vmatprep.subr.bf16.mxu0 %v4194_v51  ;;  %v738_v43 = vld [vmem:[%s4300_s23 + $0x62] sm:$0xff] }
  0x3b   : > { %v4498_v52 = vpack.c.bf16 %v739_v46, %v738_v43  ;;  %v4216_v43 = vld [vmem:[%s5399_s1 + $0x100] sm:$0xff]   ;;  %v203_v46 = vld [vmem:[%s4300_s23 + $0xf0] sm:$0xff] }
  0x3c   : > { %3745 = vmatmul.mubr.bf16.gmra.mxu0 %v4400_v54  ;;  %3761 = vmatmul.mubr.bf16.gmra.mxu1 %v4402_v55 }
  0x3d   : > { %3777 = vmatpush3.bf16.msra.mxu1 %v4193_v50  ;;  %3825 = vmatpush3.bf16.msra.mxu0 %v4194_v51  ;;  %v4494_v50 = vpack.c.bf16 %v737_v38, %v736_v36  ;;  %v4496_v51 = vpack.c.bf16 %v192_v42, %v191_v41  ;;  %v4215_v36 = vld [vmem:[%s5399_s1 + $0xc0] sm:$0xff]  }
  0x3e   : > { %3778 = vmatprep.subr.bf16.mxu1 %v4195_v58  ;;  %3826 = vmatprep.subr.bf16.mxu0 %v4196_v59  ;;  %v202_v38 = vld [vmem:[%s4300_s23 + $0xe0] sm:$0xff] }
  0x3f   : > { %3748 = vmatprep.mubr.bf16.mxu0 %v4412_v60  ;;  %3764 = vmatprep.mubr.bf16.mxu1 %v4414_v61  ;;  %v748_v41 = vld [vmem:[%s4300_s23 + $0xda] sm:$0xff]  ;;  %v749_v42 = vld [vmem:[%s4300_s23 + $0xe2] sm:$0xff] }
  0x41   : > { %3779 = vmatpush3.bf16.msra.mxu1 %v4195_v58  ;;  %3827 = vmatpush3.bf16.msra.mxu0 %v4196_v59  ;;  %v740_v58 = vld [vmem:[%s4300_s23 + $0x7a] sm:$0xff]  ;;  %v741_v59 = vld [vmem:[%s4300_s23 + $0x82] sm:$0xff] }
  0x42   : > { %3780 = vmatprep.subr.bf16.mxu1 %v4197_v2  ;;  %3828 = vmatprep.subr.bf16.mxu0 %v4198_v3  ;;  %v4526_v8 = vpack.c.bf16 %v741_v59, %v740_v58  ;;  %v4590_v59 = vpack.c.bf16 %v749_v42, %v748_v41 }
  0x44   : > { %3749 = vmatmul.mubr.bf16.gmra.mxu0 %v4431_v5  ;;  %3765 = vmatmul.mubr.bf16.gmra.mxu1 %v4433_v6 }
  0x45   : > { %3781 = vmatpush3.bf16.msra.mxu1 %v4197_v2  ;;  %3829 = vmatpush3.bf16.msra.mxu0 %v4198_v3  ;;  %v743_v2 = vld [vmem:[%s4300_s23 + $0x9a] sm:$0xff] }
  0x46   : > { %3782 = vmatprep.subr.bf16.mxu1 %v4199_v11  ;;  %3830 = vmatprep.subr.bf16.mxu0 %v4200_v12  ;;  %v4209_v3 = vld [vmem:[%s5399_s1 + $0xd8] sm:$0xff]  }
  0x47   : > { %3784 = vmatprep.mubr.bf16.mxu1 %v215_v13  ;;  %3832 = vmatprep.mubr.bf16.mxu0 %v762_v14  ;;  %v197_v13 = vld [vmem:[%s4300_s23 + $0xa8] sm:$0xff]  ;;  %v198_v14 = vld [vmem:[%s4300_s23 + $0xb0] sm:$0xff] }
  0x48   : > { %v4556_v26 = vpack.c.bf16 %v198_v14, %v197_v13  ;;  %v754_v13 = vld [vmem:[%s4300_s23 + $0x122] sm:$0xff]  ;;  %v755_v14 = vld [vmem:[%s4300_s23 + $0x12a] sm:$0xff] }
  0x49   : > { %3783 = vmatpush3.bf16.msra.mxu1 %v4199_v11  ;;  %3831 = vmatpush3.bf16.msra.mxu0 %v4200_v12  ;;  %v4530_v11 = vpack.c.bf16 %v743_v2, %v742_v1  ;;  %v4211_v12 = vld [vmem:[%s5399_s1 + $0xd0] sm:$0xff]  }
  0x4a   : > { %3864 = vmatprep.subr.bf16.mxu1 %v4201_v19  ;;  %3912 = vmatprep.subr.bf16.mxu0 %v4202_v20  ;;  %v206_v1 = vld [vmem:[%s4300_s23 + $0x110] sm:$0xff] }
  0x4b   : > { %v752_v2 = vld [vmem:[%s4300_s23 + $0x10a] sm:$0xff] }
  0x4c   : > { %3785 = vmatmul.mubr.bf16.vlgmr.msra.gmra.mxu1 %v4460_v27  ;;  %3833 = vmatmul.mubr.bf16.vlgmr.msra.gmra.mxu0 %v4462_v30 }
  0x4d   : > { %3865 = vmatpush3.bf16.msra.mxu1 %v4201_v19  ;;  %3913 = vmatpush3.bf16.msra.mxu0 %v4202_v20  ;;  %v200_v19 = vld [vmem:[%s4300_s23 + $0xc8] sm:$0xff] }
  0x4e   : > { %3788 = vmatprep.mubr.bf16.mxu1 %v4464_v31  ;;  %3836 = vmatprep.mubr.bf16.mxu0 %v4466_v32  ;;  %v746_v20 = vld [vmem:[%s4300_s23 + $0xc2] sm:$0xff]  ;;  %v4560_v34 = vpack.c.bf16 %v200_v19, %v199_v18  ;;  %v4614_v18 = vpack.c.bf16 %v755_v14, %v754_v13  ;;  %v209_v19 = vld [vmem:[%s4300_s23 + $0x138] sm:$0xff] }
  0x4f   : > { %3866 = vmatprep.subr.bf16.mxu1 %v4203_v33  ;;  %3914 = vmatprep.subr.bf16.mxu0 %v4204_v37  ;;  %v4562_v35 = vpack.c.bf16 %v747_v21, %v746_v20  ;;  %v210_v20 = vld [vmem:[%s4300_s23 + $0x140] sm:$0xff]  ;;  %v4230_v13 = vld [vmem:[%s5399_s1 + $0x188] sm:$0xff]   ;;  %v4233_v14 = vld [vmem:[%s5399_s1 + $0x1f8] sm:$0xff]  }
  0x50   : > { %v756_v21 = vld [vmem:[%s4300_s23 + $0x13a] sm:$0xff]  ;;  %v4628_v41 = vpack.c.bf16 %v210_v20, %v209_v19 }
  0x51   : > { %3867 = vmatpush3.bf16.msra.mxu1 %v4203_v33  ;;  %3915 = vmatpush3.bf16.msra.mxu0 %v4204_v37  ;;  %v4558_v33 = vpack.c.bf16 %v745_v16, %v744_v15  ;;  %v201_v37 = vld [vmem:[%s4300_s23 + $0xd8] sm:$0xff]  ;;  %v4608_v15 = vpack.c.bf16 %v206_v1, %v205_v0 }
  0x52   : > { %3868 = vmatprep.subr.bf16.mxu1 %v4205_v47  ;;  %3916 = vmatprep.subr.bf16.mxu0 %v4206_v48  ;;  %v4588_v58 = vpack.c.bf16 %v202_v38, %v201_v37  ;;  %v758_v37 = vld [vmem:[%s4300_s23 + $0x152] sm:$0xff]  ;;  %v759_v38 = vld [vmem:[%s4300_s23 + $0x15a] sm:$0xff] }
  0x53   : > { %v761_v0 = vld [vmem:[%s4300_s23 + $0x172] sm:$0xff] }
  0x54   : > { %3789 = vmatmul.mubr.bf16.gmra.mxu1 %v4492_v49  ;;  %3837 = vmatmul.mubr.bf16.gmra.mxu0 %v4494_v50  ;;  %v4234_v19 = vld [vmem:[%s5399_s1 + $0x238] sm:$0xff]  }
  0x55   : > { %3792 = vmatprep.mubr.bf16.mxu1 %v4496_v51  ;;  %3840 = vmatprep.mubr.bf16.mxu0 %v4498_v52 }
  0x56   : > { %3869 = vmatpush3.bf16.msra.mxu1 %v4205_v47  ;;  %3917 = vmatpush3.bf16.msra.mxu0 %v4206_v48  ;;  %v204_v47 = vld [vmem:[%s4300_s23 + $0xf8] sm:$0xff] }
  0x57   : > { %3870 = vmatprep.subr.bf16.mxu1 %v4207_v53  ;;  %3918 = vmatprep.subr.bf16.mxu0 %v4208_v62  ;;  %v750_v48 = vld [vmem:[%s4300_s23 + $0xf2] sm:$0xff] }
  0x5a   : > { %3871 = vmatpush3.bf16.msra.mxu1 %v4207_v53  ;;  %3919 = vmatpush3.bf16.msra.mxu0 %v4208_v62  ;;  %v751_v53 = vld [vmem:[%s4300_s23 + $0xfa] sm:$0xff]  ;;  %v4592_v62 = vpack.c.bf16 %v204_v47, %v203_v46  ;;  %v4634_v46 = vpack.c.bf16 %v759_v38, %v758_v37  ;;  %v213_v47 = vld [vmem:[%s4300_s23 + $0x168] sm:$0xff] }
  0x5b   : > { %3872 = vmatprep.subr.bf16.mxu1 %v4209_v3  ;;  %3920 = vmatprep.subr.bf16.mxu0 %v4210_v4  ;;  %v4594_v63 = vpack.c.bf16 %v751_v53, %v750_v48  ;;  %v214_v48 = vld [vmem:[%s4300_s23 + $0x170] sm:$0xff] }
  0x5c   : > { %3793 = vmatmul.mubr.bf16.gmra.mxu1 %v4524_v7  ;;  %3841 = vmatmul.mubr.bf16.gmra.mxu0 %v4526_v8  ;;  %v760_v53 = vld [vmem:[%s4300_s23 + $0x16a] sm:$0xff]  ;;  %v4644_v1 = vpack.c.bf16 %v214_v48, %v213_v47  ;;  %v3364_v47 = vld [vmem:[%s4300_s23 + $0x1a0] sm:$0xff] }
  0x5d   : > { %3796 = vmatprep.mubr.bf16.mxu1 %v4528_v10  ;;  %3844 = vmatprep.mubr.bf16.mxu0 %v4530_v11  ;;  %v3389_v48 = vld [vmem:[%s4300_s23 + $0x31] sm:$0xff] }
  0x5e   : > { %3873 = vmatpush3.bf16.msra.mxu1 %v4209_v3  ;;  %3921 = vmatpush3.bf16.msra.mxu0 %v4210_v4  ;;  %v753_v3 = vld [vmem:[%s4300_s23 + $0x112] sm:$0xff]  ;;  %v207_v4 = vld [vmem:[%s4300_s23 + $0x120] sm:$0xff] }
  0x5f   : > { %3874 = vmatprep.subr.bf16.mxu1 %v4211_v12  ;;  %3922 = vmatprep.subr.bf16.mxu0 %v4212_v17  ;;  %v4610_v16 = vpack.c.bf16 %v753_v3, %v752_v2  ;;  %v4646_v2 = vpack.c.bf16 %v761_v0, %v760_v53  ;;  %v4219_v3 = vld [vmem:[%s5399_s1 + $0x170] sm:$0xff]  }
  0x62   : > { %3875 = vmatpush3.bf16.msra.mxu1 %v4211_v12  ;;  %3923 = vmatpush3.bf16.msra.mxu0 %v4212_v17  ;;  %v208_v12 = vld [vmem:[%s4300_s23 + $0x128] sm:$0xff] }
  0x63   : > { %3876 = vmatprep.subr.bf16.mxu1 %v4213_v24  ;;  %3924 = vmatprep.subr.bf16.mxu0 %v4214_v25  ;;  %v4612_v17 = vpack.c.bf16 %v208_v12, %v207_v4  ;;  %v4220_v4 = vld [vmem:[%s5399_s1 + $0x1b0] sm:$0xff]   ;;  %v4229_v12 = vld [vmem:[%s5399_s1 + $0x148] sm:$0xff]  }
  0x64   : > { %3797 = vmatmul.mubr.bf16.gmra.mxu1 %v4556_v26  ;;  %3845 = vmatmul.mubr.bf16.gmra.mxu0 %v4558_v33 }
  0x65   : > { %3800 = vmatprep.mubr.bf16.mxu1 %v4560_v34  ;;  %3848 = vmatprep.mubr.bf16.mxu0 %v4562_v35 }
  0x66   : > { %3877 = vmatpush3.bf16.msra.mxu1 %v4213_v24  ;;  %3925 = vmatpush3.bf16.msra.mxu0 %v4214_v25  ;;  %v757_v24 = vld [vmem:[%s4300_s23 + $0x142] sm:$0xff]  ;;  %v211_v25 = vld [vmem:[%s4300_s23 + $0x150] sm:$0xff] }
  0x67   : > { %3878 = vmatprep.subr.bf16.mxu1 %v4215_v36  ;;  %3926 = vmatprep.subr.bf16.mxu0 %v4216_v43  ;;  %v4630_v42 = vpack.c.bf16 %v757_v24, %v756_v21 }
  0x6a   : > { %3879 = vmatpush3.bf16.msra.mxu1 %v4215_v36  ;;  %3927 = vmatpush3.bf16.msra.mxu0 %v4216_v43  ;;  %v212_v36 = vld [vmem:[%s4300_s23 + $0x158] sm:$0xff] }
  0x6b   : > { %3960 = vmatprep.subr.bf16.mxu1 %v4217_v56  ;;  %4008 = vmatprep.subr.bf16.mxu0 %v4218_v57  ;;  %v4632_v43 = vpack.c.bf16 %v212_v36, %v211_v25 }
  0x6c   : > { %3801 = vmatmul.mubr.bf16.gmra.mxu1 %v4588_v58  ;;  %3849 = vmatmul.mubr.bf16.gmra.mxu0 %v4590_v59 }
  0x6d   : > { %3804 = vmatprep.mubr.bf16.mxu1 %v4592_v62  ;;  %3852 = vmatprep.mubr.bf16.mxu0 %v4594_v63 }
  0x74   : > { %3805 = vmatmul.mubr.bf16.gmra.mxu1 %v4608_v15  ;;  %3853 = vmatmul.mubr.bf16.gmra.mxu0 %v4610_v16 }
  0x75   : > { %3808 = vmatprep.mubr.bf16.mxu1 %v4612_v17  ;;  %3856 = vmatprep.mubr.bf16.mxu0 %v4614_v18 }
  0x7c   : > { %3809 = vmatmul.mubr.bf16.gmra.mxu1 %v4628_v41  ;;  %3857 = vmatmul.mubr.bf16.gmra.mxu0 %v4630_v42 }
  0x7d   : > { %3812 = vmatprep.mubr.bf16.mxu1 %v4632_v43  ;;  %3860 = vmatprep.mubr.bf16.mxu0 %v4634_v46 }
  0x84   : > { %3813 = vmatmul.mubr.bf16.gmra.mxu1 %v4644_v1  ;;  %3861 = vmatmul.mubr.bf16.gmra.mxu0 %v4646_v2 }
  0x85   : > { %3880 = vmatprep.mubr.bf16.mxu1 %v4460_v27  ;;  %3928 = vmatprep.mubr.bf16.mxu0 %v4336_v22  ;;  %v4221_v22 = vld [vmem:[%s5399_s1 + $0x168] sm:$0xff]  }
  0x86   : > { %v4222_v27 = vld [vmem:[%s5399_s1 + $0x1a8] sm:$0xff]  }
  0x8c   : > { %3881 = vmatmul.mubr.bf16.vlgmr.msra.gmra.mxu1 %v4464_v31  ;;  %3929 = vmatmul.mubr.bf16.vlgmr.msra.gmra.mxu0 %v4348_v28  ;;  %v4223_v28 = vld [vmem:[%s5399_s1 + $0x160] sm:$0xff]  }
  0x8d   : > { %3961 = vmatpush3.bf16.msra.mxu1 %v4217_v56  ;;  %4009 = vmatpush3.bf16.msra.mxu0 %v4218_v57  ;;  %v4225_v56 = vld [vmem:[%s5399_s1 + $0x158] sm:$0xff]  }
  0x8e   : > { %3884 = vmatprep.mubr.bf16.mxu1 %v4492_v49  ;;  %3932 = vmatprep.mubr.bf16.mxu0 %v4369_v39  ;;  %v4224_v39 = vld [vmem:[%s5399_s1 + $0x1a0] sm:$0xff]   ;;  %v4226_v57 = vld [vmem:[%s5399_s1 + $0x198] sm:$0xff]  }
  0x8f   : > { %3962 = vmatprep.subr.bf16.mxu1 %v4219_v3  ;;  %4010 = vmatprep.subr.bf16.mxu0 %v4220_v4 }
  0x91   : > { %3963 = vmatpush3.bf16.msra.mxu1 %v4219_v3  ;;  %4011 = vmatpush3.bf16.msra.mxu0 %v4220_v4  ;;  %v3390_v3 = vld [vmem:[%s4300_s23 + $0x39] sm:$0xff] }
  0x92   : > { %3964 = vmatprep.subr.bf16.mxu1 %v4221_v22  ;;  %4012 = vmatprep.subr.bf16.mxu0 %v4222_v27  ;;  %v3445_v4 = vld [vmem:[%s4300_s23 + $0x32] sm:$0xff] }
  0x94   : > { %3885 = vmatmul.mubr.bf16.gmra.mxu1 %v4496_v51  ;;  %3933 = vmatmul.mubr.bf16.gmra.mxu0 %v4380_v44  ;;  %v4227_v44 = vld [vmem:[%s5399_s1 + $0x150] sm:$0xff]  }
  0x95   : > { %3888 = vmatprep.mubr.bf16.mxu1 %v4524_v7  ;;  %3936 = vmatprep.mubr.bf16.mxu0 %v4400_v54  ;;  %v4228_v54 = vld [vmem:[%s5399_s1 + $0x190] sm:$0xff]  }
  0x96   : > { %3965 = vmatpush3.bf16.msra.mxu1 %v4221_v22  ;;  %4013 = vmatpush3.bf16.msra.mxu0 %v4222_v27 }
  0x97   : > { %3966 = vmatprep.subr.bf16.mxu1 %v4223_v28  ;;  %4014 = vmatprep.subr.bf16.mxu0 %v4224_v39 }
  0x9a   : > { %3967 = vmatpush3.bf16.msra.mxu1 %v4223_v28  ;;  %4015 = vmatpush3.bf16.msra.mxu0 %v4224_v39  ;;  %v2294_v28 = vpack.c.bf16 %v3390_v3, %v3389_v48  ;;  %v3453_v48 = vld [vmem:[%s4300_s23 + $0x92] sm:$0xff]  ;;  %v3454_v3 = vld [vmem:[%s4300_s23 + $0x9a] sm:$0xff] }
  0x9b   : > { %3968 = vmatprep.subr.bf16.mxu1 %v4225_v56  ;;  %4016 = vmatprep.subr.bf16.mxu0 %v4226_v57 }
  0x9c   : > { %3889 = vmatmul.mubr.bf16.gmra.mxu1 %v4528_v10  ;;  %3937 = vmatmul.mubr.bf16.gmra.mxu0 %v4412_v60  ;;  %v4231_v60 = vld [vmem:[%s5399_s1 + $0x140] sm:$0xff]  }
  0x9d   : > { %3892 = vmatprep.mubr.bf16.mxu1 %v4556_v26  ;;  %3940 = vmatprep.mubr.bf16.mxu0 %v4431_v5  ;;  %v4232_v5 = vld [vmem:[%s5399_s1 + $0x180] sm:$0xff]  }
  0x9e   : > { %3969 = vmatpush3.bf16.msra.mxu1 %v4225_v56  ;;  %4017 = vmatpush3.bf16.msra.mxu0 %v4226_v57 }
  0x9f   : > { %3970 = vmatprep.subr.bf16.mxu1 %v4227_v44  ;;  %4018 = vmatprep.subr.bf16.mxu0 %v4228_v54 }
  0xa2   : > { %3971 = vmatpush3.bf16.msra.mxu1 %v4227_v44  ;;  %4019 = vmatpush3.bf16.msra.mxu0 %v4228_v54 }
  0xa3   : > { %3972 = vmatprep.subr.bf16.mxu1 %v4229_v12  ;;  %4020 = vmatprep.subr.bf16.mxu0 %v4230_v13 }
  0xa4   : > { %3893 = vmatmul.mubr.bf16.gmra.mxu1 %v4560_v34  ;;  %3941 = vmatmul.mubr.bf16.gmra.mxu0 %v4309_v9  ;;  %v3195_v9 = vld [vmem:[%s4300_s23 + $0x180] sm:$0xff] }
  0xa5   : > { %3896 = vmatprep.mubr.bf16.mxu1 %v4588_v58  ;;  %3944 = vmatprep.mubr.bf16.mxu0 %v4338_v23  ;;  %v3196_v23 = vld [vmem:[%s4300_s23 + $0x188] sm:$0xff] }
  0xa6   : > { %3973 = vmatpush3.bf16.msra.mxu1 %v4229_v12  ;;  %4021 = vmatpush3.bf16.msra.mxu0 %v4230_v13  ;;  %v4732_v20 = vpack.c.bf16 %v3196_v23, %v3195_v9  ;;  %v3391_v12 = vld [vmem:[%s4300_s23 + $0x49] sm:$0xff]  ;;  %v3392_v13 = vld [vmem:[%s4300_s23 + $0x51] sm:$0xff] }
  0xa7   : > { %3974 = vmatprep.subr.bf16.mxu1 %v4231_v60  ;;  %4022 = vmatprep.subr.bf16.mxu0 %v4232_v5  ;;  %v3394_v23 = vld [vmem:[%s4300_s23 + $0x69] sm:$0xff] }
  0xaa   : > { %3975 = vmatpush3.bf16.msra.mxu1 %v4231_v60  ;;  %4023 = vmatpush3.bf16.msra.mxu0 %v4232_v5  ;;  %v3447_v60 = vld [vmem:[%s4300_s23 + $0x4a] sm:$0xff]  ;;  %v3448_v5 = vld [vmem:[%s4300_s23 + $0x52] sm:$0xff] }
  0xab   : > { %4056 = vmatprep.subr.bf16.mxu1 %v4233_v14  ;;  %4104 = vmatprep.subr.bf16.mxu0 %v4234_v19 }
  0xac   : > { %3897 = vmatmul.mubr.bf16.gmra.mxu1 %v4592_v62  ;;  %3945 = vmatmul.mubr.bf16.gmra.mxu0 %v4350_v29  ;;  %v3251_v29 = vld [vmem:[%s4300_s23 + $0x181] sm:$0xff] }
  0xad   : > { %3900 = vmatprep.mubr.bf16.mxu1 %v4608_v15  ;;  %3948 = vmatprep.mubr.bf16.mxu0 %v4371_v40  ;;  %v3252_v40 = vld [vmem:[%s4300_s23 + $0x189] sm:$0xff] }
  0xae   : > { %v4734_v21 = vpack.c.bf16 %v3252_v40, %v3251_v29  ;;  %v3449_v29 = vld [vmem:[%s4300_s23 + $0x62] sm:$0xff]  ;;  %v3450_v40 = vld [vmem:[%s4300_s23 + $0x6a] sm:$0xff] }
  0xb4   : > { %3901 = vmatmul.mubr.bf16.gmra.mxu1 %v4612_v17  ;;  %3949 = vmatmul.mubr.bf16.gmra.mxu0 %v4382_v45  ;;  %v4235_v45 = vld [vmem:[%s5399_s1 + $0x1f0] sm:$0xff]  }
  0xb5   : > { %3904 = vmatprep.mubr.bf16.mxu1 %v4628_v41  ;;  %3952 = vmatprep.mubr.bf16.mxu0 %v4402_v55  ;;  %v4236_v55 = vld [vmem:[%s5399_s1 + $0x230] sm:$0xff]  }
  0xbc   : > { %3905 = vmatmul.mubr.bf16.gmra.mxu1 %v4632_v43  ;;  %3953 = vmatmul.mubr.bf16.gmra.mxu0 %v4414_v61  ;;  %v4237_v61 = vld [vmem:[%s5399_s1 + $0x1e8] sm:$0xff]  }
  0xbd   : > { %3908 = vmatprep.mubr.bf16.mxu1 %v4644_v1  ;;  %3956 = vmatprep.mubr.bf16.mxu0 %v4433_v6  ;;  %v4238_v6 = vld [vmem:[%s5399_s1 + $0x228] sm:$0xff]  }
  0xc4   : > { %3909 = vmatmul.mubr.bf16.gmra.mxu1 %v4732_v20  ;;  %3957 = vmatmul.mubr.bf16.gmra.mxu0 %v4734_v21 }
  0xc5   : > { %3976 = vmatprep.mubr.bf16.mxu1 %v4462_v30  ;;  %4024 = vmatprep.mubr.bf16.mxu0 %v4464_v31  ;;  %v4239_v30 = vld [vmem:[%s5399_s1 + $0x1e0] sm:$0xff]  }
  0xc6   : > { %v4240_v31 = vld [vmem:[%s5399_s1 + $0x220] sm:$0xff]  }
  0xcc   : > { %3977 = vmatmul.mubr.bf16.vlgmr.msra.gmra.mxu1 %v4466_v32  ;;  %4025 = vmatmul.mubr.bf16.vlgmr.msra.gmra.mxu0 %v4492_v49  ;;  %v4241_v32 = vld [vmem:[%s5399_s1 + $0x1d8] sm:$0xff]  }
  0xcd   : > { %4057 = vmatpush3.bf16.msra.mxu1 %v4233_v14  ;;  %4105 = vmatpush3.bf16.msra.mxu0 %v4234_v19  ;;  %v4242_v49 = vld [vmem:[%s5399_s1 + $0x218] sm:$0xff]   ;;  %v3393_v14 = vld [vmem:[%s4300_s23 + $0x61] sm:$0xff] }
  0xce   : > { %3980 = vmatprep.mubr.bf16.mxu1 %v4494_v50  ;;  %4028 = vmatprep.mubr.bf16.mxu0 %v4496_v51  ;;  %v4243_v50 = vld [vmem:[%s5399_s1 + $0x1d0] sm:$0xff]  }
  0xcf   : > { %4058 = vmatprep.subr.bf16.mxu1 %v4235_v45  ;;  %4106 = vmatprep.subr.bf16.mxu0 %v4236_v55  ;;  %v4244_v51 = vld [vmem:[%s5399_s1 + $0x210] sm:$0xff]  }
  0xd1   : > { %4059 = vmatpush3.bf16.msra.mxu1 %v4235_v45  ;;  %4107 = vmatpush3.bf16.msra.mxu0 %v4236_v55  ;;  %v2295_v55 = vpack.c.bf16 %v3392_v13, %v3391_v12 }
  0xd2   : > { %4060 = vmatprep.subr.bf16.mxu1 %v4237_v61  ;;  %4108 = vmatprep.subr.bf16.mxu0 %v4238_v6 }
  0xd4   : > { %3981 = vmatmul.mubr.bf16.gmra.mxu1 %v4498_v52  ;;  %4029 = vmatmul.mubr.bf16.gmra.mxu0 %v4524_v7  ;;  %v4245_v52 = vld [vmem:[%s5399_s1 + $0x1c8] sm:$0xff]  }
  0xd5   : > { %3984 = vmatprep.mubr.bf16.mxu1 %v4526_v8  ;;  %4032 = vmatprep.mubr.bf16.mxu0 %v4528_v10  ;;  %v4246_v7 = vld [vmem:[%s5399_s1 + $0x208] sm:$0xff]   ;;  %v4247_v8 = vld [vmem:[%s5399_s1 + $0x1c0] sm:$0xff]  }
  0xd6   : > { %4061 = vmatpush3.bf16.msra.mxu1 %v4237_v61  ;;  %4109 = vmatpush3.bf16.msra.mxu0 %v4238_v6  ;;  %v4248_v10 = vld [vmem:[%s5399_s1 + $0x200] sm:$0xff]   ;;  %v2601_v61 = vpack.c.bf16 %v3448_v5, %v3447_v60  ;;  %v2296_v6 = vpack.c.bf16 %v3394_v23, %v3393_v14  ;;  %v2604_v5 = vpack.c.bf16 %v3454_v3, %v3453_v48 }
  0xd7   : > { %4062 = vmatprep.subr.bf16.mxu1 %v4239_v30  ;;  %4110 = vmatprep.subr.bf16.mxu0 %v4240_v31 }
  0xda   : > { %4063 = vmatpush3.bf16.msra.mxu1 %v4239_v30  ;;  %4111 = vmatpush3.bf16.msra.mxu0 %v4240_v31  ;;  %v2602_v30 = vpack.c.bf16 %v3450_v40, %v3449_v29 }
  0xdb   : > { %4064 = vmatprep.subr.bf16.mxu1 %v4241_v32  ;;  %4112 = vmatprep.subr.bf16.mxu0 %v4242_v49 }
  0xdc   : > { %3985 = vmatmul.mubr.bf16.gmra.mxu1 %v4530_v11  ;;  %4033 = vmatmul.mubr.bf16.gmra.mxu0 %v4556_v26 }
  0xdd   : > { %3988 = vmatprep.mubr.bf16.mxu1 %v4558_v33  ;;  %4036 = vmatprep.mubr.bf16.mxu0 %v4560_v34 }
  0xde   : > { %4065 = vmatpush3.bf16.msra.mxu1 %v4241_v32  ;;  %4113 = vmatpush3.bf16.msra.mxu0 %v4242_v49 }
  0xdf   : > { %4066 = vmatprep.subr.bf16.mxu1 %v4243_v50  ;;  %4114 = vmatprep.subr.bf16.mxu0 %v4244_v51 }
  0xe2   : > { %4067 = vmatpush3.bf16.msra.mxu1 %v4243_v50  ;;  %4115 = vmatpush3.bf16.msra.mxu0 %v4244_v51  ;;  %v3395_v51 = vld [vmem:[%s4300_s23 + $0x79] sm:$0xff] }
  0xe3   : > { %4068 = vmatprep.subr.bf16.mxu1 %v4245_v52  ;;  %4116 = vmatprep.subr.bf16.mxu0 %v4246_v7 }
  0xe4   : > { %3989 = vmatmul.mubr.bf16.gmra.mxu1 %v4562_v35  ;;  %4037 = vmatmul.mubr.bf16.gmra.mxu0 %v4588_v58 }
  0xe5   : > { %3992 = vmatprep.mubr.bf16.mxu1 %v4590_v59  ;;  %4040 = vmatprep.mubr.bf16.mxu0 %v4592_v62 }
  0xe6   : > { %4069 = vmatpush3.bf16.msra.mxu1 %v4245_v52  ;;  %4117 = vmatpush3.bf16.msra.mxu0 %v4246_v7  ;;  %v3396_v52 = vld [vmem:[%s4300_s23 + $0x81] sm:$0xff] }
  0xe7   : > { %4070 = vmatprep.subr.bf16.mxu1 %v4247_v8  ;;  %4118 = vmatprep.subr.bf16.mxu0 %v4248_v10 }
  0xea   : > { %4071 = vmatpush3.bf16.msra.mxu1 %v4247_v8  ;;  %4119 = vmatpush3.bf16.msra.mxu0 %v4248_v10  ;;  %v3451_v8 = vld [vmem:[%s4300_s23 + $0x7a] sm:$0xff]  ;;  %v3452_v10 = vld [vmem:[%s4300_s23 + $0x82] sm:$0xff] }
  0xec   : > { %v4798_v11 = vpop.f32.mrf.mxu0  ;;  %v4800_v26 = vpop.f32.mrf.mxu1  ;;  %3993 = vmatmul.mubr.bf16.gmra.mxu1 %v4594_v63  ;;  %4041 = vmatmul.mubr.bf16.gmra.mxu0 %v4608_v15 }
  0xed   : > { %3996 = vmatprep.mubr.bf16.mxu1 %v4610_v16  ;;  %4044 = vmatprep.mubr.bf16.mxu0 %v4612_v17 }
  0xee   : > { %v4806_v33 = vpop.f32.mrf.mxu0  ;;  %v4808_v34 = vpop.f32.mrf.mxu1 }
  0xf0   : > { %v4810_v35 = vpop.f32.mrf.mxu0  ;;  %v4812_v58 = vpop.f32.mrf.mxu1 }
  0xf2   : > { %v4814_v59 = vpop.f32.mrf.mxu0  ;;  %v4816_v62 = vpop.f32.mrf.mxu1 }
  0xf4   : > { %v4818_v24 = vpop.f32.mrf.mxu0  ;;  %v4820_v63 = vpop.f32.mrf.mxu1  ;;  %3997 = vmatmul.mubr.bf16.gmra.mxu1 %v4614_v18  ;;  %4045 = vmatmul.mubr.bf16.gmra.mxu0 %v4628_v41  ;;  %v3307_v41 = vld [vmem:[%s4300_s23 + $0x182] sm:$0xff] }
  0xf5   : > { %4000 = vmatprep.mubr.bf16.mxu1 %v4630_v42  ;;  %4048 = vmatprep.mubr.bf16.mxu0 %v4632_v43  ;;  %v3308_v42 = vld [vmem:[%s4300_s23 + $0x18a] sm:$0xff]  ;;  %v3363_v43 = vld [vmem:[%s4300_s23 + $0x198] sm:$0xff] }
  0xf6   : > { %v4826_v15 = vpop.f32.mrf.mxu0  ;;  %v4828_v16 = vpop.f32.mrf.mxu1  ;;  %v2003_v27 = vpack.c.bf16 %v3364_v47, %v3363_v43  ;;  %v3398_v47 = vld [vmem:[%s4300_s23 + $0x99] sm:$0xff] }
  0xf8   : > { %v4830_v17 = vpop.f32.mrf.mxu0  ;;  %v4832_v25 = vpop.f32.mrf.mxu1 }
  0xfa   : > { %v4834_v36 = vpop.f32.mrf.mxu0  ;;  %v4836_v18 = vpop.f32.mrf.mxu1 }
  0xfc   : > { %v4838_v37 = vpop.f32.mrf.mxu0  ;;  %v4840_v38 = vpop.f32.mrf.mxu1  ;;  %4001 = vmatmul.mubr.bf16.gmra.mxu1 %v4634_v46  ;;  %4049 = vmatmul.mubr.bf16.gmra.mxu0 %v4644_v1  ;;  %v3446_v46 = vld [vmem:[%s4300_s23 + $0x3a] sm:$0xff] }
  0xfd   : > { %4004 = vmatprep.mubr.bf16.mxu1 %v4646_v2  ;;  %4052 = vmatprep.mubr.bf16.mxu0 %v4732_v20  ;;  %v4862_v2 = vpack.c.bf16 %v3308_v42, %v3307_v41  ;;  %v2600_v39 = vpack.c.bf16 %v3446_v46, %v3445_v4  ;;  %v3397_v41 = vld [vmem:[%s4300_s23 + $0x91] sm:$0xff] }
  0xfe   : > { %v4851_v53 = vpop.f32.mrf.mxu0  ;;  %v4853_v0 = vpop.f32.mrf.mxu1  ;;  %v2298_v60 = vpack.c.bf16 %v3398_v47, %v3397_v41 }
 0x100   : > { %v4858_v22 = vpop.f32.mrf.mxu0  ;;  %v4860_v1 = vpop.f32.mrf.mxu1 }
 0x102   : > { %v4864_v56 = vpop.f32.mrf.mxu0  ;;  %v4866_v57 = vpop.f32.mrf.mxu1 }
 0x104   : > { %v4868_v44 = vpop.f32.mrf.mxu0  ;;  %v4870_v54 = vpop.f32.mrf.mxu1  ;;  %4005 = vmatmul.mubr.bf16.gmra.mxu1 %v4862_v2  ;;  %4053 = vmatmul.mubr.bf16.gmra.mxu0 %v2003_v27 }
 0x105   : > { %4072 = vmatprep.mubr.bf16.mxu1 %v2294_v28  ;;  %4120 = vmatprep.mubr.bf16.mxu0 %v2600_v39  ;;  %v2297_v39 = vpack.c.bf16 %v3396_v52, %v3395_v51  ;;  %v3401_v51 = vld [vmem:[%s4300_s23 + $0xc1] sm:$0xff] }
 0x106   : > { %v4878_v19 = vpop.f32.mrf.mxu0  ;;  %v4880_v9 = vpop.f32.mrf.mxu1 }
 0x108   : > { %v4885_v20 = vpop.f32.mrf.mxu0  ;;  %v4887_v45 = vpop.f32.mrf.mxu1 }
 0x10a   : > { %v4889_v31 = vpop.f32.mrf.mxu0  ;;  %v4891_v32 = vpop.f32.mrf.mxu1 }
 0x10c   : > { %v3786_v49 = vpop.f32.mrf.mxu1  ;;  %v3834_v50 = vpop.f32.mrf.mxu0  ;;  %4073 = vmatmul.mubr.bf16.vlgmr.msra.gmra.mxu1 %v2295_v55  ;;  %4121 = vmatmul.mubr.bf16.vlgmr.msra.gmra.mxu0 %v2601_v61  ;;  %v3399_v61 = vld [vmem:[%s4300_s23 + $0xa9] sm:$0xff] }
 0x10d   : > { %v612_v7 = vadd.f32 %v3786_v49, %v4798_v11  ;;  %4076 = vmatprep.mubr.bf16.mxu1 %v2296_v6  ;;  %4124 = vmatprep.mubr.bf16.mxu0 %v2602_v30  ;;  %v2603_v11 = vpack.c.bf16 %v3452_v10, %v3451_v8  ;;  %v3455_v49 = vld [vmem:[%s4300_s23 + $0xaa] sm:$0xff]  ;;  %v3457_v8 = vld [vmem:[%s4300_s23 + $0xc2] sm:$0xff] }
 0x10e   : > { %v603_v42 = vpop.f32.mrf.mxu1  ;;  %v877_v43 = vpop.f32.mrf.mxu0  ;;  %v3458_v10 = vld [vmem:[%s4300_s23 + $0xca] sm:$0xff] }
 0x10f   : > { %v4902_v4 = vadd.f32 %v3834_v50, %v612_v7  ;;  %v604_v46 = vadd.f32 %v603_v42, %v4806_v33  ;;  %v3456_v50 = vld [vmem:[%s4300_s23 + $0xb2] sm:$0xff]  ;;  %v3402_v7 = vld [vmem:[%s4300_s23 + $0xc9] sm:$0xff] }
 0x110   : > { %v3787_v27 = vpop.f32.mrf.mxu1  ;;  %v3835_v28 = vpop.f32.mrf.mxu0 }
 0x111   : > { %v4905_v12 = vadd.f32 %v877_v43, %v604_v46  ;;  %v615_v13 = vadd.f32 %v3787_v27, %v4810_v35  ;;  %v3400_v35 = vld [vmem:[%s4300_s23 + $0xb1] sm:$0xff]  ;;  %v2300_v27 = vpack.c.bf16 %v3402_v7, %v3401_v51 }
 0x112   : > { %v606_v14 = vpop.f32.mrf.mxu1  ;;  %v880_v23 = vpop.f32.mrf.mxu0  ;;  %v2299_v48 = vpack.c.bf16 %v3400_v35, %v3399_v61  ;;  %v3405_v61 = vld [vmem:[%s4300_s23 + $0xf1] sm:$0xff] }
 0x113   : > { %v4908_v29 = vadd.f32 %v3835_v28, %v615_v13  ;;  %v607_v33 = vadd.f32 %v606_v14, %v4814_v59  ;;  %v2606_v28 = vpack.c.bf16 %v3458_v10, %v3457_v8  ;;  %v3403_v14 = vld [vmem:[%s4300_s23 + $0xd9] sm:$0xff] }
 0x114   : > { %v3790_v40 = vpop.f32.mrf.mxu1  ;;  %v3838_v55 = vpop.f32.mrf.mxu0  ;;  %4077 = vmatmul.mubr.bf16.gmra.mxu1 %v2297_v39  ;;  %4125 = vmatmul.mubr.bf16.gmra.mxu0 %v2603_v11 }
 0x115   : > { %v4913_v6 = vadd.f32 %v880_v23, %v607_v33  ;;  %v628_v30 = vadd.f32 %v3790_v40, %v4818_v24  ;;  %4080 = vmatprep.mubr.bf16.mxu1 %v2298_v60  ;;  %4128 = vmatprep.mubr.bf16.mxu0 %v2604_v5  ;;  %v2605_v24 = vpack.c.bf16 %v3456_v50, %v3455_v49  ;;  %v3459_v40 = vld [vmem:[%s4300_s23 + $0xda] sm:$0xff]  ;;  %v3461_v49 = vld [vmem:[%s4300_s23 + $0xf2] sm:$0xff] }
 0x116   : > { %v619_v52 = vpop.f32.mrf.mxu1  ;;  %v893_v59 = vpop.f32.mrf.mxu0  ;;  %v3462_v50 = vld [vmem:[%s4300_s23 + $0xfa] sm:$0xff] }
 0x117   : > { %v4922_v41 = vadd.f32 %v3838_v55, %v628_v30  ;;  %v620_v42 = vadd.f32 %v619_v52, %v4826_v15  ;;  %v3460_v55 = vld [vmem:[%s4300_s23 + $0xe2] sm:$0xff]  ;;  %v3406_v30 = vld [vmem:[%s4300_s23 + $0xf9] sm:$0xff] }
 0x118   : > { %v3791_v43 = vpop.f32.mrf.mxu1  ;;  %v3839_v47 = vpop.f32.mrf.mxu0 }
 0x119   : > { %v4925_v3 = vadd.f32 %v893_v59, %v620_v42  ;;  %v631_v46 = vadd.f32 %v3791_v43, %v4830_v17  ;;  %v3404_v17 = vld [vmem:[%s4300_s23 + $0xe1] sm:$0xff]  ;;  %v2302_v43 = vpack.c.bf16 %v3406_v30, %v3405_v61 }
 0x11a   : > { %v622_v39 = vpop.f32.mrf.mxu1  ;;  %v896_v11 = vpop.f32.mrf.mxu0  ;;  %v2301_v8 = vpack.c.bf16 %v3404_v17, %v3403_v14  ;;  %v3409_v14 = vld [vmem:[%s4300_s23 + $0x121] sm:$0xff] }
 0x11b   : > { %v4928_v13 = vadd.f32 %v3839_v47, %v631_v46  ;;  %v623_v15 = vadd.f32 %v622_v39, %v4834_v36  ;;  %v2608_v47 = vpack.c.bf16 %v3462_v50, %v3461_v49  ;;  %v3407_v39 = vld [vmem:[%s4300_s23 + $0x109] sm:$0xff] }
 0x11c   : > { %v3794_v60 = vpop.f32.mrf.mxu1  ;;  %v3842_v5 = vpop.f32.mrf.mxu0  ;;  %4081 = vmatmul.mubr.bf16.gmra.mxu1 %v2299_v48  ;;  %4129 = vmatmul.mubr.bf16.gmra.mxu0 %v2605_v24 }
 0x11d   : > { %v4933_v23 = vadd.f32 %v896_v11, %v623_v15  ;;  %v644_v33 = vadd.f32 %v3794_v60, %v4838_v37  ;;  %4084 = vmatprep.mubr.bf16.mxu1 %v2300_v27  ;;  %4132 = vmatprep.mubr.bf16.mxu0 %v2606_v28  ;;  %v2607_v37 = vpack.c.bf16 %v3460_v55, %v3459_v40  ;;  %v3463_v60 = vld [vmem:[%s4300_s23 + $0x10a] sm:$0xff]  ;;  %v3465_v40 = vld [vmem:[%s4300_s23 + $0x122] sm:$0xff] }
 0x11e   : > { %v635_v35 = vpop.f32.mrf.mxu1  ;;  %v909_v36 = vpop.f32.mrf.mxu0  ;;  %v3466_v55 = vld [vmem:[%s4300_s23 + $0x12a] sm:$0xff] }
 0x11f   : > { %v4942_v51 = vadd.f32 %v3842_v5, %v644_v33  ;;  %v636_v52 = vadd.f32 %v635_v35, %v4851_v53  ;;  %v3464_v5 = vld [vmem:[%s4300_s23 + $0x112] sm:$0xff]  ;;  %v3410_v33 = vld [vmem:[%s4300_s23 + $0x129] sm:$0xff] }
 0x120   : > { %v3795_v59 = vpop.f32.mrf.mxu1  ;;  %v3843_v7 = vpop.f32.mrf.mxu0 }
 0x121   : > { %v4945_v10 = vadd.f32 %v909_v36, %v636_v52  ;;  %v647_v42 = vadd.f32 %v3795_v59, %v4858_v22  ;;  %v3408_v22 = vld [vmem:[%s4300_s23 + $0x111] sm:$0xff]  ;;  %v2304_v59 = vpack.c.bf16 %v3410_v33, %v3409_v14 }
 0x122   : > { %v638_v48 = vpop.f32.mrf.mxu1  ;;  %v912_v24 = vpop.f32.mrf.mxu0  ;;  %v2303_v49 = vpack.c.bf16 %v3408_v22, %v3407_v39  ;;  %v3413_v39 = vld [vmem:[%s4300_s23 + $0x151] sm:$0xff] }
 0x123   : > { %v4948_v46 = vadd.f32 %v3843_v7, %v647_v42  ;;  %v639_v53 = vadd.f32 %v638_v48, %v4864_v56  ;;  %v2610_v7 = vpack.c.bf16 %v3466_v55, %v3465_v40  ;;  %v3411_v48 = vld [vmem:[%s4300_s23 + $0x139] sm:$0xff] }
 0x124   : > { %v3798_v27 = vpop.f32.mrf.mxu1  ;;  %v3846_v28 = vpop.f32.mrf.mxu0  ;;  %4085 = vmatmul.mubr.bf16.gmra.mxu1 %v2301_v8  ;;  %4133 = vmatmul.mubr.bf16.gmra.mxu0 %v2607_v37 }
 0x125   : > { %v4953_v11 = vadd.f32 %v912_v24, %v639_v53  ;;  %v660_v15 = vadd.f32 %v3798_v27, %v4868_v44  ;;  %4088 = vmatprep.mubr.bf16.mxu1 %v2302_v43  ;;  %4136 = vmatprep.mubr.bf16.mxu0 %v2608_v47  ;;  %v2609_v44 = vpack.c.bf16 %v3464_v5, %v3463_v60  ;;  %v3467_v27 = vld [vmem:[%s4300_s23 + $0x13a] sm:$0xff]  ;;  %v3469_v60 = vld [vmem:[%s4300_s23 + $0x152] sm:$0xff] }
 0x126   : > { %v651_v17 = vpop.f32.mrf.mxu1  ;;  %v925_v56 = vpop.f32.mrf.mxu0  ;;  %v3470_v5 = vld [vmem:[%s4300_s23 + $0x15a] sm:$0xff] }
 0x127   : > { %v4962_v61 = vadd.f32 %v3846_v28, %v660_v15  ;;  %v652_v35 = vadd.f32 %v651_v17, %v4878_v19  ;;  %v3468_v28 = vld [vmem:[%s4300_s23 + $0x142] sm:$0xff]  ;;  %v3414_v15 = vld [vmem:[%s4300_s23 + $0x159] sm:$0xff] }
 0x128   : > { %v3799_v36 = vpop.f32.mrf.mxu1  ;;  %v3847_v30 = vpop.f32.mrf.mxu0  ;;  %v2611_v55 = vpack.c.bf16 %v3468_v28, %v3467_v27 }
 0x129   : > { %v4965_v50 = vadd.f32 %v925_v56, %v652_v35  ;;  %v663_v52 = vadd.f32 %v3799_v36, %v4885_v20  ;;  %v3412_v20 = vld [vmem:[%s4300_s23 + $0x141] sm:$0xff]  ;;  %v2306_v36 = vpack.c.bf16 %v3414_v15, %v3413_v39 }
 0x12a   : > { %v654_v8 = vpop.f32.mrf.mxu1  ;;  %v928_v37 = vpop.f32.mrf.mxu0  ;;  %v2305_v40 = vpack.c.bf16 %v3412_v20, %v3411_v48 }
 0x12b   : > { %v4968_v42 = vadd.f32 %v3847_v30, %v663_v52  ;;  %v655_v19 = vadd.f32 %v654_v8, %v4889_v31  ;;  %v2612_v30 = vpack.c.bf16 %v3470_v5, %v3469_v60  ;;  %v3415_v8 = vld [vmem:[%s4300_s23 + $0x169] sm:$0xff] }
 0x12c   : > { %v3802_v43 = vpop.f32.mrf.mxu1  ;;  %v3850_v47 = vpop.f32.mrf.mxu0  ;;  %4089 = vmatmul.mubr.bf16.gmra.mxu1 %v2303_v49  ;;  %4137 = vmatmul.mubr.bf16.gmra.mxu0 %v2609_v44 }
 0x12d   : > { %v4973_v24 = vadd.f32 %v928_v37, %v655_v19  ;;  %v676_v53 = vadd.f32 %v3802_v43, %v4800_v26  ;;  %4092 = vmatprep.mubr.bf16.mxu1 %v2304_v59  ;;  %4140 = vmatprep.mubr.bf16.mxu0 %v2610_v7  ;;  %v3416_v19 = vld [vmem:[%s4300_s23 + $0x171] sm:$0xff] }
 0x12e   : > { %v667_v22 = vpop.f32.mrf.mxu1  ;;  %v941_v31 = vpop.f32.mrf.mxu0  ;;  %v3471_v43 = vld [vmem:[%s4300_s23 + $0x16a] sm:$0xff]  ;;  %v2307_v39 = vpack.c.bf16 %v3416_v19, %v3415_v8 }
 0x12f   : > { %v4982_v14 = vadd.f32 %v3850_v47, %v676_v53  ;;  %v668_v17 = vadd.f32 %v667_v22, %v4808_v34  ;;  %v3472_v47 = vld [vmem:[%s4300_s23 + $0x172] sm:$0xff] }
 0x130   : > { %v3803_v56 = vpop.f32.mrf.mxu1  ;;  %v3851_v33 = vpop.f32.mrf.mxu0  ;;  %v2613_v22 = vpack.c.bf16 %v3472_v47, %v3471_v43 }
 0x131   : > { %v4985_v26 = vadd.f32 %v941_v31, %v668_v17  ;;  %v679_v35 = vadd.f32 %v3803_v56, %v4812_v58 }
 0x132   : > { %v670_v49 = vpop.f32.mrf.mxu1  ;;  %v944_v44 = vpop.f32.mrf.mxu0 }
 0x133   : > { %v4988_v52 = vadd.f32 %v3851_v33, %v679_v35  ;;  %v671_v34 = vadd.f32 %v670_v49, %v4816_v62  ;;  %v3475_v35 = vld [vmem:[%s4300_s23 + $0x19a] sm:$0xff] }
 0x134   : > { %v3806_v59 = vpop.f32.mrf.mxu1  ;;  %v3854_v7 = vpop.f32.mrf.mxu0  ;;  %4093 = vmatmul.mubr.bf16.gmra.mxu1 %v2305_v40  ;;  %4141 = vmatmul.mubr.bf16.gmra.mxu0 %v2611_v55 }
 0x135   : > { %v4992_v37 = vadd.f32 %v944_v44, %v671_v34  ;;  %v692_v58 = vadd.f32 %v3806_v59, %v4820_v63  ;;  %4096 = vmatprep.mubr.bf16.mxu1 %v2306_v36  ;;  %4144 = vmatprep.mubr.bf16.mxu0 %v2612_v30  ;;  %v3476_v36 = vld [vmem:[%s4300_s23 + $0x1a2] sm:$0xff] }
 0x136   : > { %v683_v48 = vpop.f32.mrf.mxu1  ;;  %v957_v20 = vpop.f32.mrf.mxu0  ;;  %v2615_v8 = vpack.c.bf16 %v3476_v36, %v3475_v35 }
 0x137   : > { %v4998_v53 = vadd.f32 %v3854_v7, %v692_v58  ;;  %v684_v62 = vadd.f32 %v683_v48, %v4828_v16  ;;  %v3419_v16 = vld [vmem:[%s4300_s23 + $0x199] sm:$0xff] }
 0x138   : > { %v3807_v27 = vpop.f32.mrf.mxu1  ;;  %v3855_v28 = vpop.f32.mrf.mxu0 }
 0x139   : > { %v5001_v31 = vadd.f32 %v957_v20, %v684_v62  ;;  %v695_v63 = vadd.f32 %v3807_v27, %v4832_v25  ;;  %v3420_v25 = vld [vmem:[%s4300_s23 + $0x1a1] sm:$0xff]  ;;  %s3503_s23 = sshll.u32 %s5485_s13, 8 }
 0x13a   : > { %v686_v15 = vpop.f32.mrf.mxu1  ;;  %v960_v60 = vpop.f32.mrf.mxu0  ;;  %v2309_v7 = vpack.c.bf16 %v3420_v25, %v3419_v16  ;;  %s5271_s19 = scalar_lea.vmem %s5400_s2, %s3503_s23 }
 0x13b   : > { %v5004_v5 = vadd.f32 %v3855_v28, %v695_v63  ;;  %v687_v17 = vadd.f32 %v686_v15, %v4836_v18 }
 0x13c   : > { %v3810_v56 = vpop.f32.mrf.mxu1  ;;  %v3858_v33 = vpop.f32.mrf.mxu0  ;;  %4097 = vmatmul.mubr.bf16.gmra.mxu1 %v2307_v39  ;;  %4145 = vmatmul.mubr.bf16.gmra.mxu0 %v2613_v22 }
 0x13d   : > { %v5008_v40 = vadd.f32 %v960_v60, %v687_v17  ;;  %v708_v55 = vadd.f32 %v3810_v56, %v4840_v38  ;;  %4100 = vmatprep.mubr.bf16.mxu1 %v4734_v21  ;;  %4148 = vmatprep.mubr.bf16.mxu0 %v4862_v2 }
 0x13e   : > { %v699_v30 = vpop.f32.mrf.mxu1  ;;  %v973_v49 = vpop.f32.mrf.mxu0 }
 0x13f   : > { %v5016_v44 = vadd.f32 %v3858_v33, %v708_v55  ;;  %v700_v18 = vadd.f32 %v699_v30, %v4853_v0 }
 0x140   : > { %v3811_v34 = vpop.f32.mrf.mxu1  ;;  %v3859_v59 = vpop.f32.mrf.mxu0 }
 0x141   : > { %v5019_v58 = vadd.f32 %v973_v49, %v700_v18  ;;  %v711_v38 = vadd.f32 %v3811_v34, %v4860_v1 }
 0x142   : > { %v702_v21 = vpop.f32.mrf.mxu1  ;;  %v976_v19 = vpop.f32.mrf.mxu0 }
 0x143   : > { %v5022_v2 = vadd.f32 %v3859_v59, %v711_v38  ;;  %v703_v43 = vadd.f32 %v702_v21, %v4866_v57 }
 0x144   : > { %v3814_v47 = vpop.f32.mrf.mxu1  ;;  %v3862_v48 = vpop.f32.mrf.mxu0  ;;  %4101 = vmatmul.mubr.bf16.gmra.mxu1 %v2309_v7  ;;  %4149 = vmatmul.mubr.bf16.gmra.mxu0 %v2615_v8 }
 0x145   : > { %v5025_v20 = vadd.f32 %v976_v19, %v703_v43  ;;  %v724_v0 = vadd.f32 %v3814_v47, %v4870_v54 }
 0x146   : > { %v715_v62 = vpop.f32.mrf.mxu1  ;;  %v989_v27 = vpop.f32.mrf.mxu0 }
 0x147   : > { %v5028_v28 = vadd.f32 %v3862_v48, %v724_v0  ;;  %v716_v1 = vadd.f32 %v715_v62, %v4880_v9 }
 0x148   : > { %v3815_v39 = vpop.f32.mrf.mxu1  ;;  %v3863_v22 = vpop.f32.mrf.mxu0 }
 0x149   : > { %v5031_v63 = vadd.f32 %v989_v27, %v716_v1  ;;  %v727_v57 = vadd.f32 %v3815_v39, %v4887_v45 }
 0x14a   : > { %v718_v15 = vpop.f32.mrf.mxu1  ;;  %v992_v60 = vpop.f32.mrf.mxu0 }
 0x14b   : > { %v5034_v17 = vadd.f32 %v3863_v22, %v727_v57  ;;  %v719_v56 = vadd.f32 %v718_v15, %v4891_v32 }
 0x14c   : > { %v3882_v33 = vpop.f32.mrf.mxu1  ;;  %v3930_v54 = vpop.f32.mrf.mxu0 }
 0x14d   : > { %v5037_v16 = vadd.f32 %v992_v60, %v719_v56  ;;  %v1313_v55 = vadd.f32 %v3882_v33, %v4902_v4 }
 0x14e   : > { %v1184_v25 = vpop.f32.mrf.mxu1  ;;  %v1490_v9 = vpop.f32.mrf.mxu0 }
 0x14f   : > { %v5040_v35 = vadd.f32 %v3930_v54, %v1313_v55  ;;  %v1311_v36 = vadd.f32 %v1184_v25, %v4905_v12 }
 0x150   : > { %v3883_v30 = vpop.f32.mrf.mxu1  ;;  %v3931_v45 = vpop.f32.mrf.mxu0 }
 0x151   : > { %v5043_v49 = vadd.f32 %v1490_v9, %v1311_v36  ;;  %v1314_v18 = vadd.f32 %v3883_v30, %v4908_v29 }
 0x152   : > { %v1187_v34 = vpop.f32.mrf.mxu1  ;;  %v1493_v32 = vpop.f32.mrf.mxu0 }
 0x153   : > { %v5046_v59 = vadd.f32 %v3931_v45, %v1314_v18  ;;  %v1312_v7 = vadd.f32 %v1187_v34, %v4913_v6 }
 0x154   : > { %v3886_v8 = vpop.f32.mrf.mxu1  ;;  %v3934_v4 = vpop.f32.mrf.mxu0 }
 0x155   : > { %v5049_v38 = vadd.f32 %v1493_v32, %v1312_v7  ;;  %v1317_v21 = vadd.f32 %v3886_v8, %v4922_v41 }
 0x156   : > { %v1200_v19 = vpop.f32.mrf.mxu1  ;;  %v1506_v12 = vpop.f32.mrf.mxu0 }
 0x157   : > { %v5052_v43 = vadd.f32 %v3934_v4, %v1317_v21  ;;  %v1315_v47 = vadd.f32 %v1200_v19, %v4925_v3 }
 0x158   : > { %v3887_v48 = vpop.f32.mrf.mxu1  ;;  %v3935_v29 = vpop.f32.mrf.mxu0 }
 0x159   : > { %v5055_v0 = vadd.f32 %v1506_v12, %v1315_v47  ;;  %v1318_v62 = vadd.f32 %v3887_v48, %v4928_v13 }
 0x15a   : > { %v1203_v27 = vpop.f32.mrf.mxu1  ;;  %v1509_v6 = vpop.f32.mrf.mxu0 }
 0x15b   : > { %v5058_v1 = vadd.f32 %v3935_v29, %v1318_v62  ;;  %v1316_v39 = vadd.f32 %v1203_v27, %v4933_v23 }
 0x15c   : > { %v3890_v22 = vpop.f32.mrf.mxu1  ;;  %v3938_v41 = vpop.f32.mrf.mxu0 }
 0x15d   : > { %v5061_v57 = vadd.f32 %v1509_v6, %v1316_v39  ;;  %v1321_v15 = vadd.f32 %v3890_v22, %v4942_v51 }
 0x15e   : > { %v1216_v60 = vpop.f32.mrf.mxu1  ;;  %v1522_v3 = vpop.f32.mrf.mxu0 }
 0x15f   : > { %v5064_v56 = vadd.f32 %v3938_v41, %v1321_v15  ;;  %v1319_v33 = vadd.f32 %v1216_v60, %v4945_v10 }
 0x160   : > { %v3891_v54 = vpop.f32.mrf.mxu1  ;;  %v3939_v13 = vpop.f32.mrf.mxu0 }
 0x161   : > { %v5067_v55 = vadd.f32 %v1522_v3, %v1319_v33  ;;  %v1322_v25 = vadd.f32 %v3891_v54, %v4948_v46 }
 0x162   : > { %v1219_v9 = vpop.f32.mrf.mxu1  ;;  %v1525_v23 = vpop.f32.mrf.mxu0 }
 0x163   : > { %v5070_v36 = vadd.f32 %v3939_v13, %v1322_v25  ;;  %v1320_v30 = vadd.f32 %v1219_v9, %v4953_v11 }
 0x164   : > { %v3894_v45 = vpop.f32.mrf.mxu1  ;;  %v3942_v51 = vpop.f32.mrf.mxu0 }
 0x165   : > { %v5073_v18 = vadd.f32 %v1525_v23, %v1320_v30  ;;  %v1325_v34 = vadd.f32 %v3894_v45, %v4962_v61 }
 0x166   : > { %v1232_v32 = vpop.f32.mrf.mxu1  ;;  %v1538_v10 = vpop.f32.mrf.mxu0 }
 0x167   : > { %v5076_v7 = vadd.f32 %v3942_v51, %v1325_v34  ;;  %v1323_v8 = vadd.f32 %v1232_v32, %v4965_v50 }
 0x168   : > { %v3895_v4 = vpop.f32.mrf.mxu1  ;;  %v3943_v46 = vpop.f32.mrf.mxu0 }
 0x169   : > { %v5079_v21 = vadd.f32 %v1538_v10, %v1323_v8  ;;  %v1326_v19 = vadd.f32 %v3895_v4, %v4968_v42 }
 0x16a   : > { %v1235_v12 = vpop.f32.mrf.mxu1  ;;  %v1541_v11 = vpop.f32.mrf.mxu0 }
 0x16b   : > { %v5082_v47 = vadd.f32 %v3943_v46, %v1326_v19  ;;  %v1324_v48 = vadd.f32 %v1235_v12, %v4973_v24 }
 0x16c   : > { %v3898_v29 = vpop.f32.mrf.mxu1  ;;  %v3946_v61 = vpop.f32.mrf.mxu0 }
 0x16d   : > { %v5085_v62 = vadd.f32 %v1541_v11, %v1324_v48  ;;  %v1329_v27 = vadd.f32 %v3898_v29, %v4982_v14 }
 0x16e   : > { %v1248_v6 = vpop.f32.mrf.mxu1  ;;  %v1554_v50 = vpop.f32.mrf.mxu0 }
 0x16f   : > { %v5088_v39 = vadd.f32 %v3946_v61, %v1329_v27  ;;  %v1327_v22 = vadd.f32 %v1248_v6, %v4985_v26 }
 0x170   : > { %v3899_v41 = vpop.f32.mrf.mxu1  ;;  %v3947_v42 = vpop.f32.mrf.mxu0 }
 0x171   : > { %v5091_v15 = vadd.f32 %v1554_v50, %v1327_v22  ;;  %v1330_v60 = vadd.f32 %v3899_v41, %v4988_v52 }
 0x172   : > { %v1251_v3 = vpop.f32.mrf.mxu1  ;;  %v1557_v24 = vpop.f32.mrf.mxu0 }
 0x173   : > { %v5094_v33 = vadd.f32 %v3947_v42, %v1330_v60  ;;  %v1328_v54 = vadd.f32 %v1251_v3, %v4992_v37 }
 0x174   : > { %v3902_v13 = vpop.f32.mrf.mxu1  ;;  %v3950_v14 = vpop.f32.mrf.mxu0 }
 0x175   : > { %5402 = vst [vmem:[#allocation2_spill] sm:$0xff] %v5094_v33  ;;  %v5097_v25 = vadd.f32 %v1557_v24, %v1328_v54  ;;  %v1333_v9 = vadd.f32 %v3902_v13, %v4998_v53 }
 0x176   : > { %v1264_v23 = vpop.f32.mrf.mxu1  ;;  %v1570_v26 = vpop.f32.mrf.mxu0 }
 0x177   : > { %5403 = vst [vmem:[#allocation3_spill] sm:$0xff] %v5097_v25  ;;  %v5100_v30 = vadd.f32 %v3950_v14, %v1333_v9  ;;  %v1331_v45 = vadd.f32 %v1264_v23, %v5001_v31 }
 0x178   : > { %v3903_v51 = vpop.f32.mrf.mxu1  ;;  %v3951_v52 = vpop.f32.mrf.mxu0 }
 0x179   : > { %5404 = vst [vmem:[#allocation4_spill] sm:$0xff] %v5100_v30  ;;  %v5103_v34 = vadd.f32 %v1570_v26, %v1331_v45  ;;  %v1334_v32 = vadd.f32 %v3903_v51, %v5004_v5 }
 0x17a   : > { %v1267_v10 = vpop.f32.mrf.mxu1  ;;  %v1573_v37 = vpop.f32.mrf.mxu0 }
 0x17b   : > { %5405 = vst [vmem:[#allocation5_spill] sm:$0xff] %v5103_v34  ;;  %v5106_v8 = vadd.f32 %v3951_v52, %v1334_v32  ;;  %v1332_v4 = vadd.f32 %v1267_v10, %v5008_v40 }
 0x17c   : > { %v3906_v46 = vpop.f32.mrf.mxu1  ;;  %v3954_v53 = vpop.f32.mrf.mxu0 }
 0x17d   : > { %5406 = vst [vmem:[#allocation6_spill] sm:$0xff] %v5106_v8  ;;  %v5109_v19 = vadd.f32 %v1573_v37, %v1332_v4  ;;  %v1337_v12 = vadd.f32 %v3906_v46, %v5016_v44 }
 0x17e   : > { %v1280_v11 = vpop.f32.mrf.mxu1  ;;  %v1586_v31 = vpop.f32.mrf.mxu0 }
 0x17f   : > { %5407 = vst [vmem:[#allocation7_spill] sm:$0xff] %v5109_v19  ;;  %v5112_v48 = vadd.f32 %v3954_v53, %v1337_v12  ;;  %v1335_v29 = vadd.f32 %v1280_v11, %v5019_v58 }
 0x180   : > { %v3907_v61 = vpop.f32.mrf.mxu1  ;;  %v3955_v5 = vpop.f32.mrf.mxu0 }
 0x181   : > { %5408 = vst [vmem:[#allocation8_spill] sm:$0xff] %v5112_v48  ;;  %v5115_v27 = vadd.f32 %v1586_v31, %v1335_v29  ;;  %v1338_v6 = vadd.f32 %v3907_v61, %v5022_v2 }
 0x182   : > { %v1283_v50 = vpop.f32.mrf.mxu1  ;;  %v1589_v40 = vpop.f32.mrf.mxu0 }
 0x183   : > { %5409 = vst [vmem:[#allocation9_spill] sm:$0xff] %v5115_v27  ;;  %v5118_v22 = vadd.f32 %v3955_v5, %v1338_v6  ;;  %v1336_v41 = vadd.f32 %v1283_v50, %v5025_v20 }
 0x184   : > { %v3910_v42 = vpop.f32.mrf.mxu1  ;;  %v3958_v44 = vpop.f32.mrf.mxu0 }
 0x185   : > { %5410 = vst [vmem:[#allocation10_spill] sm:$0xff] %v5118_v22  ;;  %v5121_v60 = vadd.f32 %v1589_v40, %v1336_v41  ;;  %v1341_v3 = vadd.f32 %v3910_v42, %v5028_v28 }
 0x186   : > { %v1296_v24 = vpop.f32.mrf.mxu1  ;;  %v1602_v58 = vpop.f32.mrf.mxu0 }
 0x187   : > { %5411 = vst [vmem:[#allocation11_spill] sm:$0xff] %v5121_v60  ;;  %v5124_v54 = vadd.f32 %v3958_v44, %v1341_v3  ;;  %v1339_v13 = vadd.f32 %v1296_v24, %v5031_v63 }
 0x188   : > { %v3911_v14 = vpop.f32.mrf.mxu1  ;;  %v3959_v2 = vpop.f32.mrf.mxu0 }
 0x189   : > { %5412 = vst [vmem:[#allocation12_spill] sm:$0xff] %v5124_v54  ;;  %v5127_v9 = vadd.f32 %v1602_v58, %v1339_v13  ;;  %v1342_v23 = vadd.f32 %v3911_v14, %v5034_v17 }
 0x18a   : > { %v1299_v26 = vpop.f32.mrf.mxu1  ;;  %v1605_v20 = vpop.f32.mrf.mxu0 }
 0x18b   : > { %5413 = vst [vmem:[#allocation13_spill] sm:$0xff] %v5127_v9  ;;  %v5130_v45 = vadd.f32 %v3959_v2, %v1342_v23  ;;  %v1340_v51 = vadd.f32 %v1299_v26, %v5037_v16 }
 0x18c   : > { %v3978_v52 = vpop.f32.mrf.mxu1  ;;  %v5133_v28 = vpop.f32.mrf.mxu0 }
 0x18d   : > { %5414 = vst [vmem:[#allocation14_spill] sm:$0xff] %v5130_v45  ;;  %v5135_v32 = vadd.f32 %v1605_v20, %v1340_v51 }
 0x18e   : > { %v1796_v10 = vpop.f32.mrf.mxu1  ;;  %v5137_v37 = vpop.f32.mrf.mxu0 }
 0x18f   : > { %5415 = vst [vmem:[#allocation15_spill] sm:$0xff] %v5135_v32 }
 0x190   : > { %v5139_v63 = vpop.f32.mrf.mxu1  ;;  %v5141_v4 = vpop.f32.mrf.mxu0 }
 0x192   : > { %v5143_v46 = vpop.f32.mrf.mxu1  ;;  %v5145_v17 = vpop.f32.mrf.mxu0 }
 0x194   : > { %v5147_v53 = vpop.f32.mrf.mxu1  ;;  %v5149_v12 = vpop.f32.mrf.mxu0 }
 0x196   : > { %v5151_v16 = vpop.f32.mrf.mxu1  ;;  %v5153_v11 = vpop.f32.mrf.mxu0 }
 0x198   : > { %v5155_v31 = vpop.f32.mrf.mxu1  ;;  %v5157_v29 = vpop.f32.mrf.mxu0 }
 0x19a   : > { %v5159_v61 = vpop.f32.mrf.mxu1  ;;  %v5161_v5 = vpop.f32.mrf.mxu0 }
 0x19c   : > { %v5163_v6 = vpop.f32.mrf.mxu1  ;;  %v5165_v50 = vpop.f32.mrf.mxu0 }
 0x19e   : > { %v5167_v40 = vpop.f32.mrf.mxu1  ;;  %v5169_v41 = vpop.f32.mrf.mxu0 }
 0x1a0   : > { %v5171_v42 = vpop.f32.mrf.mxu1  ;;  %v5173_v44 = vpop.f32.mrf.mxu0 }
 0x1a2   : > { %v5175_v3 = vpop.f32.mrf.mxu1  ;;  %v5177_v24 = vpop.f32.mrf.mxu0 }
 0x1a4   : > { %v5179_v58 = vpop.f32.mrf.mxu1  ;;  %v5181_v13 = vpop.f32.mrf.mxu0 }
 0x1a6   : > { %v5183_v14 = vpop.f32.mrf.mxu1  ;;  %v5185_v2 = vpop.f32.mrf.mxu0 }
 0x1a8   : > { %v5187_v23 = vpop.f32.mrf.mxu1  ;;  %v5189_v26 = vpop.f32.mrf.mxu0 }
 0x1aa   : > { %v5191_v20 = vpop.f32.mrf.mxu1  ;;  %v5193_v51 = vpop.f32.mrf.mxu0 }
 0x1ac   : > { %v5195_v32 = vpop.f32.mrf.mxu1  ;;  %v5197_v45 = vpop.f32.mrf.mxu0 }
 0x1ae   : > { %v5199_v9 = vpop.f32.mrf.mxu1  ;;  %v5201_v54 = vpop.f32.mrf.mxu0 }
 0x1af   : > { %5416 = vst [vmem:[#allocation16_spill] sm:$0xff] %v5201_v54 }
 0x1b0   : > { %v5203_v60 = vpop.f32.mrf.mxu1  ;;  %v5205_v22 = vpop.f32.mrf.mxu0 }
 0x1b1   : > { %5417 = vst [vmem:[#allocation17_spill] sm:$0xff] %v5203_v60  ;;  %5418 = vst [vmem:[#allocation18_spill] sm:$0xff] %v5205_v22 }
 0x1b2   : > { %v5207_v27 = vpop.f32.mrf.mxu1  ;;  %v5209_v48 = vpop.f32.mrf.mxu0 }
 0x1b3   : > { %5419 = vst [vmem:[#allocation19_spill] sm:$0xff] %v5207_v27  ;;  %5420 = vst [vmem:[#allocation20_spill] sm:$0xff] %v5209_v48 }
 0x1b4   : > { %v5211_v19 = vpop.f32.mrf.mxu1  ;;  %v5213_v8 = vpop.f32.mrf.mxu0 }
 0x1b5   : > { %5421 = vst [vmem:[#allocation21_spill] sm:$0xff] %v5211_v19  ;;  %5422 = vst [vmem:[#allocation22_spill] sm:$0xff] %v5213_v8 }
 0x1b6   : > { %v5215_v34 = vpop.f32.mrf.mxu1  ;;  %v5217_v30 = vpop.f32.mrf.mxu0 }
 0x1b7   : > { %5423 = vst [vmem:[#allocation23_spill] sm:$0xff] %v5215_v34  ;;  %5424 = vst [vmem:[#allocation24_spill] sm:$0xff] %v5217_v30 }
 0x1b8   : > { %v5219_v25 = vpop.f32.mrf.mxu1  ;;  %v5221_v33 = vpop.f32.mrf.mxu0 }
 0x1b9   : > { %5425 = vst [vmem:[#allocation25_spill] sm:$0xff] %v5219_v25  ;;  %5426 = vst [vmem:[#allocation26_spill] sm:$0xff] %v5221_v33 }
 0x1ba   : > { %v5223_v54 = vpop.f32.mrf.mxu1  ;;  %v5225_v60 = vpop.f32.mrf.mxu0 }
 0x1bb   : > { %5427 = vst [vmem:[#allocation27_spill] sm:$0xff] %v5223_v54  ;;  %5428 = vst [vmem:[#allocation28_spill] sm:$0xff] %v5225_v60 }
 0x1bc   : > { %v5227_v22 = vpop.f32.mrf.mxu1  ;;  %v5229_v27 = vpop.f32.mrf.mxu0 }
 0x1bd   : > { %5429 = vst [vmem:[#allocation29_spill] sm:$0xff] %v5227_v22  ;;  %5430 = vst [vmem:[#allocation30_spill] sm:$0xff] %v5229_v27 }
 0x1be   : > { %v5231_v48 = vpop.f32.mrf.mxu1  ;;  %v5233_v19 = vpop.f32.mrf.mxu0 }
 0x1bf   : > { %5431 = vst [vmem:[#allocation31_spill] sm:$0xff] %v5231_v48  ;;  %5432 = vst [vmem:[#allocation32_spill] sm:$0xff] %v5233_v19  ;;  %v1925_v48 = vadd.f32 %v3978_v52, %v5040_v35  ;;  %v1924_v52 = vadd.f32 %v5143_v46, %v5049_v38 }
 0x1c0   : > { %v5235_v8 = vpop.f32.mrf.mxu1  ;;  %v5237_v30 = vpop.f32.mrf.mxu0 }
 0x1c1   : > { %5433 = vst [vmem:[#allocation33_spill] sm:$0xff] %v5235_v8  ;;  %5434 = vst [vmem:[#allocation34_spill] sm:$0xff] %v5237_v30  ;;  %v1923_v30 = vadd.f32 %v1796_v10, %v5043_v49  ;;  %v2231_v38 = vadd.f32 %v5145_v17, %v1924_v52 }
 0x1c2   : > { %v5239_v25 = vpop.f32.mrf.mxu1  ;;  %v5241_v33 = vpop.f32.mrf.mxu0 }
 0x1c3   : > { %5435 = vst [vmem:[#allocation35_spill] sm:$0xff] %v5239_v25  ;;  %5436 = vst [vmem:[#allocation36_spill] sm:$0xff] %v5241_v33  ;;  %v2232_v33 = vadd.f32 %v5133_v28, %v1925_v48  ;;  %v2230_v35 = vadd.f32 %v5137_v37, %v1923_v30  ;;  %v1929_v28 = vadd.f32 %v5147_v53, %v5052_v43 }
 0x1c4   : > { %v5243_v54 = vpop.f32.mrf.mxu1  ;;  %v5245_v60 = vpop.f32.mrf.mxu0 }
 0x1c5   : > { %5437 = vst [vmem:[#allocation37_spill] sm:$0xff] %v5245_v60  ;;  %v1926_v60 = vadd.f32 %v5139_v63, %v5046_v59 }
 0x1c6   : > { %v5247_v22 = vpop.f32.mrf.mxu1  ;;  %v5249_v27 = vpop.f32.mrf.mxu0 }
 0x1c7   : > { %5438 = vst [vmem:[#allocation38_spill] sm:$0xff] %v5247_v22  ;;  %5439 = vst [vmem:[#allocation39_spill] sm:$0xff] %v5249_v27  ;;  %v2233_v59 = vadd.f32 %v5141_v4, %v1926_v60  ;;  %v2236_v60 = vadd.f32 %v5149_v12, %v1929_v28  ;;  %v1928_v4 = vadd.f32 %v5159_v61, %v5061_v57 }
 0x1c8   : > { %v5252_v19 = vpop.f32.mrf.mxu1  ;;  %v5254_v8 = vpop.f32.mrf.mxu0  ;;  %v1933_v12 = vadd.f32 %v5163_v6, %v5064_v56 }
 0x1c9   : > { %5440 = vst [vmem:[#allocation40_spill] sm:$0xff] %v5254_v8  ;;  %v2235_v61 = vadd.f32 %v5161_v5, %v1928_v4 }
 0x1ca   : > { %v5257_v34 = vpop.f32.mrf.mxu1  ;;  %v5259_v25 = vpop.f32.mrf.mxu0  ;;  %v2240_v6 = vadd.f32 %v5165_v50, %v1933_v12 }
 0x1cb   : > { %5441 = vst [vmem:[#allocation41_spill] sm:$0xff] %v5257_v34  ;;  %5442 = vst [vmem:[#allocation42_spill] sm:$0xff] %v5259_v25 }
 0x1cc   : > { %v4074_v22 = vpop.f32.mrf.mxu1  ;;  %v4122_v27 = vpop.f32.mrf.mxu0 }
 0x1cd   : > { %v2538_v8 = vadd.f32 %v4074_v22, %v2232_v33  ;;  %v1927_v33 = vadd.f32 %v5151_v16, %v5055_v0 }
 0x1ce   : > { %v2409_v49 = vpop.f32.mrf.mxu1  ;;  %v2715_v48 = vpop.f32.mrf.mxu0 }
 0x1cf   : > { %v2844_v10 = vadd.f32 %v4122_v27, %v2538_v8  ;;  %v2536_v30 = vadd.f32 %v2409_v49, %v2230_v35  ;;  %v1930_v27 = vadd.f32 %v5155_v31, %v5058_v1  ;;  %v2234_v0 = vadd.f32 %v5153_v11, %v1927_v33 }
 0x1d0   : > { %v4075_v37 = vpop.f32.mrf.mxu1  ;;  %v4123_v63 = vpop.f32.mrf.mxu0 }
 0x1d1   : > { %2876 = vst [vmem:[%s5271_s19 + $0x10] sm:$0xff] %v2844_v10  ;;  %v2842_v22 = vadd.f32 %v2715_v48, %v2536_v30  ;;  %v2539_v46 = vadd.f32 %v4075_v37, %v2233_v59  ;;  %v2237_v57 = vadd.f32 %v5157_v29, %v1930_v27  ;;  %v2946_v28 = vmul.f32 %v2844_v10, %v2844_v10 }
 0x1d2   : > { %v2412_v25 = vpop.f32.mrf.mxu1  ;;  %v2718_v34 = vpop.f32.mrf.mxu0 }
 0x1d3   : > { %2874 = vst [vmem:[%s5271_s19] sm:$0xff] %v2842_v22  ;;  %v2845_v43 = vadd.f32 %v4123_v63, %v2539_v46  ;;  %v2537_v8 = vadd.f32 %v2412_v25, %v2231_v38  ;;  %v2944_v52 = vmul.f32 %v2842_v22, %v2842_v22  ;;  %v1931_v63 = vadd.f32 %v5167_v40, %v5067_v55 }
 0x1d4   : > { %v4078_v17 = vpop.f32.mrf.mxu1  ;;  %v4126_v53 = vpop.f32.mrf.mxu0  ;;  %v1934_v38 = vadd.f32 %v5171_v42, %v5070_v36 }
 0x1d5   : > { %2877 = vst [vmem:[%s5271_s19 + $0x18] sm:$0xff] %v2845_v43  ;;  %v2843_v16 = vadd.f32 %v2718_v34, %v2537_v8  ;;  %v2542_v35 = vadd.f32 %v4078_v17, %v2236_v60  ;;  %v2947_v5 = vmul.f32 %v2845_v43, %v2845_v43  ;;  %v1932_v8 = vadd.f32 %v5175_v3, %v5073_v18 }
 0x1d6   : > { %v2425_v49 = vpop.f32.mrf.mxu1  ;;  %v2731_v25 = vpop.f32.mrf.mxu0 }
 0x1d7   : > { %2875 = vst [vmem:[%s5271_s19 + $0x8] sm:$0xff] %v2843_v16  ;;  %v2906_v48 = vadd.f32 %v2843_v16, %v2842_v22  ;;  %v2945_v1 = vmul.f32 %v2843_v16, %v2843_v16  ;;  %v2848_v31 = vadd.f32 %v4126_v53, %v2542_v35  ;;  %v2540_v59 = vadd.f32 %v2425_v49, %v2234_v0 }
 0x1d8   : > { %v4079_v11 = vpop.f32.mrf.mxu1  ;;  %v4127_v34 = vpop.f32.mrf.mxu0  ;;  %v2238_v53 = vadd.f32 %v5169_v41, %v1931_v63  ;;  %v2241_v0 = vadd.f32 %v5173_v44, %v1934_v38  ;;  %v1937_v49 = vadd.f32 %v5179_v58, %v5076_v7 }
 0x1d9   : > { %v2907_v30 = vadd.f32 %v2906_v48, %v2844_v10  ;;  %v2976_v37 = vadd.f32 %v2945_v1, %v2944_v52  ;;  %2880 = vst [vmem:[%s5271_s19 + $0x30] sm:$0xff] %v2848_v31  ;;  %v2846_v56 = vadd.f32 %v2731_v25, %v2540_v59  ;;  %v2543_v33 = vadd.f32 %v4079_v11, %v2237_v57 }
 0x1da   : > { %v2428_v29 = vpop.f32.mrf.mxu1  ;;  %v2734_v22 = vpop.f32.mrf.mxu0  ;;  %v2239_v52 = vadd.f32 %v5177_v24, %v1932_v8  ;;  %v1935_v25 = vadd.f32 %v5183_v14, %v5079_v21  ;;  %v2950_v1 = vmul.f32 %v2848_v31, %v2848_v31  ;;  %v1938_v11 = vadd.f32 %v5187_v23, %v5082_v47 }
 0x1db   : > { %v2977_v46 = vadd.f32 %v2976_v37, %v2946_v28  ;;  %2878 = vst [vmem:[%s5271_s19 + $0x20] sm:$0xff] %v2846_v56  ;;  %v2908_v60 = vadd.f32 %v2907_v30, %v2845_v43  ;;  %v2541_v10 = vadd.f32 %v2428_v29, %v2235_v61  ;;  %v2948_v50 = vmul.f32 %v2846_v56, %v2846_v56 }
 0x1dc   : > { %v2849_v27 = vadd.f32 %v4127_v34, %v2543_v33  ;;  %v4082_v4 = vpop.f32.mrf.mxu1  ;;  %v4130_v55 = vpop.f32.mrf.mxu0  ;;  %v2244_v37 = vadd.f32 %v5181_v13, %v1937_v49  ;;  %v2245_v33 = vadd.f32 %v5189_v26, %v1938_v11  ;;  %v1936_v29 = vadd.f32 %v5191_v20, %v5085_v62 }
 0x1dd   : > { %v2909_v40 = vadd.f32 %v2908_v60, %v2846_v56  ;;  %v2978_v17 = vadd.f32 %v2977_v46, %v2947_v5  ;;  %v2847_v36 = vadd.f32 %v2734_v22, %v2541_v10  ;;  %v2546_v42 = vadd.f32 %v4082_v4, %v2240_v6 }
 0x1de   : > { %2881 = vst [vmem:[%s5271_s19 + $0x38] sm:$0xff] %v2849_v27  ;;  %v2441_v16 = vpop.f32.mrf.mxu1  ;;  %v2747_v43 = vpop.f32.mrf.mxu0  ;;  %v2951_v34 = vmul.f32 %v2849_v27, %v2849_v27  ;;  %v2242_v56 = vadd.f32 %v5185_v2, %v1935_v25  ;;  %v1941_v22 = vadd.f32 %v5195_v32, %v5088_v39 }
 0x1df   : > { %v2979_v35 = vadd.f32 %v2978_v17, %v2948_v50  ;;  %2879 = vst [vmem:[%s5271_s19 + $0x28] sm:$0xff] %v2847_v36  ;;  %v2910_v12 = vadd.f32 %v2909_v40, %v2847_v36  ;;  %v2949_v18 = vmul.f32 %v2847_v36, %v2847_v36  ;;  %v2852_v3 = vadd.f32 %v4130_v55, %v2546_v42  ;;  %v5443_v36 = vld [vmem:[#allocation2_spill] sm:$0xff]  ;;  %v5444_v42 = vld [vmem:[#allocation17_spill] sm:$0xff] }
 0x1e0   : > { %v2544_v41 = vadd.f32 %v2441_v16, %v2238_v53  ;;  %v4083_v48 = vpop.f32.mrf.mxu1  ;;  %v4131_v44 = vpop.f32.mrf.mxu0  ;;  %v1939_v50 = vadd.f32 %v5199_v9, %v5091_v15  ;;  %v2243_v40 = vadd.f32 %v5193_v51, %v1936_v29  ;;  %v2248_v17 = vadd.f32 %v5197_v45, %v1941_v22  ;;  %v5454_v22 = vld [vmem:[#allocation6_spill] sm:$0xff] }
 0x1e1   : > { %v2911_v59 = vadd.f32 %v2910_v12, %v2848_v31  ;;  %v2980_v57 = vadd.f32 %v2979_v35, %v2949_v18  ;;  %2884 = vst [vmem:[%s5271_s19 + $0x50] sm:$0xff] %v2852_v3  ;;  %v2547_v61 = vadd.f32 %v4083_v48, %v2241_v0  ;;  %v1942_v53 = vadd.f32 %v5444_v42, %v5443_v36  ;;  %v5445_v12 = vld [vmem:[#allocation16_spill] sm:$0xff]  ;;  %v5458_v42 = vld [vmem:[#allocation7_spill] sm:$0xff] }
 0x1e2   : > { %v2850_v24 = vadd.f32 %v2747_v43, %v2544_v41  ;;  %v2444_v28 = vpop.f32.mrf.mxu1  ;;  %v2750_v7 = vpop.f32.mrf.mxu0  ;;  %v2246_v18 = vadd.f32 %v5445_v12, %v1939_v50  ;;  %v5456_v50 = vld [vmem:[#allocation22_spill] sm:$0xff] }
 0x1e3   : > { %v2981_v58 = vadd.f32 %v2980_v57, %v2950_v1  ;;  %v2912_v30 = vadd.f32 %v2911_v59, %v2849_v27  ;;  %v2853_v21 = vadd.f32 %v4131_v44, %v2547_v61  ;;  %v2545_v14 = vadd.f32 %v2444_v28, %v2239_v52  ;;  %v5447_v52 = vld [vmem:[#allocation19_spill] sm:$0xff]  ;;  %v5448_v59 = vld [vmem:[#allocation18_spill] sm:$0xff]  ;;  %v5450_v28 = vld [vmem:[#allocation21_spill] sm:$0xff] }
 0x1e4   : > { %2882 = vst [vmem:[%s5271_s19 + $0x40] sm:$0xff] %v2850_v24  ;;  %v4086_v31 = vpop.f32.mrf.mxu1  ;;  %v4134_v6 = vpop.f32.mrf.mxu0  ;;  %v2952_v38 = vmul.f32 %v2850_v24, %v2850_v24  ;;  %v2954_v27 = vmul.f32 %v2852_v3, %v2852_v3  ;;  %v2249_v57 = vadd.f32 %v5448_v59, %v1942_v53  ;;  %v5459_v53 = vld [vmem:[#allocation27_spill] sm:$0xff] }
 0x1e5   : > { %v2913_v63 = vadd.f32 %v2912_v30, %v2850_v24  ;;  %v2982_v47 = vadd.f32 %v2981_v58, %v2951_v34  ;;  %2885 = vst [vmem:[%s5271_s19 + $0x58] sm:$0xff] %v2853_v21  ;;  %v2851_v23 = vadd.f32 %v2750_v7, %v2545_v14  ;;  %v2550_v13 = vadd.f32 %v4086_v31, %v2244_v37  ;;  %v5449_v24 = vld [vmem:[#allocation4_spill] sm:$0xff] }
 0x1e6   : > { %v2457_v5 = vpop.f32.mrf.mxu1  ;;  %v2763_v2 = vpop.f32.mrf.mxu0  ;;  %v2955_v9 = vmul.f32 %v2853_v21, %v2853_v21  ;;  %v1945_v7 = vadd.f32 %v5450_v28, %v5449_v24 }
 0x1e7   : > { %v2983_v46 = vadd.f32 %v2982_v47, %v2952_v38  ;;  %2883 = vst [vmem:[%s5271_s19 + $0x48] sm:$0xff] %v2851_v23  ;;  %v2914_v60 = vadd.f32 %v2913_v63, %v2851_v23  ;;  %v2953_v10 = vmul.f32 %v2851_v23, %v2851_v23  ;;  %v2548_v8 = vadd.f32 %v2457_v5, %v2242_v56  ;;  %v5452_v38 = vld [vmem:[#allocation5_spill] sm:$0xff]  ;;  %v5453_v47 = vld [vmem:[#allocation23_spill] sm:$0xff] }
 0x1e8   : > { %v2856_v26 = vadd.f32 %v4134_v6, %v2550_v13  ;;  %v4087_v4 = vpop.f32.mrf.mxu1  ;;  %v4135_v62 = vpop.f32.mrf.mxu0  ;;  %v5451_v6 = vld [vmem:[#allocation20_spill] sm:$0xff]  ;;  %v1943_v23 = vadd.f32 %v5453_v47, %v5452_v38  ;;  %v5455_v13 = vld [vmem:[#allocation25_spill] sm:$0xff]  ;;  %v5468_v38 = vld [vmem:[#allocation30_spill] sm:$0xff] }
 0x1e9   : > { %v2915_v20 = vadd.f32 %v2914_v60, %v2852_v3  ;;  %v2984_v55 = vadd.f32 %v2983_v46, %v2953_v10  ;;  %v2854_v39 = vadd.f32 %v2763_v2, %v2548_v8  ;;  %v2551_v32 = vadd.f32 %v4087_v4, %v2245_v33  ;;  %v5446_v3 = vld [vmem:[#allocation3_spill] sm:$0xff] }
 0x1ea   : > { %2888 = vst [vmem:[%s5271_s19 + $0x70] sm:$0xff] %v2856_v26  ;;  %v2460_v0 = vpop.f32.mrf.mxu1  ;;  %v2766_v15 = vpop.f32.mrf.mxu0  ;;  %v1940_v49 = vadd.f32 %v5447_v52, %v5446_v3  ;;  %v1946_v5 = vadd.f32 %v5455_v13, %v5454_v22  ;;  %v2958_v2 = vmul.f32 %v2856_v26, %v2856_v26 }
 0x1eb   : > { %v2985_v16 = vadd.f32 %v2984_v55, %v2954_v27  ;;  %2886 = vst [vmem:[%s5271_s19 + $0x60] sm:$0xff] %v2854_v39  ;;  %v2916_v43 = vadd.f32 %v2915_v20, %v2853_v21  ;;  %v2857_v35 = vadd.f32 %v4135_v62, %v2551_v32  ;;  %v2549_v51 = vadd.f32 %v2460_v0, %v2243_v40 }
 0x1ec   : > { %v4090_v45 = vpop.f32.mrf.mxu1  ;;  %v4138_v25 = vpop.f32.mrf.mxu0  ;;  %v2956_v48 = vmul.f32 %v2854_v39, %v2854_v39  ;;  %v2247_v63 = vadd.f32 %v5451_v6, %v1940_v49  ;;  %v2252_v27 = vadd.f32 %v5456_v50, %v1945_v7  ;;  %v1944_v0 = vadd.f32 %v5459_v53, %v5458_v42  ;;  %v5461_v49 = vld [vmem:[#allocation8_spill] sm:$0xff] }
 0x1ed   : > { %v2917_v41 = vadd.f32 %v2916_v43, %v2854_v39  ;;  %v2986_v44 = vadd.f32 %v2985_v16, %v2955_v9  ;;  %2889 = vst [vmem:[%s5271_s19 + $0x78] sm:$0xff] %v2857_v35  ;;  %v2554_v1 = vadd.f32 %v4090_v45, %v2248_v17  ;;  %v2855_v61 = vadd.f32 %v2766_v15, %v2549_v51  ;;  %v5457_v17 = vld [vmem:[#allocation24_spill] sm:$0xff]  ;;  %v5460_v9 = vld [vmem:[#allocation26_spill] sm:$0xff] }
 0x1ee   : > { %v2473_v11 = vpop.f32.mrf.mxu1  ;;  %v2779_v34 = vpop.f32.mrf.mxu0  ;;  %v2959_v20 = vmul.f32 %v2857_v35, %v2857_v35  ;;  %v2250_v36 = vadd.f32 %v5457_v17, %v1943_v23  ;;  %v2253_v16 = vadd.f32 %v5460_v9, %v1946_v5 }
 0x1ef   : > { %v2987_v58 = vadd.f32 %v2986_v44, %v2956_v48  ;;  %v2860_v30 = vadd.f32 %v4138_v25, %v2554_v1  ;;  %v2552_v21 = vadd.f32 %v2473_v11, %v2246_v18  ;;  %2887 = vst [vmem:[%s5271_s19 + $0x68] sm:$0xff] %v2855_v61  ;;  %v2918_v14 = vadd.f32 %v2917_v41, %v2855_v61  ;;  %v5464_v11 = vld [vmem:[#allocation9_spill] sm:$0xff] }
 0x1f0   : > { %v2957_v37 = vmul.f32 %v2855_v61, %v2855_v61  ;;  %v4091_v56 = vpop.f32.mrf.mxu1  ;;  %v4139_v31 = vpop.f32.mrf.mxu0 }
 0x1f1   : > { %2892 = vst [vmem:[%s5271_s19 + $0x90] sm:$0xff] %v2860_v30  ;;  %v2858_v33 = vadd.f32 %v2779_v34, %v2552_v21  ;;  %v2555_v29 = vadd.f32 %v4091_v56, %v2249_v57  ;;  %v2919_v46 = vadd.f32 %v2918_v14, %v2856_v26  ;;  %v5463_v57 = vld [vmem:[#allocation28_spill] sm:$0xff]  ;;  %v5465_v34 = vld [vmem:[#allocation31_spill] sm:$0xff]  ;;  %v5467_v21 = vld [vmem:[#allocation33_spill] sm:$0xff] }
 0x1f2   : > { %v2988_v60 = vadd.f32 %v2987_v58, %v2957_v37  ;;  %v2476_v10 = vpop.f32.mrf.mxu1  ;;  %v2782_v8 = vpop.f32.mrf.mxu0  ;;  %v2251_v61 = vadd.f32 %v5463_v57, %v1944_v0  ;;  %v1947_v24 = vadd.f32 %v5465_v34, %v5464_v11  ;;  %v5466_v58 = vld [vmem:[#allocation10_spill] sm:$0xff]  ;;  %v2962_v37 = vmul.f32 %v2860_v30, %v2860_v30 }
 0x1f3   : > { %2890 = vst [vmem:[%s5271_s19 + $0x80] sm:$0xff] %v2858_v33  ;;  %v2861_v4 = vadd.f32 %v4139_v31, %v2555_v29  ;;  %v2553_v62 = vadd.f32 %v2476_v10, %v2247_v63  ;;  %v2920_v39 = vadd.f32 %v2919_v46, %v2857_v35  ;;  %v2960_v12 = vmul.f32 %v2858_v33, %v2858_v33  ;;  %v5462_v35 = vld [vmem:[#allocation29_spill] sm:$0xff]  ;;  %v5469_v46 = vld [vmem:[#allocation32_spill] sm:$0xff]  ;;  %v5470_v10 = vld [vmem:[#allocation11_spill] sm:$0xff] }
 0x1f4   : > { %v2989_v55 = vadd.f32 %v2988_v60, %v2958_v2  ;;  %v4094_v32 = vpop.f32.mrf.mxu1  ;;  %v4142_v40 = vpop.f32.mrf.mxu0  ;;  %v1949_v51 = vadd.f32 %v5462_v35, %v5461_v49  ;;  %v1950_v14 = vadd.f32 %v5467_v21, %v5466_v58  ;;  %v2254_v60 = vadd.f32 %v5469_v46, %v1947_v24  ;;  %v5479_v21 = vld [vmem:[#allocation39_spill] sm:$0xff] }
 0x1f5   : > { %2893 = vst [vmem:[%s5271_s19 + $0x98] sm:$0xff] %v2861_v4  ;;  %v2859_v26 = vadd.f32 %v2782_v8, %v2553_v62  ;;  %v2558_v15 = vadd.f32 %v4094_v32, %v2252_v27  ;;  %v2921_v43 = vadd.f32 %v2920_v39, %v2858_v33  ;;  %v2963_v29 = vmul.f32 %v2861_v4, %v2861_v4  ;;  %v5471_v8 = vld [vmem:[#allocation35_spill] sm:$0xff]  ;;  %v5472_v62 = vld [vmem:[#allocation34_spill] sm:$0xff] }
 0x1f6   : > { %v2990_v18 = vadd.f32 %v2989_v55, %v2959_v20  ;;  %v2489_v3 = vpop.f32.mrf.mxu1  ;;  %v2795_v52 = vpop.f32.mrf.mxu0  ;;  %v2256_v47 = vadd.f32 %v5468_v38, %v1949_v51  ;;  %v1948_v50 = vadd.f32 %v5471_v8, %v5470_v10  ;;  %v2257_v20 = vadd.f32 %v5472_v62, %v1950_v14  ;;  %v5480_v14 = vld [vmem:[#allocation15_spill] sm:$0xff]  ;;  %v5483_v8 = vld [vmem:[#allocation42_spill] sm:$0xff] }
 0x1f7   : > { %2891 = vst [vmem:[%s5271_s19 + $0x88] sm:$0xff] %v2859_v26  ;;  %v2961_v45 = vmul.f32 %v2859_v26, %v2859_v26  ;;  %v2864_v25 = vadd.f32 %v4142_v40, %v2558_v15  ;;  %v2556_v41 = vadd.f32 %v2489_v3, %v2250_v36  ;;  %v2922_v44 = vadd.f32 %v2921_v43, %v2859_v26  ;;  %v5473_v36 = vld [vmem:[#allocation12_spill] sm:$0xff]  ;;  %v5476_v3 = vld [vmem:[#allocation38_spill] sm:$0xff] }
 0x1f8   : > { %v2991_v48 = vadd.f32 %v2990_v18, %v2960_v12  ;;  %v4095_v1 = vpop.f32.mrf.mxu1  ;;  %v4143_v59 = vpop.f32.mrf.mxu0  ;;  %v5474_v43 = vld [vmem:[#allocation36_spill] sm:$0xff]  ;;  %v5475_v18 = vld [vmem:[#allocation13_spill] sm:$0xff] }
 0x1f9   : > { %2896 = vst [vmem:[%s5271_s19 + $0xb0] sm:$0xff] %v2864_v25  ;;  %v2862_v28 = vadd.f32 %v2795_v52, %v2556_v41  ;;  %v2559_v7 = vadd.f32 %v4095_v1, %v2253_v16  ;;  %v2923_v56 = vadd.f32 %v2922_v44, %v2860_v30  ;;  %v2255_v12 = vadd.f32 %v5474_v43, %v1948_v50  ;;  %v5477_v44 = vld [vmem:[#allocation37_spill] sm:$0xff] }
 0x1fa   : > { %v2992_v31 = vadd.f32 %v2991_v48, %v2961_v45  ;;  %v2492_v6 = vpop.f32.mrf.mxu1  ;;  %v2798_v63 = vpop.f32.mrf.mxu0  ;;  %v1951_v52 = vadd.f32 %v5476_v3, %v5475_v18  ;;  %v2966_v51 = vmul.f32 %v2864_v25, %v2864_v25 }
 0x1fb   : > { %2894 = vst [vmem:[%s5271_s19 + $0xa0] sm:$0xff] %v2862_v28  ;;  %v2865_v23 = vadd.f32 %v4143_v59, %v2559_v7  ;;  %v2557_v33 = vadd.f32 %v2492_v6, %v2251_v61  ;;  %v2924_v13 = vadd.f32 %v2923_v56, %v2861_v4  ;;  %v2964_v39 = vmul.f32 %v2862_v28, %v2862_v28  ;;  %v5478_v59 = vld [vmem:[#allocation14_spill] sm:$0xff] }
 0x1fc   : > { %v2993_v22 = vadd.f32 %v2992_v31, %v2962_v37  ;;  %v4098_v5 = vpop.f32.mrf.mxu1  ;;  %v4146_v2 = vpop.f32.mrf.mxu0  ;;  %v1953_v4 = vadd.f32 %v5243_v54, %v5473_v36  ;;  %v1954_v57 = vadd.f32 %v5252_v19, %v5478_v59  ;;  %v5481_v37 = vld [vmem:[#allocation41_spill] sm:$0xff] }
 0x1fd   : > { %2897 = vst [vmem:[%s5271_s19 + $0xb8] sm:$0xff] %v2865_v23  ;;  %v2863_v30 = vadd.f32 %v2798_v63, %v2557_v33  ;;  %v2562_v27 = vadd.f32 %v4098_v5, %v2256_v47  ;;  %v2925_v55 = vadd.f32 %v2924_v13, %v2862_v28  ;;  %v2967_v34 = vmul.f32 %v2865_v23, %v2865_v23 }
 0x1fe   : > { %v2994_v32 = vadd.f32 %v2993_v22, %v2963_v29  ;;  %v2505_v40 = vpop.f32.mrf.mxu1  ;;  %v2811_v17 = vpop.f32.mrf.mxu0  ;;  %v2260_v1 = vadd.f32 %v5477_v44, %v1953_v4  ;;  %v1952_v56 = vadd.f32 %v5481_v37, %v5480_v14  ;;  %v5482_v29 = vld [vmem:[#allocation40_spill] sm:$0xff] }
 0x1ff   : > { %2895 = vst [vmem:[%s5271_s19 + $0xa8] sm:$0xff] %v2863_v30  ;;  %v2965_v42 = vmul.f32 %v2863_v30, %v2863_v30  ;;  %v2868_v53 = vadd.f32 %v4146_v2, %v2562_v27  ;;  %v2560_v0 = vadd.f32 %v2505_v40, %v2254_v60  ;;  %v2926_v15 = vadd.f32 %v2925_v55, %v2863_v30 }
 0x200   : > { %v2995_v26 = vadd.f32 %v2994_v32, %v2964_v39  ;;  %v4099_v9 = vpop.f32.mrf.mxu1  ;;  %v4147_v16 = vpop.f32.mrf.mxu0  ;;  %v2261_v22 = vadd.f32 %v5482_v29, %v1954_v57  ;;  %v2259_v50 = vadd.f32 %v5483_v8, %v1952_v56 }
 0x201   : > { %2900 = vst [vmem:[%s5271_s19 + $0xd0] sm:$0xff] %v2868_v53  ;;  %v2866_v49 = vadd.f32 %v2811_v17, %v2560_v0  ;;  %v2563_v35 = vadd.f32 %v4099_v9, %v2257_v20  ;;  %v2927_v45 = vadd.f32 %v2926_v15, %v2864_v25  ;;  %v2258_v25 = vadd.f32 %v5479_v21, %v1951_v52 }
 0x202   : > { %v2996_v54 = vadd.f32 %v2995_v26, %v2965_v42  ;;  %v2508_v41 = vpop.f32.mrf.mxu1  ;;  %v2814_v48 = vpop.f32.mrf.mxu0  ;;  %v2970_v62 = vmul.f32 %v2868_v53, %v2868_v53 }
 0x203   : > { %2898 = vst [vmem:[%s5271_s19 + $0xc0] sm:$0xff] %v2866_v49  ;;  %v2869_v61 = vadd.f32 %v4147_v16, %v2563_v35  ;;  %v2561_v11 = vadd.f32 %v2508_v41, %v2255_v12  ;;  %v2928_v28 = vadd.f32 %v2927_v45, %v2865_v23  ;;  %v2968_v19 = vmul.f32 %v2866_v49, %v2866_v49 }
 0x204   : > { %v2997_v24 = vadd.f32 %v2996_v54, %v2966_v51  ;;  %v4102_v7 = vpop.f32.mrf.mxu1  ;;  %v4150_v58 = vpop.f32.mrf.mxu0 }
 0x205   : > { %2901 = vst [vmem:[%s5271_s19 + $0xd8] sm:$0xff] %v2869_v61  ;;  %v2867_v31 = vadd.f32 %v2814_v48, %v2561_v11  ;;  %v2566_v6 = vadd.f32 %v4102_v7, %v2260_v1  ;;  %v2929_v63 = vadd.f32 %v2928_v28, %v2866_v49  ;;  %v2971_v17 = vmul.f32 %v2869_v61, %v2869_v61 }
 0x206   : > { %v2998_v38 = vadd.f32 %v2997_v24, %v2967_v34  ;;  %v2521_v47 = vpop.f32.mrf.mxu1  ;;  %v2827_v33 = vpop.f32.mrf.mxu0 }
 0x207   : > { %2899 = vst [vmem:[%s5271_s19 + $0xc8] sm:$0xff] %v2867_v31  ;;  %v2969_v23 = vmul.f32 %v2867_v31, %v2867_v31  ;;  %v2872_v13 = vadd.f32 %v4150_v58, %v2566_v6  ;;  %v2564_v5 = vadd.f32 %v2521_v47, %v2258_v25  ;;  %v2930_v46 = vadd.f32 %v2929_v63, %v2867_v31 }
 0x208   : > { %v2999_v2 = vadd.f32 %v2998_v38, %v2968_v19  ;;  %v4103_v60 = vpop.f32.mrf.mxu1  ;;  %v4151_v10 = vpop.f32.mrf.mxu0 }
 0x209   : > { %2904 = vst [vmem:[%s5271_s19 + $0xf0] sm:$0xff] %v2872_v13  ;;  %v2870_v30 = vadd.f32 %v2827_v33, %v2564_v5  ;;  %v2567_v27 = vadd.f32 %v4103_v60, %v2261_v22  ;;  %v2931_v20 = vadd.f32 %v2930_v46, %v2868_v53  ;;  %v2974_v53 = vmul.f32 %v2872_v13, %v2872_v13 }
 0x20a   : > { %v3000_v55 = vadd.f32 %v2999_v2, %v2969_v23  ;;  %v2524_v39 = vpop.f32.mrf.mxu1  ;;  %v2830_v42 = vpop.f32.mrf.mxu0 }
 0x20b   : > { %2902 = vst [vmem:[%s5271_s19 + $0xe0] sm:$0xff] %v2870_v30  ;;  %v2873_v32 = vadd.f32 %v4151_v10, %v2567_v27  ;;  %v2565_v40 = vadd.f32 %v2524_v39, %v2259_v50  ;;  %v2932_v4 = vadd.f32 %v2931_v20, %v2869_v61  ;;  %v2972_v15 = vmul.f32 %v2870_v30, %v2870_v30 }
 0x20c   : > { %v3001_v36 = vadd.f32 %v3000_v55, %v2970_v62 }
 0x20d   : > { %2905 = vst [vmem:[%s5271_s19 + $0xf8] sm:$0xff] %v2873_v32  ;;  %v2871_v0 = vadd.f32 %v2830_v42, %v2565_v40  ;;  %v2933_v26 = vadd.f32 %v2932_v4, %v2870_v30  ;;  %v2975_v52 = vmul.f32 %v2873_v32, %v2873_v32 }
 0x20e   : > { %v3002_v9 = vadd.f32 %v3001_v36, %v2971_v17 }
 0x20f   : > { %2903 = vst [vmem:[%s5271_s19 + $0xe8] sm:$0xff] %v2871_v0  ;;  %v2973_v16 = vmul.f32 %v2871_v0, %v2871_v0  ;;  %v2934_v12 = vadd.f32 %v2933_v26, %v2871_v0 }
 0x210   : > { %v3003_v43 = vadd.f32 %v3002_v9, %v2972_v15 }
 0x211   : > { %v2935_v18 = vadd.f32 %v2934_v12, %v2872_v13 }
 0x212   : > { %v3004_v3 = vadd.f32 %v3003_v43, %v2973_v16 }
 0x213   : > { %v2936_v49 = vadd.f32 %v2935_v18, %v2873_v32 }
 0x214   : > { %v3005_v35 = vadd.f32 %v3004_v3, %v2974_v53 }
 0x215   : > { %v2937_v51 = vrot.slane %v2936_v49, 4 }
 0x216   : > { %v3006_v45 = vadd.f32 %v3005_v35, %v2975_v52 }
 0x217   : > { %v2938_v54 = vadd.f32 %v2937_v51, %v2936_v49 }
 0x218   : > { %v3007_v41 = vrot.slane %v3006_v45, 4 }
 0x219   : > { %v2939_v48 = vrot.slane %v2938_v54, 2 }
 0x21a   : > { %v3008_v44 = vadd.f32 %v3007_v41, %v3006_v45 }
 0x21b   : > { %v2940_v1 = vadd.f32 %v2939_v48, %v2938_v54 }
 0x21c   : > { %v3009_v59 = vrot.slane %v3008_v44, 2 }
 0x21d   : > { %v2941_v57 = vrot.slane %v2940_v1, 1 }
 0x21e   : > { %v3010_v61 = vadd.f32 %v3009_v59, %v3008_v44 }
 0x21f   : > { %v2942_v11 = vadd.f32 %v2941_v57, %v2940_v1 }
 0x220   : > { %v3011_v34 = vrot.slane %v3010_v61, 1 }
 0x221   : > { %2943 = vst [vmem:[%s181_s24] sm:$0x1] %v2942_v11 }
 0x222   : > { %v3012_v24 = vadd.f32 %v3011_v34, %v3010_v61 }
 0x224   : > { %3013 = vst [vmem:[%s181_s24 + $0x1] sm:$0x1] %v3012_v24 }
 0x225 PF: > { %s14_s12 = sadd.s32 1, %s4255_s12  }
 0x226   : > { %p11_p4 = scmp.ge.s32.totalorder %s14_s12, 4  }
 0x228   :  { %13 = sbr.rel (!%p11_p4) target bundleno = 1 (0x1), region = 80 }

// kernel: residual_forward.4
= control target key start
LH: loop header
LB: loop body
LE: loop exit
PB: predicated region body
PF: predicated region fallthrough
CT: control target
= control target key end

     0   :  { %s4348_s15 = smov 0   ;;  %s5590_s0 = inlined_call_operand.vmem [shape: f32[2,16,16,128], index: 0, kind: input, shape index: {}]   ;;  %s5591_s1 = inlined_call_operand.vmem [shape: f32[8,128], index: 1, kind: input, shape index: {}]   ;;  %s5592_s2 = inlined_call_operand.vmem [shape: bf16[9,128,128], index: 2, kind: input, shape index: {}]   ;;  %s5593_s3 = inlined_call_operand.vmem [shape: f32[2,16,16,128], index: 3, kind: output, shape index: {0}]   ;;  %s5594_s4 = inlined_call_operand.vmem [shape: f32[2,2,128], index: 4, kind: output, shape index: {1}]  }
   0x1 LB: > { %s3351_s16 = sadd.s32 4294967295, %s4319_s15   ;;  %p3355_p0 = scmp.ge.s32.totalorder %s4319_s15, 1  ;;  %s4319_s15 = sphi %s4348_s15, %s15_s15  }
   0x2   : > { %p165_p1 = scmp.lt.s32.totalorder %s4319_s15, 3 }
   0x4   : > { %p166_p2 = pnand %p3355_p0, %p165_p1 }
   0x6   : > { %169 = sbr.rel (%p166_p2) target bundleno = 549 (0x225), region = 32 }
   0xb   : > { %v4240_v0 = vld [vmem:[%s5592_s2 + $0x78] sm:$0xff]   ;;  %v4362_v1 = vld [vmem:[%s5592_s2 + $0x70] sm:$0xff]   ;;  %v4321_v2 = vmov 0.0   ;;  %p195_p3 = scmp.lt.s32.totalorder %s3351_s16, 1  ;;  %v4242_v3 = vld [vmem:[%s5592_s2 + $0x68] sm:$0xff]  }
   0xc   : > { %348 = vst [vmem:[#allocation2] sm:$0xff] %v4321_v2  ;;  %349 = vst [vmem:[#allocation2 + $0x8] sm:$0xff] %v4321_v2  ;;  %3783 = vmatprep.subr.bf16.mxu0 %v4240_v0  ;;  %4215 = vmatprep.subr.bf16.mxu1 %v4240_v0  ;;  %v4243_v4 = vld [vmem:[%s5592_s2 + $0x60] sm:$0xff]   ;;  %v4244_v21 = vld [vmem:[%s5592_s2 + $0x58] sm:$0xff]  }
   0xd   : > { %350 = vst [vmem:[#allocation2 + $0x10] sm:$0x3] %v4321_v2  ;;  %351 = vst [vmem:[#allocation2 + $0x18] sm:$0xff] %v4321_v2  ;;  %3784 = vmatpush3.bf16.msra.mxu0 %v4240_v0  ;;  %4223 = vmatpush3.bf16.msra.mxu1 %v4240_v0  ;;  %s5678_s16 = smov (!%p195_p3, %s3351_s16), 1  ;;  %v4391_v7 = vld [vmem:[%s5591_s1] ss:$0 sm:$0xff] }
   0xe   : > { %352 = vst [vmem:[#allocation2 + $0x20] sm:$0xff] %v4321_v2  ;;  %353 = vst [vmem:[#allocation2 + $0x28] sm:$0x3] %v4321_v2  ;;  %3785 = vmatprep.subr.bf16.mxu0 %v4362_v1  ;;  %4216 = vmatprep.subr.bf16.mxu1 %v4362_v1  ;;  %s3565_s23 = sshll.u32 %s5678_s16, 8  ;;  %v4396_v9 = vld [vmem:[%s5591_s1 + $0x1] ss:$0 sm:$0xff] }
   0xf   : > { %354 = vst [vmem:[#allocation2 + $0x30] sm:$0xff] %v4321_v2  ;;  %355 = vst [vmem:[#allocation2 + $0x38] sm:$0xff] %v4321_v2  ;;  %s4381_s26 = scalar_lea.vmem %s5590_s0, %s3565_s23  ;;  %v4245_v28 = vld [vmem:[%s5592_s2 + $0x50] sm:$0xff]   ;;  %v4246_v55 = vld [vmem:[%s5592_s2 + $0x48] sm:$0xff]   ;;  %s5463_s10 = scalar_lea.vmem %s5593_s3, %s3565_s23 }
  0x10   : > { %356 = vst [vmem:[#allocation2 + $0x40] sm:$0x3] %v4321_v2  ;;  %357 = vst [vmem:[#allocation2 + $0x48] sm:$0xff] %v4321_v2  ;;  %v226_v10 = vld [vmem:[%s4381_s26 + $0x70] sm:$0xff]  ;;  %v227_v11 = vld [vmem:[%s4381_s26 + $0x78] sm:$0xff]  ;;  %s3360_s23 = sshll.u32 %s5678_s16, 1 }
  0x11   : > { %358 = vst [vmem:[#allocation2 + $0x50] sm:$0xff] %v4321_v2  ;;  %359 = vst [vmem:[#allocation2 + $0x58] sm:$0x3] %v4321_v2  ;;  %3786 = vmatpush3.bf16.msra.mxu0 %v4362_v1  ;;  %4224 = vmatpush3.bf16.msra.mxu1 %v4362_v1  ;;  %v262_v12 = vmul.f32 %v4391_v7, %v226_v10  ;;  %v263_v13 = vmul.f32 %v4391_v7, %v227_v11  ;;  %v212_v14 = vld [vmem:[%s4381_s26] sm:$0xff]  ;;  %v213_v15 = vld [vmem:[%s4381_s26 + $0x8] sm:$0xff]  ;;  %s208_s13 = scalar_lea.vmem %s5594_s4, %s3360_s23 }
  0x12   : > { %360 = vst [vmem:[#allocation2 + $0x60] sm:$0xff] %v4321_v2  ;;  %361 = vst [vmem:[#allocation2 + $0x68] sm:$0xff] %v4321_v2  ;;  %3787 = vmatprep.subr.bf16.mxu0 %v4242_v3  ;;  %4217 = vmatprep.subr.bf16.mxu1 %v4242_v3  ;;  %v228_v16 = vld [vmem:[%s4381_s26 + $0x80] sm:$0xff]  ;;  %v248_v17 = vmul.f32 %v4391_v7, %v212_v14  ;;  %v249_v18 = vmul.f32 %v4391_v7, %v213_v15  ;;  %v229_v19 = vld [vmem:[%s4381_s26 + $0x88] sm:$0xff] }
  0x13   : > { %362 = vst [vmem:[#allocation2 + $0x70] sm:$0x3] %v4321_v2  ;;  %363 = vst [vmem:[#allocation2 + $0x78] sm:$0xff] %v4321_v2  ;;  %v499_v5 = vld [vmem:[#allocation2 + $0x1] sm:$0xff]  ;;  %v264_v20 = vmul.f32 %v4391_v7, %v228_v16  ;;  %v298_v22 = vadd.f32 %v4396_v9, %v262_v12  ;;  %v299_v23 = vadd.f32 %v4396_v9, %v263_v13  ;;  %v214_v35 = vld [vmem:[%s4381_s26 + $0x10] sm:$0xff] }
  0x14   : > { %364 = vst [vmem:[#allocation2 + $0x80] sm:$0xff] %v4321_v2  ;;  %365 = vst [vmem:[#allocation2 + $0x88] sm:$0x3] %v4321_v2  ;;  %v500_v6 = vld [vmem:[#allocation2 + $0x9] sm:$0xff]  ;;  %v265_v24 = vmul.f32 %v4391_v7, %v229_v19  ;;  %v4416_v25 = vadd.f32 %v4396_v9, %v248_v17  ;;  %v4419_v26 = vadd.f32 %v4396_v9, %v249_v18  ;;  %v215_v38 = vld [vmem:[%s4381_s26 + $0x18] sm:$0xff] }
  0x15   : > { %366 = vst [vmem:[#allocation2 + $0x90] sm:$0xff] %v4321_v2  ;;  %367 = vst [vmem:[#allocation2 + $0x98] sm:$0xff] %v4321_v2  ;;  %v531_v8 = vpack.c.bf16 %v500_v6, %v499_v5  ;;  %3788 = vmatpush3.bf16.msra.mxu0 %v4242_v3  ;;  %4225 = vmatpush3.bf16.msra.mxu1 %v4242_v3  ;;  %v4422_v27 = vadd.f32 %v4396_v9, %v264_v20  ;;  %v330_v29 = vmax.f32 %v298_v22, 0.0  ;;  %v230_v40 = vld [vmem:[%s4381_s26 + $0x90] sm:$0xff]  ;;  %v231_v41 = vld [vmem:[%s4381_s26 + $0x98] sm:$0xff] }
  0x16   : > { %368 = vst [vmem:[#allocation2 + $0xa0] sm:$0x3] %v4321_v2  ;;  %369 = vst [vmem:[#allocation2 + $0xa8] sm:$0xff] %v4321_v2  ;;  %3789 = vmatprep.subr.bf16.mxu0 %v4243_v4  ;;  %4218 = vmatprep.subr.bf16.mxu1 %v4243_v4  ;;  %v331_v30 = vmax.f32 %v299_v23, 0.0  ;;  %v4428_v31 = vadd.f32 %v4396_v9, %v265_v24  ;;  %v316_v32 = vmax.f32 %v4416_v25, 0.0  ;;  %v317_v33 = vmax.f32 %v4419_v26, 0.0 }
  0x17   : > { %370 = vst [vmem:[#allocation2 + $0xb0] sm:$0xff] %v4321_v2  ;;  %371 = vst [vmem:[#allocation2 + $0xb8] sm:$0x3] %v4321_v2  ;;  %3799 = vmatprep.mubr.bf16.mxu0 %v531_v8  ;;  %v332_v34 = vmax.f32 %v4422_v27, 0.0  ;;  %v250_v39 = vmul.f32 %v4391_v7, %v214_v35  ;;  %v251_v42 = vmul.f32 %v4391_v7, %v215_v38  ;;  %v216_v45 = vld [vmem:[%s4381_s26 + $0x20] sm:$0xff]  ;;  %v217_v46 = vld [vmem:[%s4381_s26 + $0x28] sm:$0xff] }
  0x18   : > { %372 = vst [vmem:[#allocation2 + $0xc0] sm:$0xff] %v4321_v2  ;;  %373 = vst [vmem:[#allocation2 + $0xc8] sm:$0xff] %v4321_v2  ;;  %v539_v36 = vpack.c.bf16 %v331_v30, %v330_v29  ;;  %v333_v37 = vmax.f32 %v4428_v31, 0.0  ;;  %v266_v43 = vmul.f32 %v4391_v7, %v230_v40  ;;  %v267_v44 = vmul.f32 %v4391_v7, %v231_v41  ;;  %v232_v47 = vld [vmem:[%s4381_s26 + $0xa0] sm:$0xff]  ;;  %v233_v51 = vld [vmem:[%s4381_s26 + $0xa8] sm:$0xff] }
  0x19   : > { %374 = vst [vmem:[#allocation2 + $0xd0] sm:$0x3] %v4321_v2  ;;  %375 = vst [vmem:[#allocation2 + $0xd8] sm:$0xff] %v4321_v2  ;;  %3790 = vmatpush3.bf16.msra.mxu0 %v4243_v4  ;;  %4226 = vmatpush3.bf16.msra.mxu1 %v4243_v4  ;;  %v4454_v48 = vadd.f32 %v4396_v9, %v250_v39  ;;  %v252_v49 = vmul.f32 %v4391_v7, %v216_v45  ;;  %v4486_v0 = vld [vmem:[%s5592_s2 + $0x40] sm:$0xff]   ;;  %v218_v4 = vld [vmem:[%s4381_s26 + $0x30] sm:$0xff] }
  0x1a   : > { %376 = vst [vmem:[#allocation2 + $0xe0] sm:$0xff] %v4321_v2  ;;  %377 = vst [vmem:[#allocation2 + $0xe8] sm:$0x3] %v4321_v2  ;;  %3791 = vmatprep.subr.bf16.mxu0 %v4244_v21  ;;  %4219 = vmatprep.subr.bf16.mxu1 %v4244_v21  ;;  %v253_v50 = vmul.f32 %v4391_v7, %v217_v46  ;;  %v4460_v52 = vadd.f32 %v4396_v9, %v251_v42  ;;  %v219_v6 = vld [vmem:[%s4381_s26 + $0x38] sm:$0xff]  ;;  %v234_v8 = vld [vmem:[%s4381_s26 + $0xb0] sm:$0xff] }
  0x1b   : > { %378 = vst [vmem:[#allocation2 + $0xf0] sm:$0xff] %v4321_v2  ;;  %379 = vst [vmem:[#allocation2 + $0xf8] sm:$0xff] %v4321_v2  ;;  %3815 = vmatprep.mubr.bf16.mxu1 %v539_v36  ;;  %v4463_v53 = vadd.f32 %v4396_v9, %v266_v43  ;;  %v4466_v54 = vadd.f32 %v4396_v9, %v267_v44  ;;  %v318_v56 = vmax.f32 %v4454_v48, 0.0  ;;  %v235_v10 = vld [vmem:[%s4381_s26 + $0xb8] sm:$0xff]  ;;  %v220_v14 = vld [vmem:[%s4381_s26 + $0x40] sm:$0xff] }
  0x1c   : > { %380 = vst [vmem:[#allocation2 + $0x100] sm:$0x3] %v4321_v2  ;;  %381 = vst [vmem:[#allocation2 + $0x108] sm:$0xff] %v4321_v2  ;;  %v4473_v57 = vadd.f32 %v4396_v9, %v252_v49  ;;  %v4476_v58 = vadd.f32 %v4396_v9, %v253_v50  ;;  %v268_v59 = vmul.f32 %v4391_v7, %v232_v47  ;;  %v319_v60 = vmax.f32 %v4460_v52, 0.0  ;;  %v221_v15 = vld [vmem:[%s4381_s26 + $0x48] sm:$0xff]  ;;  %v236_v16 = vld [vmem:[%s4381_s26 + $0xc0] sm:$0xff] }
  0x1d   : > { %382 = vst [vmem:[#allocation2 + $0x110] sm:$0xff] %v4321_v2  ;;  %383 = vst [vmem:[#allocation2 + $0x118] sm:$0x3] %v4321_v2  ;;  %3792 = vmatpush3.bf16.msra.mxu0 %v4244_v21  ;;  %4227 = vmatpush3.bf16.msra.mxu1 %v4244_v21  ;;  %v334_v61 = vmax.f32 %v4463_v53, 0.0  ;;  %v335_v62 = vmax.f32 %v4466_v54, 0.0  ;;  %v269_v63 = vmul.f32 %v4391_v7, %v233_v51  ;;  %v237_v24 = vld [vmem:[%s4381_s26 + $0xc8] sm:$0xff] }
  0x1e   : > { %384 = vst [vmem:[#allocation2 + $0x120] sm:$0xff] %v4321_v2  ;;  %385 = vst [vmem:[#allocation2 + $0x128] sm:$0xff] %v4321_v2  ;;  %3793 = vmatprep.subr.bf16.mxu0 %v4245_v28  ;;  %4220 = vmatprep.subr.bf16.mxu1 %v4245_v28  ;;  %v320_v1 = vmax.f32 %v4473_v57, 0.0  ;;  %v4493_v3 = vadd.f32 %v4396_v9, %v268_v59  ;;  %v254_v12 = vmul.f32 %v4391_v7, %v218_v4  ;;  %v4248_v25 = vld [vmem:[%s5592_s2 + $0x38] sm:$0xff]   ;;  %v222_v43 = vld [vmem:[%s4381_s26 + $0x50] sm:$0xff] }
  0x1f   : > { %386 = vst [vmem:[#allocation2 + $0x130] sm:$0x3] %v4321_v2  ;;  %387 = vst [vmem:[#allocation2 + $0x138] sm:$0xff] %v4321_v2  ;;  %v4503_v5 = vadd.f32 %v4396_v9, %v269_v63  ;;  %v255_v13 = vmul.f32 %v4391_v7, %v219_v6  ;;  %v270_v18 = vmul.f32 %v4391_v7, %v234_v8  ;;  %v4249_v26 = vld [vmem:[%s5592_s2 + $0xb8] sm:$0xff]   ;;  %v238_v50 = vld [vmem:[%s4381_s26 + $0xd0] sm:$0xff] }
  0x20   : > { %388 = vst [vmem:[#allocation2 + $0x140] sm:$0xff] %v4321_v2  ;;  %389 = vst [vmem:[#allocation2 + $0x148] sm:$0x3] %v4321_v2  ;;  %v336_v11 = vmax.f32 %v4493_v3, 0.0  ;;  %v271_v19 = vmul.f32 %v4391_v7, %v235_v10  ;;  %v256_v20 = vmul.f32 %v4391_v7, %v220_v14  ;;  %v4525_v21 = vadd.f32 %v4396_v9, %v254_v12  ;;  %v223_v44 = vld [vmem:[%s4381_s26 + $0x58] sm:$0xff]  ;;  %v224_v27 = vld [vmem:[%s4381_s26 + $0x60] sm:$0xff] }
  0x21   : > { %390 = vst [vmem:[#allocation2 + $0x150] sm:$0xff] %v4321_v2  ;;  %391 = vst [vmem:[#allocation2 + $0x158] sm:$0xff] %v4321_v2  ;;  %3794 = vmatpush3.bf16.msra.mxu0 %v4245_v28  ;;  %4228 = vmatpush3.bf16.msra.mxu1 %v4245_v28  ;;  %v337_v17 = vmax.f32 %v4503_v5, 0.0  ;;  %v4528_v22 = vadd.f32 %v4396_v9, %v255_v13  ;;  %v257_v23 = vmul.f32 %v4391_v7, %v221_v15  ;;  %v239_v51 = vld [vmem:[%s4381_s26 + $0xd8] sm:$0xff]  ;;  %v4250_v31 = vld [vmem:[%s5592_s2 + $0x30] sm:$0xff]  }
  0x22   : > { %392 = vst [vmem:[#allocation2 + $0x160] sm:$0x3] %v4321_v2  ;;  %393 = vst [vmem:[#allocation2 + $0x168] sm:$0xff] %v4321_v2  ;;  %3795 = vmatprep.subr.bf16.mxu0 %v4246_v55  ;;  %4221 = vmatprep.subr.bf16.mxu1 %v4246_v55  ;;  %v272_v28 = vmul.f32 %v4391_v7, %v236_v16  ;;  %v4545_v35 = vadd.f32 %v4396_v9, %v271_v19  ;;  %v225_v63 = vld [vmem:[%s4381_s26 + $0x68] sm:$0xff]  ;;  %v240_v48 = vld [vmem:[%s4381_s26 + $0xe0] sm:$0xff] }
  0x23   : > { %394 = vst [vmem:[#allocation2 + $0x170] sm:$0xff] %v4321_v2  ;;  %395 = vst [vmem:[#allocation2 + $0x178] sm:$0x3] %v4321_v2  ;;  %v4558_v36 = vadd.f32 %v4396_v9, %v256_v20  ;;  %v4561_v38 = vadd.f32 %v4396_v9, %v257_v23  ;;  %v273_v41 = vmul.f32 %v4391_v7, %v237_v24  ;;  %v4251_v52 = vld [vmem:[%s5592_s2 + $0xb0] sm:$0xff]   ;;  %v4252_v16 = vld [vmem:[%s5592_s2 + $0x28] sm:$0xff]  }
  0x24   : > { %396 = vst [vmem:[#allocation2 + $0x180] sm:$0xff] %v4321_v2  ;;  %397 = vst [vmem:[#allocation2 + $0x188] sm:$0xff] %v4321_v2  ;;  %v339_v40 = vmax.f32 %v4545_v35, 0.0  ;;  %v4567_v42 = vadd.f32 %v4396_v9, %v272_v28  ;;  %v540_v45 = vpack.c.bf16 %v333_v37, %v332_v34  ;;  %v258_v49 = vmul.f32 %v4391_v7, %v222_v43  ;;  %v4254_v57 = vld [vmem:[%s5592_s2 + $0x20] sm:$0xff]   ;;  %v4256_v5 = vld [vmem:[%s5592_s2 + $0x18] sm:$0xff]  }
  0x25   : > { %398 = vst [vmem:[#allocation2 + $0x190] sm:$0x3] %v4321_v2  ;;  %399 = vst [vmem:[#allocation2 + $0x198] sm:$0xff] %v4321_v2  ;;  %3796 = vmatpush3.bf16.msra.mxu0 %v4246_v55  ;;  %4229 = vmatpush3.bf16.msra.mxu1 %v4246_v55  ;;  %v324_v46 = vmax.f32 %v4558_v36, 0.0  ;;  %v325_v47 = vmax.f32 %v4561_v38, 0.0  ;;  %v259_v59 = vmul.f32 %v4391_v7, %v223_v44  ;;  %v4261_v36 = vld [vmem:[%s5592_s2 + $0x88] sm:$0xff]  }
  0x26   : > { %400 = vst [vmem:[#allocation2 + $0x1a0] sm:$0xff] %v4321_v2  ;;  %401 = vst [vmem:[#allocation2 + $0x1a8] sm:$0x3] %v4321_v2  ;;  %v321_v2 = vmax.f32 %v4476_v58, 0.0  ;;  %3797 = vmatprep.subr.bf16.mxu0 %v4486_v0  ;;  %4222 = vmatprep.subr.bf16.mxu1 %v4486_v0  ;;  %v340_v55 = vmax.f32 %v4567_v42, 0.0  ;;  %v275_v54 = vmul.f32 %v4391_v7, %v239_v51  ;;  %v4255_v58 = vld [vmem:[%s5592_s2 + $0xa0] sm:$0xff]  }
  0x27   : > { %417 = vst [vmem:[#allocation2 + $0xc1] sm:$0xff] %v330_v29  ;;  %418 = vst [vmem:[#allocation2 + $0xc9] sm:$0xff] %v331_v30  ;;  %v4537_v29 = vpack.c.bf16 %v317_v33, %v316_v32  ;;  %v4542_v30 = vadd.f32 %v4396_v9, %v270_v18  ;;  %v4626_v53 = vadd.f32 %v4396_v9, %v259_v59  ;;  %v4253_v18 = vld [vmem:[%s5592_s2 + $0xa8] sm:$0xff]  }
  0x28   : > { %403 = vst [vmem:[#allocation2 + $0x19] sm:$0xff] %v316_v32  ;;  %404 = vst [vmem:[#allocation2 + $0x21] sm:$0xff] %v317_v33  ;;  %v322_v32 = vmax.f32 %v4525_v21, 0.0  ;;  %v323_v33 = vmax.f32 %v4528_v22, 0.0  ;;  %v261_v10 = vmul.f32 %v4391_v7, %v225_v63  ;;  %v276_v12 = vmul.f32 %v4391_v7, %v240_v48  ;;  %v4258_v22 = vld [vmem:[%s5592_s2 + $0x10] sm:$0xff]  }
  0x29   : > { %419 = vst [vmem:[#allocation2 + $0xd9] sm:$0xff] %v332_v34  ;;  %420 = vst [vmem:[#allocation2 + $0xe1] sm:$0xff] %v333_v37  ;;  %v338_v39 = vmax.f32 %v4542_v30, 0.0  ;;  %3798 = vmatpush3.bf16.msra.mxu0 %v4486_v0  ;;  %4230 = vmatpush3.bf16.msra.mxu1 %v4486_v0  ;;  %v4594_v34 = vpack.c.bf16 %v319_v60, %v318_v56  ;;  %v4601_v37 = vadd.f32 %v4396_v9, %v273_v41  ;;  %v4259_v30 = vld [vmem:[%s5592_s2 + $0x90] sm:$0xff]   ;;  %v4322_v48 = vmov 0.0|0.0  }
  0x2a   : > { %405 = vst [vmem:[#allocation2 + $0x31] sm:$0xff] %v318_v56  ;;  %406 = vst [vmem:[#allocation2 + $0x39] sm:$0xff] %v319_v60  ;;  %3831 = vmatprep.subr.bf16.mxu1 %v4248_v25  ;;  %3879 = vmatprep.subr.bf16.mxu0 %v4249_v26  ;;  %v541_v56 = vpack.c.bf16 %v335_v62, %v334_v61  ;;  %v4619_v60 = vadd.f32 %v4396_v9, %v258_v49  ;;  %v327_v13 = vmax.f32 %v4626_v53, 0.0  ;;  %v983_v42 = vld [vmem:[#allocation2 + $0xa] sm:$0xff] }
  0x2b   : > { %421 = vst [vmem:[#allocation2 + $0xf1] sm:$0xff] %v334_v61  ;;  %422 = vst [vmem:[#allocation2 + $0xf9] sm:$0xff] %v335_v62  ;;  %v274_v0 = vmul.f32 %v4391_v7, %v238_v50  ;;  %v341_v4 = vmax.f32 %v4601_v37, 0.0  ;;  %v260_v61 = vmul.f32 %v4391_v7, %v224_v27  ;;  %v241_v62 = vld [vmem:[%s4381_s26 + $0xe8] sm:$0xff]  ;;  %v311_v14 = vadd.f32 %v4396_v9, %v275_v54  ;;  %v4264_v37 = vld [vmem:[%s5592_s2 + $0xf8] sm:$0xff]  }
  0x2c   : > { %407 = vst [vmem:[#allocation2 + $0x49] sm:$0xff] %v320_v1  ;;  %408 = vst [vmem:[#allocation2 + $0x51] sm:$0xff] %v321_v2  ;;  %3800 = vmatmul.mubr.bf16.vlgmr.msra.gmra.mxu0 %v4537_v29  ;;  %3816 = vmatmul.mubr.bf16.vlgmr.msra.gmra.mxu1 %v540_v45  ;;  %v326_v6 = vmax.f32 %v4619_v60, 0.0  ;;  %v297_v20 = vadd.f32 %v4396_v9, %v261_v10  ;;  %v277_v23 = vmul.f32 %v4391_v7, %v241_v62  ;;  %v4267_v10 = vld [vmem:[%s5592_s2 + $0x130] sm:$0xff]  }
  0x2d   : > { %423 = vst [vmem:[#allocation2 + $0x109] sm:$0xff] %v336_v11  ;;  %424 = vst [vmem:[#allocation2 + $0x111] sm:$0xff] %v337_v17  ;;  %v4634_v8 = vadd.f32 %v4396_v9, %v274_v0  ;;  %3832 = vmatpush3.bf16.msra.mxu1 %v4248_v25  ;;  %3880 = vmatpush3.bf16.msra.mxu0 %v4249_v26  ;;  %v4643_v15 = vadd.f32 %v4396_v9, %v260_v61  ;;  %v343_v25 = vmax.f32 %v311_v14, 0.0 }
  0x2e   : > { %409 = vst [vmem:[#allocation2 + $0x61] sm:$0xff] %v322_v32  ;;  %410 = vst [vmem:[#allocation2 + $0x69] sm:$0xff] %v323_v33  ;;  %3833 = vmatprep.subr.bf16.mxu1 %v4250_v31  ;;  %3881 = vmatprep.subr.bf16.mxu0 %v4251_v52  ;;  %v312_v24 = vadd.f32 %v4396_v9, %v276_v12  ;;  %v4660_v28 = vpack.c.bf16 %v321_v2, %v320_v1  ;;  %v329_v43 = vmax.f32 %v297_v20, 0.0 }
  0x2f   : > { %425 = vst [vmem:[#allocation2 + $0x121] sm:$0xff] %v338_v39  ;;  %426 = vst [vmem:[#allocation2 + $0x129] sm:$0xff] %v339_v40  ;;  %v342_v19 = vmax.f32 %v4634_v8, 0.0  ;;  %3803 = vmatprep.mubr.bf16.mxu0 %v4594_v34  ;;  %3819 = vmatprep.mubr.bf16.mxu1 %v541_v56  ;;  %v328_v26 = vmax.f32 %v4643_v15, 0.0  ;;  %v542_v41 = vpack.c.bf16 %v337_v17, %v336_v11  ;;  %v4257_v11 = vld [vmem:[%s5592_s2 + $0x98] sm:$0xff]   ;;  %v438_v51 = vld [vmem:[#allocation2 + $0x20] sm:$0xff] }
  0x30   : > { %411 = vst [vmem:[#allocation2 + $0x79] sm:$0xff] %v324_v46  ;;  %412 = vst [vmem:[#allocation2 + $0x81] sm:$0xff] %v325_v47  ;;  %v313_v44 = vadd.f32 %v4396_v9, %v277_v23  ;;  %v344_v45 = vmax.f32 %v312_v24, 0.0  ;;  %v4678_v2 = vpack.c.bf16 %v323_v33, %v322_v32  ;;  %v4684_v3 = vpack.c.bf16 %v339_v40, %v338_v39  ;;  %v4260_v33 = vld [vmem:[%s5592_s2 + $0x8] sm:$0xff]   ;;  %v437_v50 = vld [vmem:[#allocation2 + $0x18] sm:$0xff] }
  0x31   : > { %427 = vst [vmem:[#allocation2 + $0x139] sm:$0xff] %v340_v55  ;;  %428 = vst [vmem:[#allocation2 + $0x141] sm:$0xff] %v341_v4  ;;  %3834 = vmatpush3.bf16.msra.mxu1 %v4250_v31  ;;  %3882 = vmatpush3.bf16.msra.mxu0 %v4251_v52  ;;  %v4699_v17 = vpack.c.bf16 %v325_v47, %v324_v46  ;;  %v4705_v21 = vpack.c.bf16 %v341_v4, %v340_v55  ;;  %v982_v40 = vld [vmem:[#allocation2 + $0x2] sm:$0xff]  ;;  %v984_v27 = vld [vmem:[#allocation2 + $0x1a] sm:$0xff] }
  0x32   : > { %413 = vst [vmem:[#allocation2 + $0x91] sm:$0xff] %v326_v6  ;;  %414 = vst [vmem:[#allocation2 + $0x99] sm:$0xff] %v327_v13  ;;  %3835 = vmatprep.subr.bf16.mxu1 %v4252_v16  ;;  %3883 = vmatprep.subr.bf16.mxu0 %v4253_v18  ;;  %v345_v1 = vmax.f32 %v313_v44, 0.0  ;;  %v4713_v35 = vpack.c.bf16 %v327_v13, %v326_v6  ;;  %v4715_v32 = vpack.c.bf16 %v343_v25, %v342_v19  ;;  %v4262_v46 = vld [vmem:[%s5592_s2] sm:$0xff]   ;;  %v4265_v55 = vld [vmem:[%s5592_s2 + $0x138] sm:$0xff]  }
  0x33   : > { %429 = vst [vmem:[#allocation2 + $0x151] sm:$0xff] %v342_v19  ;;  %430 = vst [vmem:[#allocation2 + $0x159] sm:$0xff] %v343_v25  ;;  %v4727_v38 = vpack.c.bf16 %v329_v43, %v328_v26  ;;  %v4263_v47 = vld [vmem:[%s5592_s2 + $0x80] sm:$0xff]   ;;  %v1014_v49 = vpack.c.bf16 %v983_v42, %v982_v40  ;;  %v439_v59 = vld [vmem:[#allocation2 + $0x30] sm:$0xff]  ;;  %v4745_v60 = vpack.c.bf16 %v438_v51, %v437_v50 }
  0x34   : > { %415 = vst [vmem:[#allocation2 + $0xa9] sm:$0xff] %v328_v26  ;;  %416 = vst [vmem:[#allocation2 + $0xb1] sm:$0xff] %v329_v43  ;;  %3804 = vmatmul.mubr.bf16.gmra.mxu0 %v4660_v28  ;;  %3820 = vmatmul.mubr.bf16.gmra.mxu1 %v542_v41  ;;  %v4729_v39 = vpack.c.bf16 %v345_v1, %v344_v45  ;;  %v985_v31 = vld [vmem:[#allocation2 + $0x22] sm:$0xff]  ;;  %v440_v63 = vld [vmem:[#allocation2 + $0x38] sm:$0xff] }
  0x35   : > { %431 = vst [vmem:[#allocation2 + $0x169] sm:$0xff] %v344_v45  ;;  %432 = vst [vmem:[#allocation2 + $0x171] sm:$0xff] %v345_v1  ;;  %3836 = vmatpush3.bf16.msra.mxu1 %v4252_v16  ;;  %3884 = vmatpush3.bf16.msra.mxu0 %v4253_v18  ;;  %v986_v52 = vld [vmem:[#allocation2 + $0x32] sm:$0xff]  ;;  %v987_v56 = vld [vmem:[#allocation2 + $0x3a] sm:$0xff]  ;;  %v4747_v0 = vpack.c.bf16 %v985_v31, %v984_v27  ;;  %v4749_v4 = vpack.c.bf16 %v440_v63, %v439_v59 }
  0x36   : > { %3837 = vmatprep.subr.bf16.mxu1 %v4254_v57  ;;  %3885 = vmatprep.subr.bf16.mxu0 %v4255_v58  ;;  %v4751_v53 = vpack.c.bf16 %v987_v56, %v986_v52  ;;  %v441_v54 = vld [vmem:[#allocation2 + $0x48] sm:$0xff]  ;;  %v442_v61 = vld [vmem:[#allocation2 + $0x50] sm:$0xff]  ;;  %v443_v12 = vld [vmem:[#allocation2 + $0x60] sm:$0xff] }
  0x37   : > { %3807 = vmatprep.mubr.bf16.mxu0 %v4678_v2  ;;  %3823 = vmatprep.mubr.bf16.mxu1 %v4684_v3  ;;  %v988_v62 = vld [vmem:[#allocation2 + $0x4a] sm:$0xff]  ;;  %v989_v6 = vld [vmem:[#allocation2 + $0x52] sm:$0xff]  ;;  %v990_v14 = vld [vmem:[#allocation2 + $0x62] sm:$0xff]  ;;  %v4769_v19 = vpack.c.bf16 %v442_v61, %v441_v54 }
  0x38   : > { %v4266_v8 = vld [vmem:[%s5592_s2 + $0xf0] sm:$0xff]   ;;  %v444_v13 = vld [vmem:[#allocation2 + $0x68] sm:$0xff]  ;;  %v4771_v20 = vpack.c.bf16 %v989_v6, %v988_v62  ;;  %v4270_v25 = vld [vmem:[%s5592_s2 + $0xe0] sm:$0xff]  }
  0x39   : > { %3838 = vmatpush3.bf16.msra.mxu1 %v4254_v57  ;;  %3886 = vmatpush3.bf16.msra.mxu0 %v4255_v58  ;;  %v991_v15 = vld [vmem:[#allocation2 + $0x6a] sm:$0xff]  ;;  %v4773_v23 = vpack.c.bf16 %v444_v13, %v443_v12  ;;  %v445_v26 = vld [vmem:[#allocation2 + $0x78] sm:$0xff]  ;;  %v446_v41 = vld [vmem:[#allocation2 + $0x80] sm:$0xff] }
  0x3a   : > { %3839 = vmatprep.subr.bf16.mxu1 %v4256_v5  ;;  %3887 = vmatprep.subr.bf16.mxu0 %v4257_v11  ;;  %v4268_v16 = vld [vmem:[%s5592_s2 + $0xe8] sm:$0xff]   ;;  %v4775_v24 = vpack.c.bf16 %v991_v15, %v990_v14  ;;  %v992_v43 = vld [vmem:[#allocation2 + $0x7a] sm:$0xff]  ;;  %v447_v57 = vld [vmem:[#allocation2 + $0x90] sm:$0xff] }
  0x3b   : > { %v4269_v18 = vld [vmem:[%s5592_s2 + $0x128] sm:$0xff]   ;;  %v4271_v45 = vld [vmem:[%s5592_s2 + $0x120] sm:$0xff]   ;;  %v448_v58 = vld [vmem:[#allocation2 + $0x98] sm:$0xff] }
  0x3c   : > { %3808 = vmatmul.mubr.bf16.gmra.mxu0 %v4699_v17  ;;  %3824 = vmatmul.mubr.bf16.gmra.mxu1 %v4705_v21  ;;  %v993_v44 = vld [vmem:[#allocation2 + $0x82] sm:$0xff]  ;;  %v994_v1 = vld [vmem:[#allocation2 + $0x92] sm:$0xff] }
  0x3d   : > { %3840 = vmatpush3.bf16.msra.mxu1 %v4256_v5  ;;  %3888 = vmatpush3.bf16.msra.mxu0 %v4257_v11  ;;  %v995_v5 = vld [vmem:[#allocation2 + $0x9a] sm:$0xff]  ;;  %v449_v42 = vld [vmem:[#allocation2 + $0xa8] sm:$0xff]  ;;  %v4275_v50 = vld [vmem:[%s5592_s2 + $0x110] sm:$0xff]  }
  0x3e   : > { %3841 = vmatprep.subr.bf16.mxu1 %v4258_v22  ;;  %3889 = vmatprep.subr.bf16.mxu0 %v4259_v30  ;;  %v4272_v11 = vld [vmem:[%s5592_s2 + $0xd8] sm:$0xff]   ;;  %v4799_v40 = vpack.c.bf16 %v995_v5, %v994_v1  ;;  %v451_v27 = vld [vmem:[#allocation2 + $0xc0] sm:$0xff]  ;;  %v452_v31 = vld [vmem:[#allocation2 + $0xc8] sm:$0xff] }
  0x3f   : > { %3811 = vmatprep.mubr.bf16.mxu0 %v4713_v35  ;;  %3827 = vmatprep.mubr.bf16.mxu1 %v4715_v32  ;;  %v997_v51 = vld [vmem:[#allocation2 + $0xb2] sm:$0xff]  ;;  %v4276_v59 = vld [vmem:[%s5592_s2 + $0xc8] sm:$0xff]   ;;  %v4821_v56 = vpack.c.bf16 %v452_v31, %v451_v27  ;;  %v4278_v61 = vld [vmem:[%s5592_s2 + $0xc0] sm:$0xff]  }
  0x40   : > { %v4277_v63 = vld [vmem:[%s5592_s2 + $0x108] sm:$0xff]   ;;  %v453_v62 = vld [vmem:[#allocation2 + $0xd8] sm:$0xff]  ;;  %v454_v6 = vld [vmem:[#allocation2 + $0xe0] sm:$0xff] }
  0x41   : > { %3842 = vmatpush3.bf16.msra.mxu1 %v4258_v22  ;;  %3890 = vmatpush3.bf16.msra.mxu0 %v4259_v30  ;;  %v4273_v22 = vld [vmem:[%s5592_s2 + $0x118] sm:$0xff]   ;;  %v4793_v30 = vpack.c.bf16 %v446_v41, %v445_v26  ;;  %v4279_v12 = vld [vmem:[%s5592_s2 + $0x100] sm:$0xff]   ;;  %v242_v13 = vld [vmem:[%s4381_s26 + $0xf0] sm:$0xff] }
  0x42   : > { %3843 = vmatprep.subr.bf16.mxu1 %v4260_v33  ;;  %3891 = vmatprep.subr.bf16.mxu0 %v4261_v36  ;;  %v455_v14 = vld [vmem:[#allocation2 + $0xf0] sm:$0xff]  ;;  %v456_v15 = vld [vmem:[#allocation2 + $0xf8] sm:$0xff]  ;;  %v1006_v27 = vld [vmem:[#allocation2 + $0x122] sm:$0xff] }
  0x43   : > { %v1003_v26 = vld [vmem:[#allocation2 + $0xfa] sm:$0xff]  ;;  %v4855_v5 = vpack.c.bf16 %v456_v15, %v455_v14  ;;  %v1007_v31 = vld [vmem:[#allocation2 + $0x12a] sm:$0xff] }
  0x44   : > { %3812 = vmatmul.mubr.bf16.gmra.mxu0 %v4727_v38  ;;  %3828 = vmatmul.mubr.bf16.gmra.mxu1 %v4729_v39  ;;  %v1011_v14 = vld [vmem:[#allocation2 + $0x15a] sm:$0xff] }
  0x45   : > { %3844 = vmatpush3.bf16.msra.mxu1 %v4260_v33  ;;  %3892 = vmatpush3.bf16.msra.mxu0 %v4261_v36  ;;  %v4795_v33 = vpack.c.bf16 %v993_v44, %v992_v43  ;;  %v4797_v36 = vpack.c.bf16 %v448_v58, %v447_v57  ;;  %v4842_v43 = vld [vmem:[%s5592_s2 + $0x178] sm:$0xff]   ;;  %v4851_v58 = vpack.c.bf16 %v454_v6, %v453_v62  ;;  %v462_v62 = vld [vmem:[#allocation2 + $0x140] sm:$0xff] }
  0x46   : > { %3845 = vmatprep.subr.bf16.mxu1 %v4262_v46  ;;  %3893 = vmatprep.subr.bf16.mxu0 %v4263_v47  ;;  %v1008_v6 = vld [vmem:[#allocation2 + $0x13a] sm:$0xff] }
  0x47   : > { %3847 = vmatprep.mubr.bf16.mxu1 %v4322_v48  ;;  %3895 = vmatprep.mubr.bf16.mxu0 %v1014_v49  ;;  %v4274_v49 = vld [vmem:[%s5592_s2 + $0xd0] sm:$0xff]  }
  0x49   : > { %3846 = vmatpush3.bf16.msra.mxu1 %v4262_v46  ;;  %3894 = vmatpush3.bf16.msra.mxu0 %v4263_v47  ;;  %v450_v46 = vld [vmem:[#allocation2 + $0xb0] sm:$0xff] }
  0x4a   : > { %3927 = vmatprep.subr.bf16.mxu1 %v4264_v37  ;;  %3975 = vmatprep.subr.bf16.mxu0 %v4265_v55  ;;  %v996_v47 = vld [vmem:[#allocation2 + $0xaa] sm:$0xff]  ;;  %v4817_v48 = vpack.c.bf16 %v450_v46, %v449_v42 }
  0x4b   : > { %v4819_v52 = vpack.c.bf16 %v997_v51, %v996_v47  ;;  %v457_v42 = vld [vmem:[#allocation2 + $0x108] sm:$0xff]  ;;  %v458_v46 = vld [vmem:[#allocation2 + $0x110] sm:$0xff] }
  0x4c   : > { %3848 = vmatmul.mubr.bf16.vlgmr.msra.gmra.mxu1 %v4745_v60  ;;  %3896 = vmatmul.mubr.bf16.vlgmr.msra.gmra.mxu0 %v4747_v0  ;;  %v1004_v47 = vld [vmem:[#allocation2 + $0x10a] sm:$0xff] }
  0x4d   : > { %3928 = vmatpush3.bf16.msra.mxu1 %v4264_v37  ;;  %3976 = vmatpush3.bf16.msra.mxu0 %v4265_v55  ;;  %v998_v37 = vld [vmem:[#allocation2 + $0xc2] sm:$0xff]  ;;  %v999_v55 = vld [vmem:[#allocation2 + $0xca] sm:$0xff] }
  0x4e   : > { %3851 = vmatprep.mubr.bf16.mxu1 %v4749_v4  ;;  %3899 = vmatprep.mubr.bf16.mxu0 %v4751_v53  ;;  %v4823_v54 = vpack.c.bf16 %v999_v55, %v998_v37  ;;  %v460_v51 = vld [vmem:[#allocation2 + $0x128] sm:$0xff]  ;;  %v4867_v37 = vpack.c.bf16 %v458_v46, %v457_v42  ;;  %v4282_v42 = vld [vmem:[%s5592_s2 + $0x170] sm:$0xff]  }
  0x4f   : > { %3929 = vmatprep.subr.bf16.mxu1 %v4266_v8  ;;  %3977 = vmatprep.subr.bf16.mxu0 %v4267_v10  ;;  %v4283_v46 = vld [vmem:[%s5592_s2 + $0x1b0] sm:$0xff]  }
  0x51   : > { %3930 = vmatpush3.bf16.msra.mxu1 %v4266_v8  ;;  %3978 = vmatpush3.bf16.msra.mxu0 %v4267_v10  ;;  %v1000_v8 = vld [vmem:[#allocation2 + $0xda] sm:$0xff]  ;;  %v1001_v10 = vld [vmem:[#allocation2 + $0xe2] sm:$0xff] }
  0x52   : > { %3931 = vmatprep.subr.bf16.mxu1 %v4268_v16  ;;  %3979 = vmatprep.subr.bf16.mxu0 %v4269_v18 }
  0x54   : > { %3852 = vmatmul.mubr.bf16.gmra.mxu1 %v4769_v19  ;;  %3900 = vmatmul.mubr.bf16.gmra.mxu0 %v4771_v20 }
  0x55   : > { %3855 = vmatprep.mubr.bf16.mxu1 %v4773_v23  ;;  %3903 = vmatprep.mubr.bf16.mxu0 %v4775_v24 }
  0x56   : > { %3932 = vmatpush3.bf16.msra.mxu1 %v4268_v16  ;;  %3980 = vmatpush3.bf16.msra.mxu0 %v4269_v18  ;;  %v1002_v16 = vld [vmem:[#allocation2 + $0xf2] sm:$0xff] }
  0x57   : > { %3933 = vmatprep.subr.bf16.mxu1 %v4270_v25  ;;  %3981 = vmatprep.subr.bf16.mxu0 %v4271_v45  ;;  %v243_v18 = vld [vmem:[%s4381_s26 + $0xf8] sm:$0xff] }
  0x58   : > { %v279_v41 = vmul.f32 %v4391_v7, %v243_v18 }
  0x5a   : > { %3934 = vmatpush3.bf16.msra.mxu1 %v4270_v25  ;;  %3982 = vmatpush3.bf16.msra.mxu0 %v4271_v45  ;;  %v278_v25 = vmul.f32 %v4391_v7, %v242_v13  ;;  %v4848_v45 = vld [vmem:[%s5592_s2 + $0x1b8] sm:$0xff]   ;;  %v315_v57 = vadd.f32 %v4396_v9, %v279_v41  ;;  %v4853_v7 = vpack.c.bf16 %v1001_v10, %v1000_v8  ;;  %v1009_v8 = vld [vmem:[#allocation2 + $0x142] sm:$0xff]  ;;  %v463_v10 = vld [vmem:[#allocation2 + $0x150] sm:$0xff] }
  0x5b   : > { %3935 = vmatprep.subr.bf16.mxu1 %v4272_v11  ;;  %3983 = vmatprep.subr.bf16.mxu0 %v4273_v22  ;;  %v1010_v13 = vld [vmem:[#allocation2 + $0x152] sm:$0xff] }
  0x5c   : > { %3856 = vmatmul.mubr.bf16.gmra.mxu1 %v4793_v30  ;;  %3904 = vmatmul.mubr.bf16.gmra.mxu0 %v4795_v33  ;;  %v314_v44 = vadd.f32 %v4396_v9, %v278_v25  ;;  %v4885_v25 = vpack.c.bf16 %v1011_v14, %v1010_v13  ;;  %v466_v41 = vld [vmem:[#allocation2 + $0x170] sm:$0xff]  ;;  %v4296_v13 = vld [vmem:[%s5592_s2 + $0x1f8] sm:$0xff]  }
  0x5d   : > { %3859 = vmatprep.mubr.bf16.mxu1 %v4797_v36  ;;  %3907 = vmatprep.mubr.bf16.mxu0 %v4799_v40  ;;  %v4297_v14 = vld [vmem:[%s5592_s2 + $0x238] sm:$0xff]  }
  0x5e   : > { %3936 = vmatpush3.bf16.msra.mxu1 %v4272_v11  ;;  %3984 = vmatpush3.bf16.msra.mxu0 %v4273_v22  ;;  %v346_v1 = vmax.f32 %v314_v44, 0.0  ;;  %v4857_v11 = vpack.c.bf16 %v1003_v26, %v1002_v16  ;;  %v347_v22 = vmax.f32 %v315_v57, 0.0  ;;  %v4881_v16 = vpack.c.bf16 %v1009_v8, %v1008_v6  ;;  %v465_v26 = vld [vmem:[#allocation2 + $0x168] sm:$0xff]  ;;  %v1013_v57 = vld [vmem:[#allocation2 + $0x172] sm:$0xff] }
  0x5f   : > { %3937 = vmatprep.subr.bf16.mxu1 %v4274_v49  ;;  %3985 = vmatprep.subr.bf16.mxu0 %v4275_v50  ;;  %v1012_v44 = vld [vmem:[#allocation2 + $0x16a] sm:$0xff]  ;;  %v1613_v8 = vld [vmem:[#allocation2 + $0xf9] sm:$0xff] }
  0x60   : > { %433 = vst [vmem:[#allocation2 + $0x181] sm:$0xff] %v346_v1  ;;  %434 = vst [vmem:[#allocation2 + $0x189] sm:$0xff] %v347_v22  ;;  %v4861_v9 = vpack.c.bf16 %v347_v22, %v346_v1  ;;  %v4891_v1 = vpack.c.bf16 %v466_v41, %v465_v26  ;;  %v4893_v22 = vpack.c.bf16 %v1013_v57, %v1012_v44  ;;  %v1612_v6 = vld [vmem:[#allocation2 + $0xf1] sm:$0xff] }
  0x61   : > { %v4969_v26 = vpack.c.bf16 %v1613_v8, %v1612_v6  ;;  %v2515_v8 = vld [vmem:[#allocation2 + $0x49] sm:$0xff] }
  0x62   : > { %3938 = vmatpush3.bf16.msra.mxu1 %v4274_v49  ;;  %3986 = vmatpush3.bf16.msra.mxu0 %v4275_v50  ;;  %v1005_v49 = vld [vmem:[#allocation2 + $0x112] sm:$0xff]  ;;  %v459_v50 = vld [vmem:[#allocation2 + $0x120] sm:$0xff] }
  0x63   : > { %3939 = vmatprep.subr.bf16.mxu1 %v4276_v59  ;;  %3987 = vmatprep.subr.bf16.mxu0 %v4277_v63  ;;  %v4869_v55 = vpack.c.bf16 %v1005_v49, %v1004_v47  ;;  %v1608_v47 = vld [vmem:[#allocation2 + $0xc1] sm:$0xff]  ;;  %v1609_v49 = vld [vmem:[#allocation2 + $0xc9] sm:$0xff] }
  0x64   : > { %3860 = vmatmul.mubr.bf16.gmra.mxu1 %v4817_v48  ;;  %3908 = vmatmul.mubr.bf16.gmra.mxu0 %v4819_v52 }
  0x65   : > { %3863 = vmatprep.mubr.bf16.mxu1 %v4821_v56  ;;  %3911 = vmatprep.mubr.bf16.mxu0 %v4823_v54 }
  0x66   : > { %3940 = vmatpush3.bf16.msra.mxu1 %v4276_v59  ;;  %3988 = vmatpush3.bf16.msra.mxu0 %v4277_v63  ;;  %v4871_v59 = vpack.c.bf16 %v460_v51, %v459_v50  ;;  %v4873_v63 = vpack.c.bf16 %v1007_v31, %v1006_v27  ;;  %v1610_v50 = vld [vmem:[#allocation2 + $0xd9] sm:$0xff]  ;;  %v1611_v51 = vld [vmem:[#allocation2 + $0xe1] sm:$0xff]  ;;  %v4949_v31 = vpack.c.bf16 %v1609_v49, %v1608_v47 }
  0x67   : > { %3941 = vmatprep.subr.bf16.mxu1 %v4278_v61  ;;  %3989 = vmatprep.subr.bf16.mxu0 %v4279_v12  ;;  %v4292_v27 = vld [vmem:[%s5592_s2 + $0x148] sm:$0xff]   ;;  %v1318_v44 = vld [vmem:[#allocation2 + $0x180] sm:$0xff] }
  0x68   : > { %v1319_v57 = vld [vmem:[#allocation2 + $0x188] sm:$0xff]  ;;  %v2820_v47 = vld [vmem:[#allocation2 + $0x3a] sm:$0xff] }
  0x6a   : > { %3942 = vmatpush3.bf16.msra.mxu1 %v4278_v61  ;;  %3990 = vmatpush3.bf16.msra.mxu0 %v4279_v12  ;;  %v461_v61 = vld [vmem:[#allocation2 + $0x138] sm:$0xff] }
  0x6b   : > { %4023 = vmatprep.subr.bf16.mxu1 %v4842_v43  ;;  %4071 = vmatprep.subr.bf16.mxu0 %v4848_v45  ;;  %v464_v12 = vld [vmem:[#allocation2 + $0x158] sm:$0xff]  ;;  %v4879_v15 = vpack.c.bf16 %v462_v62, %v461_v61  ;;  %v4951_v61 = vpack.c.bf16 %v1611_v51, %v1610_v50  ;;  %v4295_v62 = vld [vmem:[%s5592_s2 + $0x180] sm:$0xff]  }
  0x6c   : > { %3864 = vmatmul.mubr.bf16.gmra.mxu1 %v4851_v58  ;;  %3912 = vmatmul.mubr.bf16.gmra.mxu0 %v4853_v7  ;;  %v4883_v18 = vpack.c.bf16 %v464_v12, %v463_v10  ;;  %v1614_v10 = vld [vmem:[#allocation2 + $0x109] sm:$0xff]  ;;  %v1615_v12 = vld [vmem:[#allocation2 + $0x111] sm:$0xff] }
  0x6d   : > { %3867 = vmatprep.mubr.bf16.mxu1 %v4855_v5  ;;  %3915 = vmatprep.mubr.bf16.mxu0 %v4857_v11  ;;  %v4971_v41 = vpack.c.bf16 %v1615_v12, %v1614_v10  ;;  %v2516_v10 = vld [vmem:[#allocation2 + $0x51] sm:$0xff] }
  0x6e   : > { %v2821_v12 = vld [vmem:[#allocation2 + $0x4a] sm:$0xff] }
  0x74   : > { %3868 = vmatmul.mubr.bf16.gmra.mxu1 %v4867_v37  ;;  %3916 = vmatmul.mubr.bf16.gmra.mxu0 %v4869_v55 }
  0x75   : > { %3871 = vmatprep.mubr.bf16.mxu1 %v4871_v59  ;;  %3919 = vmatprep.mubr.bf16.mxu0 %v4873_v63 }
  0x7c   : > { %3872 = vmatmul.mubr.bf16.gmra.mxu1 %v4879_v15  ;;  %3920 = vmatmul.mubr.bf16.gmra.mxu0 %v4881_v16 }
  0x7d   : > { %3875 = vmatprep.mubr.bf16.mxu1 %v4883_v18  ;;  %3923 = vmatprep.mubr.bf16.mxu0 %v4885_v25 }
  0x84   : > { %3876 = vmatmul.mubr.bf16.gmra.mxu1 %v4891_v1  ;;  %3924 = vmatmul.mubr.bf16.gmra.mxu0 %v4893_v22 }
  0x85   : > { %3943 = vmatprep.mubr.bf16.mxu1 %v4745_v60  ;;  %3991 = vmatprep.mubr.bf16.mxu0 %v4537_v29  ;;  %v4284_v29 = vld [vmem:[%s5592_s2 + $0x168] sm:$0xff]  }
  0x86   : > { %v4285_v60 = vld [vmem:[%s5592_s2 + $0x1a8] sm:$0xff]  }
  0x8c   : > { %3944 = vmatmul.mubr.bf16.vlgmr.msra.gmra.mxu1 %v4749_v4  ;;  %3992 = vmatmul.mubr.bf16.vlgmr.msra.gmra.mxu0 %v4594_v34  ;;  %v4286_v34 = vld [vmem:[%s5592_s2 + $0x160] sm:$0xff]  }
  0x8d   : > { %4024 = vmatpush3.bf16.msra.mxu1 %v4842_v43  ;;  %4072 = vmatpush3.bf16.msra.mxu0 %v4848_v45  ;;  %v4288_v43 = vld [vmem:[%s5592_s2 + $0x158] sm:$0xff]  }
  0x8e   : > { %3947 = vmatprep.mubr.bf16.mxu1 %v4769_v19  ;;  %3995 = vmatprep.mubr.bf16.mxu0 %v4660_v28  ;;  %v4287_v28 = vld [vmem:[%s5592_s2 + $0x1a0] sm:$0xff]   ;;  %v4289_v45 = vld [vmem:[%s5592_s2 + $0x198] sm:$0xff]  }
  0x8f   : > { %4025 = vmatprep.subr.bf16.mxu1 %v4282_v42  ;;  %4073 = vmatprep.subr.bf16.mxu0 %v4283_v46 }
  0x91   : > { %4026 = vmatpush3.bf16.msra.mxu1 %v4282_v42  ;;  %4074 = vmatpush3.bf16.msra.mxu0 %v4283_v46  ;;  %v4985_v42 = vpack.c.bf16 %v1319_v57, %v1318_v44 }
  0x92   : > { %4027 = vmatprep.subr.bf16.mxu1 %v4284_v29  ;;  %4075 = vmatprep.subr.bf16.mxu0 %v4285_v60 }
  0x94   : > { %3948 = vmatmul.mubr.bf16.gmra.mxu1 %v4773_v23  ;;  %3996 = vmatmul.mubr.bf16.gmra.mxu0 %v4678_v2  ;;  %v4290_v2 = vld [vmem:[%s5592_s2 + $0x150] sm:$0xff]  }
  0x95   : > { %3951 = vmatprep.mubr.bf16.mxu1 %v4793_v30  ;;  %3999 = vmatprep.mubr.bf16.mxu0 %v4699_v17  ;;  %v4291_v17 = vld [vmem:[%s5592_s2 + $0x190] sm:$0xff]  }
  0x96   : > { %4028 = vmatpush3.bf16.msra.mxu1 %v4284_v29  ;;  %4076 = vmatpush3.bf16.msra.mxu0 %v4285_v60 }
  0x97   : > { %4029 = vmatprep.subr.bf16.mxu1 %v4286_v34  ;;  %4077 = vmatprep.subr.bf16.mxu0 %v4287_v28 }
  0x9a   : > { %4030 = vmatpush3.bf16.msra.mxu1 %v4286_v34  ;;  %4078 = vmatpush3.bf16.msra.mxu0 %v4287_v28 }
  0x9b   : > { %4031 = vmatprep.subr.bf16.mxu1 %v4288_v43  ;;  %4079 = vmatprep.subr.bf16.mxu0 %v4289_v45 }
  0x9c   : > { %3952 = vmatmul.mubr.bf16.gmra.mxu1 %v4797_v36  ;;  %4000 = vmatmul.mubr.bf16.gmra.mxu0 %v4713_v35  ;;  %v4293_v35 = vld [vmem:[%s5592_s2 + $0x188] sm:$0xff]  }
  0x9d   : > { %3955 = vmatprep.mubr.bf16.mxu1 %v4817_v48  ;;  %4003 = vmatprep.mubr.bf16.mxu0 %v4727_v38  ;;  %v4294_v38 = vld [vmem:[%s5592_s2 + $0x140] sm:$0xff]  }
  0x9e   : > { %4032 = vmatpush3.bf16.msra.mxu1 %v4288_v43  ;;  %4080 = vmatpush3.bf16.msra.mxu0 %v4289_v45 }
  0x9f   : > { %4033 = vmatprep.subr.bf16.mxu1 %v4290_v2  ;;  %4081 = vmatprep.subr.bf16.mxu0 %v4291_v17 }
  0xa2   : > { %4034 = vmatpush3.bf16.msra.mxu1 %v4290_v2  ;;  %4082 = vmatpush3.bf16.msra.mxu0 %v4291_v17  ;;  %v2514_v2 = vld [vmem:[#allocation2 + $0x39] sm:$0xff] }
  0xa3   : > { %4035 = vmatprep.subr.bf16.mxu1 %v4292_v27  ;;  %4083 = vmatprep.subr.bf16.mxu0 %v4293_v35  ;;  %v2819_v17 = vld [vmem:[#allocation2 + $0x32] sm:$0xff] }
  0xa4   : > { %3956 = vmatmul.mubr.bf16.gmra.mxu1 %v4821_v56  ;;  %4004 = vmatmul.mubr.bf16.gmra.mxu0 %v4949_v31 }
  0xa5   : > { %3959 = vmatprep.mubr.bf16.mxu1 %v4851_v58  ;;  %4007 = vmatprep.mubr.bf16.mxu0 %v4951_v61 }
  0xa6   : > { %4036 = vmatpush3.bf16.msra.mxu1 %v4292_v27  ;;  %4084 = vmatpush3.bf16.msra.mxu0 %v4293_v35  ;;  %v2851_v27 = vpack.c.bf16 %v2820_v47, %v2819_v17 }
  0xa7   : > { %4037 = vmatprep.subr.bf16.mxu1 %v4294_v38  ;;  %4085 = vmatprep.subr.bf16.mxu0 %v4295_v62 }
  0xaa   : > { %4038 = vmatpush3.bf16.msra.mxu1 %v4294_v38  ;;  %4086 = vmatpush3.bf16.msra.mxu0 %v4295_v62 }
  0xab   : > { %4119 = vmatprep.subr.bf16.mxu1 %v4296_v13  ;;  %4167 = vmatprep.subr.bf16.mxu0 %v4297_v14 }
  0xac   : > { %3960 = vmatmul.mubr.bf16.gmra.mxu1 %v4855_v5  ;;  %4008 = vmatmul.mubr.bf16.gmra.mxu0 %v4969_v26 }
  0xad   : > { %3963 = vmatprep.mubr.bf16.mxu1 %v4867_v37  ;;  %4011 = vmatprep.mubr.bf16.mxu0 %v4971_v41 }
  0xb4   : > { %3964 = vmatmul.mubr.bf16.gmra.mxu1 %v4871_v59  ;;  %4012 = vmatmul.mubr.bf16.gmra.mxu0 %v4684_v3  ;;  %v4298_v3 = vld [vmem:[%s5592_s2 + $0x1f0] sm:$0xff]  }
  0xb5   : > { %3967 = vmatprep.mubr.bf16.mxu1 %v4879_v15  ;;  %4015 = vmatprep.mubr.bf16.mxu0 %v4705_v21  ;;  %v4299_v21 = vld [vmem:[%s5592_s2 + $0x230] sm:$0xff]  }
  0xbc   : > { %3968 = vmatmul.mubr.bf16.gmra.mxu1 %v4883_v18  ;;  %4016 = vmatmul.mubr.bf16.gmra.mxu0 %v4715_v32  ;;  %v4300_v32 = vld [vmem:[%s5592_s2 + $0x1e8] sm:$0xff]  }
  0xbd   : > { %3971 = vmatprep.mubr.bf16.mxu1 %v4891_v1  ;;  %4019 = vmatprep.mubr.bf16.mxu0 %v4729_v39  ;;  %v4301_v39 = vld [vmem:[%s5592_s2 + $0x228] sm:$0xff]  }
  0xc4   : > { %3972 = vmatmul.mubr.bf16.gmra.mxu1 %v4985_v42  ;;  %4020 = vmatmul.mubr.bf16.gmra.mxu0 %v4861_v9 }
  0xc5   : > { %4039 = vmatprep.mubr.bf16.mxu1 %v4747_v0  ;;  %4087 = vmatprep.mubr.bf16.mxu0 %v4749_v4  ;;  %v4302_v0 = vld [vmem:[%s5592_s2 + $0x1e0] sm:$0xff]  }
  0xc6   : > { %v4303_v4 = vld [vmem:[%s5592_s2 + $0x220] sm:$0xff]  }
  0xcc   : > { %4040 = vmatmul.mubr.bf16.vlgmr.msra.gmra.mxu1 %v4751_v53  ;;  %4088 = vmatmul.mubr.bf16.vlgmr.msra.gmra.mxu0 %v4769_v19  ;;  %v4304_v53 = vld [vmem:[%s5592_s2 + $0x1d8] sm:$0xff]  }
  0xcd   : > { %4120 = vmatpush3.bf16.msra.mxu1 %v4296_v13  ;;  %4168 = vmatpush3.bf16.msra.mxu0 %v4297_v14  ;;  %v4305_v19 = vld [vmem:[%s5592_s2 + $0x218] sm:$0xff]   ;;  %v2517_v14 = vld [vmem:[#allocation2 + $0x61] sm:$0xff] }
  0xce   : > { %4043 = vmatprep.mubr.bf16.mxu1 %v4771_v20  ;;  %4091 = vmatprep.mubr.bf16.mxu0 %v4773_v23  ;;  %v4306_v20 = vld [vmem:[%s5592_s2 + $0x1d0] sm:$0xff]  }
  0xcf   : > { %4121 = vmatprep.subr.bf16.mxu1 %v4298_v3  ;;  %4169 = vmatprep.subr.bf16.mxu0 %v4299_v21  ;;  %v4307_v23 = vld [vmem:[%s5592_s2 + $0x210] sm:$0xff]  }
  0xd0   : > { %v2822_v13 = vld [vmem:[#allocation2 + $0x52] sm:$0xff] }
  0xd1   : > { %4122 = vmatpush3.bf16.msra.mxu1 %v4298_v3  ;;  %4170 = vmatpush3.bf16.msra.mxu0 %v4299_v21  ;;  %v2823_v3 = vld [vmem:[#allocation2 + $0x62] sm:$0xff]  ;;  %v2824_v21 = vld [vmem:[#allocation2 + $0x6a] sm:$0xff] }
  0xd2   : > { %4123 = vmatprep.subr.bf16.mxu1 %v4300_v32  ;;  %4171 = vmatprep.subr.bf16.mxu0 %v4301_v39 }
  0xd4   : > { %4044 = vmatmul.mubr.bf16.gmra.mxu1 %v4775_v24  ;;  %4092 = vmatmul.mubr.bf16.gmra.mxu0 %v4793_v30  ;;  %v4308_v24 = vld [vmem:[%s5592_s2 + $0x1c8] sm:$0xff]  }
  0xd5   : > { %4047 = vmatprep.mubr.bf16.mxu1 %v4795_v33  ;;  %4095 = vmatprep.mubr.bf16.mxu0 %v4797_v36  ;;  %v4309_v30 = vld [vmem:[%s5592_s2 + $0x208] sm:$0xff]   ;;  %v4310_v33 = vld [vmem:[%s5592_s2 + $0x1c0] sm:$0xff]  }
  0xd6   : > { %4124 = vmatpush3.bf16.msra.mxu1 %v4300_v32  ;;  %4172 = vmatpush3.bf16.msra.mxu0 %v4301_v39  ;;  %v4311_v36 = vld [vmem:[%s5592_s2 + $0x200] sm:$0xff]  }
  0xd7   : > { %4125 = vmatprep.subr.bf16.mxu1 %v4302_v0  ;;  %4173 = vmatprep.subr.bf16.mxu0 %v4303_v4 }
  0xda   : > { %4126 = vmatpush3.bf16.msra.mxu1 %v4302_v0  ;;  %4174 = vmatpush3.bf16.msra.mxu0 %v4303_v4  ;;  %v2546_v0 = vpack.c.bf16 %v2516_v10, %v2515_v8  ;;  %v2852_v4 = vpack.c.bf16 %v2822_v13, %v2821_v12 }
  0xdb   : > { %4127 = vmatprep.subr.bf16.mxu1 %v4304_v53  ;;  %4175 = vmatprep.subr.bf16.mxu0 %v4305_v19 }
  0xdc   : > { %4048 = vmatmul.mubr.bf16.gmra.mxu1 %v4799_v40  ;;  %4096 = vmatmul.mubr.bf16.gmra.mxu0 %v4817_v48 }
  0xdd   : > { %4051 = vmatprep.mubr.bf16.mxu1 %v4819_v52  ;;  %4099 = vmatprep.mubr.bf16.mxu0 %v4821_v56 }
  0xde   : > { %4128 = vmatpush3.bf16.msra.mxu1 %v4304_v53  ;;  %4176 = vmatpush3.bf16.msra.mxu0 %v4305_v19  ;;  %v2853_v19 = vpack.c.bf16 %v2824_v21, %v2823_v3 }
  0xdf   : > { %4129 = vmatprep.subr.bf16.mxu1 %v4306_v20  ;;  %4177 = vmatprep.subr.bf16.mxu0 %v4307_v23 }
  0xe2   : > { %4130 = vmatpush3.bf16.msra.mxu1 %v4306_v20  ;;  %4178 = vmatpush3.bf16.msra.mxu0 %v4307_v23 }
  0xe3   : > { %4131 = vmatprep.subr.bf16.mxu1 %v4308_v24  ;;  %4179 = vmatprep.subr.bf16.mxu0 %v4309_v30 }
  0xe4   : > { %4052 = vmatmul.mubr.bf16.gmra.mxu1 %v4823_v54  ;;  %4100 = vmatmul.mubr.bf16.gmra.mxu0 %v4851_v58 }
  0xe5   : > { %4055 = vmatprep.mubr.bf16.mxu1 %v4853_v7  ;;  %4103 = vmatprep.mubr.bf16.mxu0 %v4855_v5 }
  0xe6   : > { %4132 = vmatpush3.bf16.msra.mxu1 %v4308_v24  ;;  %4180 = vmatpush3.bf16.msra.mxu0 %v4309_v30 }
  0xe7   : > { %4133 = vmatprep.subr.bf16.mxu1 %v4310_v33  ;;  %4181 = vmatprep.subr.bf16.mxu0 %v4311_v36 }
  0xea   : > { %4134 = vmatpush3.bf16.msra.mxu1 %v4310_v33  ;;  %4182 = vmatpush3.bf16.msra.mxu0 %v4311_v36  ;;  %v2519_v33 = vld [vmem:[#allocation2 + $0x79] sm:$0xff]  ;;  %v2520_v36 = vld [vmem:[#allocation2 + $0x81] sm:$0xff] }
  0xeb   : > { %v2548_v13 = vpack.c.bf16 %v2520_v36, %v2519_v33  ;;  %v2829_v36 = vld [vmem:[#allocation2 + $0xaa] sm:$0xff] }
  0xec   : > { %v5049_v40 = vpop.f32.mrf.mxu0  ;;  %v5051_v48 = vpop.f32.mrf.mxu1  ;;  %4056 = vmatmul.mubr.bf16.gmra.mxu1 %v4857_v11  ;;  %4104 = vmatmul.mubr.bf16.gmra.mxu0 %v4867_v37 }
  0xed   : > { %4059 = vmatprep.mubr.bf16.mxu1 %v4869_v55  ;;  %4107 = vmatprep.mubr.bf16.mxu0 %v4871_v59 }
  0xee   : > { %v5057_v52 = vpop.f32.mrf.mxu0  ;;  %v5059_v56 = vpop.f32.mrf.mxu1 }
  0xf0   : > { %v5061_v54 = vpop.f32.mrf.mxu0  ;;  %v5063_v58 = vpop.f32.mrf.mxu1 }
  0xf2   : > { %v5065_v7 = vpop.f32.mrf.mxu0  ;;  %v5067_v5 = vpop.f32.mrf.mxu1 }
  0xf4   : > { %v5069_v46 = vpop.f32.mrf.mxu0  ;;  %v5071_v11 = vpop.f32.mrf.mxu1  ;;  %4060 = vmatmul.mubr.bf16.gmra.mxu1 %v4873_v63  ;;  %4108 = vmatmul.mubr.bf16.gmra.mxu0 %v4879_v15  ;;  %v1930_v15 = vld [vmem:[#allocation2 + $0x182] sm:$0xff] }
  0xf5   : > { %4063 = vmatprep.mubr.bf16.mxu1 %v4881_v16  ;;  %4111 = vmatprep.mubr.bf16.mxu0 %v4883_v18  ;;  %v1931_v16 = vld [vmem:[#allocation2 + $0x18a] sm:$0xff] }
  0xf6   : > { %v5077_v37 = vpop.f32.mrf.mxu0  ;;  %v5079_v55 = vpop.f32.mrf.mxu1  ;;  %v2513_v18 = vld [vmem:[#allocation2 + $0x31] sm:$0xff] }
  0xf7   : > { %v2545_v51 = vpack.c.bf16 %v2514_v2, %v2513_v18  ;;  %v2826_v18 = vld [vmem:[#allocation2 + $0x82] sm:$0xff]  ;;  %v2521_v2 = vld [vmem:[#allocation2 + $0x91] sm:$0xff] }
  0xf8   : > { %v5081_v59 = vpop.f32.mrf.mxu0  ;;  %v5083_v29 = vpop.f32.mrf.mxu1 }
  0xfa   : > { %v5085_v60 = vpop.f32.mrf.mxu0  ;;  %v5087_v34 = vpop.f32.mrf.mxu1 }
  0xfc   : > { %v5089_v28 = vpop.f32.mrf.mxu0  ;;  %v5091_v63 = vpop.f32.mrf.mxu1  ;;  %4064 = vmatmul.mubr.bf16.gmra.mxu1 %v4885_v25  ;;  %4112 = vmatmul.mubr.bf16.gmra.mxu0 %v4891_v1  ;;  %v5105_v25 = vpack.c.bf16 %v1931_v16, %v1930_v15  ;;  %v4312_v1 = vld [vmem:[#allocation2] sm:$0xff] }
  0xfd   : > { %4067 = vmatprep.mubr.bf16.mxu1 %v4893_v22  ;;  %4115 = vmatprep.mubr.bf16.mxu0 %v4985_v42  ;;  %v2254_v22 = vpack.c.bf16 %v4312_v1, %v4312_v1  ;;  %v2518_v42 = vld [vmem:[#allocation2 + $0x69] sm:$0xff]  ;;  %v2825_v16 = vld [vmem:[#allocation2 + $0x7a] sm:$0xff] }
  0xfe   : > { %v5097_v43 = vpop.f32.mrf.mxu0  ;;  %v5099_v45 = vpop.f32.mrf.mxu1  ;;  %v2547_v53 = vpack.c.bf16 %v2518_v42, %v2517_v14  ;;  %v2522_v1 = vld [vmem:[#allocation2 + $0x99] sm:$0xff]  ;;  %v2854_v14 = vpack.c.bf16 %v2826_v18, %v2825_v16 }
  0xff   : > { %v2549_v3 = vpack.c.bf16 %v2522_v1, %v2521_v2  ;;  %v2830_v16 = vld [vmem:[#allocation2 + $0xb2] sm:$0xff] }
 0x100   : > { %v5101_v49 = vpop.f32.mrf.mxu0  ;;  %v5103_v50 = vpop.f32.mrf.mxu1 }
 0x102   : > { %v5107_v35 = vpop.f32.mrf.mxu0  ;;  %v5109_v38 = vpop.f32.mrf.mxu1 }
 0x104   : > { %v5111_v62 = vpop.f32.mrf.mxu0  ;;  %v5113_v6 = vpop.f32.mrf.mxu1  ;;  %4068 = vmatmul.mubr.bf16.gmra.mxu1 %v5105_v25  ;;  %4116 = vmatmul.mubr.bf16.gmra.mxu0 %v2254_v22  ;;  %v2827_v22 = vld [vmem:[#allocation2 + $0x92] sm:$0xff] }
 0x105   : > { %4135 = vmatprep.mubr.bf16.mxu1 %v2545_v51  ;;  %4183 = vmatprep.mubr.bf16.mxu0 %v2851_v27  ;;  %v2828_v51 = vld [vmem:[#allocation2 + $0x9a] sm:$0xff] }
 0x106   : > { %v5116_v44 = vpop.f32.mrf.mxu0  ;;  %v5118_v57 = vpop.f32.mrf.mxu1  ;;  %v2855_v21 = vpack.c.bf16 %v2828_v51, %v2827_v22 }
 0x108   : > { %v5120_v32 = vpop.f32.mrf.mxu0  ;;  %v5122_v39 = vpop.f32.mrf.mxu1 }
 0x10a   : > { %v5124_v20 = vpop.f32.mrf.mxu0  ;;  %v5126_v23 = vpop.f32.mrf.mxu1 }
 0x10c   : > { %v3849_v24 = vpop.f32.mrf.mxu1  ;;  %v3897_v30 = vpop.f32.mrf.mxu0  ;;  %4136 = vmatmul.mubr.bf16.vlgmr.msra.gmra.mxu1 %v2546_v0  ;;  %4184 = vmatmul.mubr.bf16.vlgmr.msra.gmra.mxu0 %v2852_v4 }
 0x10d   : > { %v864_v15 = vadd.f32 %v3849_v24, %v5049_v40  ;;  %4139 = vmatprep.mubr.bf16.mxu1 %v2547_v53  ;;  %4187 = vmatprep.mubr.bf16.mxu0 %v2853_v19 }
 0x10e   : > { %v855_v17 = vpop.f32.mrf.mxu1  ;;  %v1129_v47 = vpop.f32.mrf.mxu0 }
 0x10f   : > { %v5129_v27 = vadd.f32 %v3897_v30, %v864_v15  ;;  %v856_v8 = vadd.f32 %v855_v17, %v5057_v52  ;;  %v2523_v52 = vld [vmem:[#allocation2 + $0xa9] sm:$0xff] }
 0x110   : > { %v3850_v10 = vpop.f32.mrf.mxu1  ;;  %v3898_v12 = vpop.f32.mrf.mxu0  ;;  %v2831_v17 = vld [vmem:[#allocation2 + $0xc2] sm:$0xff] }
 0x111   : > { %v5132_v42 = vadd.f32 %v1129_v47, %v856_v8  ;;  %v867_v40 = vadd.f32 %v3850_v10, %v5061_v54  ;;  %v2524_v54 = vld [vmem:[#allocation2 + $0xb1] sm:$0xff]  ;;  %v2856_v10 = vpack.c.bf16 %v2830_v16, %v2829_v36 }
 0x112   : > { %v858_v0 = vpop.f32.mrf.mxu1  ;;  %v1132_v4 = vpop.f32.mrf.mxu0  ;;  %v2832_v47 = vld [vmem:[#allocation2 + $0xca] sm:$0xff]  ;;  %v2550_v8 = vpack.c.bf16 %v2524_v54, %v2523_v52  ;;  %v2836_v54 = vld [vmem:[#allocation2 + $0xfa] sm:$0xff] }
 0x113   : > { %v5135_v53 = vadd.f32 %v3898_v12, %v867_v40  ;;  %v859_v19 = vadd.f32 %v858_v0, %v5065_v7 }
 0x114   : > { %v3853_v24 = vpop.f32.mrf.mxu1  ;;  %v3901_v30 = vpop.f32.mrf.mxu0  ;;  %4140 = vmatmul.mubr.bf16.gmra.mxu1 %v2548_v13  ;;  %4188 = vmatmul.mubr.bf16.gmra.mxu0 %v2854_v14  ;;  %v2857_v13 = vpack.c.bf16 %v2832_v47, %v2831_v17 }
 0x115   : > { %v5138_v15 = vadd.f32 %v1132_v4, %v859_v19  ;;  %v880_v33 = vadd.f32 %v3853_v24, %v5069_v46  ;;  %4143 = vmatprep.mubr.bf16.mxu1 %v2549_v3  ;;  %4191 = vmatprep.mubr.bf16.mxu0 %v2855_v21  ;;  %v2833_v24 = vld [vmem:[#allocation2 + $0xda] sm:$0xff] }
 0x116   : > { %v871_v18 = vpop.f32.mrf.mxu1  ;;  %v1145_v2 = vpop.f32.mrf.mxu0 }
 0x117   : > { %v5141_v1 = vadd.f32 %v3901_v30, %v880_v33  ;;  %v872_v7 = vadd.f32 %v871_v18, %v5077_v37  ;;  %v2835_v33 = vld [vmem:[#allocation2 + $0xf2] sm:$0xff] }
 0x118   : > { %v3854_v22 = vpop.f32.mrf.mxu1  ;;  %v3902_v51 = vpop.f32.mrf.mxu0  ;;  %v2859_v47 = vpack.c.bf16 %v2836_v54, %v2835_v33 }
 0x119   : > { %v5144_v12 = vadd.f32 %v1145_v2, %v872_v7  ;;  %v883_v46 = vadd.f32 %v3854_v22, %v5081_v59  ;;  %v2834_v59 = vld [vmem:[#allocation2 + $0xe2] sm:$0xff] }
 0x11a   : > { %v874_v14 = vpop.f32.mrf.mxu1  ;;  %v1148_v40 = vpop.f32.mrf.mxu0  ;;  %v2858_v2 = vpack.c.bf16 %v2834_v59, %v2833_v24 }
 0x11b   : > { %v5147_v3 = vadd.f32 %v3902_v51, %v883_v46  ;;  %v875_v21 = vadd.f32 %v874_v14, %v5085_v60  ;;  %v2533_v14 = vld [vmem:[#allocation2 + $0x121] sm:$0xff] }
 0x11c   : > { %v3857_v0 = vpop.f32.mrf.mxu1  ;;  %v3905_v4 = vpop.f32.mrf.mxu0  ;;  %4144 = vmatmul.mubr.bf16.gmra.mxu1 %v2550_v8  ;;  %4192 = vmatmul.mubr.bf16.gmra.mxu0 %v2856_v10 }
 0x11d   : > { %v5150_v37 = vadd.f32 %v1148_v40, %v875_v21  ;;  %v896_v19 = vadd.f32 %v3857_v0, %v5089_v28  ;;  %4147 = vmatprep.mubr.bf16.mxu1 %v4949_v31  ;;  %4195 = vmatprep.mubr.bf16.mxu0 %v2857_v13  ;;  %v2838_v13 = vld [vmem:[#allocation2 + $0x112] sm:$0xff]  ;;  %v2534_v0 = vld [vmem:[#allocation2 + $0x129] sm:$0xff] }
 0x11e   : > { %v887_v30 = vpop.f32.mrf.mxu1  ;;  %v1161_v52 = vpop.f32.mrf.mxu0 }
 0x11f   : > { %v5154_v36 = vadd.f32 %v3905_v4, %v896_v19  ;;  %v888_v60 = vadd.f32 %v887_v30, %v5097_v43  ;;  %v2839_v4 = vld [vmem:[#allocation2 + $0x122] sm:$0xff] }
 0x120   : > { %v3858_v16 = vpop.f32.mrf.mxu1  ;;  %v3906_v18 = vpop.f32.mrf.mxu0 }
 0x121   : > { %v5157_v17 = vadd.f32 %v1161_v52, %v888_v60  ;;  %v899_v28 = vadd.f32 %v3858_v16, %v5101_v49  ;;  %v2837_v49 = vld [vmem:[#allocation2 + $0x10a] sm:$0xff] }
 0x122   : > { %v890_v31 = vpop.f32.mrf.mxu1  ;;  %v1164_v7 = vpop.f32.mrf.mxu0  ;;  %v2860_v30 = vpack.c.bf16 %v2838_v13, %v2837_v49  ;;  %v2538_v49 = vld [vmem:[#allocation2 + $0x159] sm:$0xff] }
 0x123   : > { %v5160_v22 = vadd.f32 %v3906_v18, %v899_v28  ;;  %v891_v51 = vadd.f32 %v890_v31, %v5107_v35  ;;  %v2840_v35 = vld [vmem:[#allocation2 + $0x12a] sm:$0xff]  ;;  %v2844_v13 = vld [vmem:[#allocation2 + $0x15a] sm:$0xff] }
 0x124   : > { %v3861_v8 = vpop.f32.mrf.mxu1  ;;  %v3909_v10 = vpop.f32.mrf.mxu0  ;;  %4148 = vmatmul.mubr.bf16.gmra.mxu1 %v4951_v61  ;;  %4196 = vmatmul.mubr.bf16.gmra.mxu0 %v2858_v2  ;;  %v2861_v33 = vpack.c.bf16 %v2840_v35, %v2839_v4 }
 0x125   : > { %v5164_v43 = vadd.f32 %v1164_v7, %v891_v51  ;;  %v912_v46 = vadd.f32 %v3861_v8, %v5111_v62  ;;  %4151 = vmatprep.mubr.bf16.mxu1 %v4969_v26  ;;  %4199 = vmatprep.mubr.bf16.mxu0 %v2859_v47  ;;  %v2555_v62 = vpack.c.bf16 %v2534_v0, %v2533_v14  ;;  %v2536_v47 = vld [vmem:[#allocation2 + $0x141] sm:$0xff]  ;;  %v2537_v8 = vld [vmem:[#allocation2 + $0x151] sm:$0xff] }
 0x126   : > { %v903_v40 = vpop.f32.mrf.mxu1  ;;  %v1177_v21 = vpop.f32.mrf.mxu0  ;;  %v2842_v51 = vld [vmem:[#allocation2 + $0x142] sm:$0xff] }
 0x127   : > { %v5168_v19 = vadd.f32 %v3909_v10, %v912_v46  ;;  %v904_v61 = vadd.f32 %v903_v40, %v5116_v44  ;;  %v2535_v44 = vld [vmem:[#allocation2 + $0x139] sm:$0xff] }
 0x128   : > { %v3862_v24 = vpop.f32.mrf.mxu1  ;;  %v3910_v59 = vpop.f32.mrf.mxu0  ;;  %v2556_v0 = vpack.c.bf16 %v2536_v47, %v2535_v44 }
 0x129   : > { %v5171_v52 = vadd.f32 %v1177_v21, %v904_v61  ;;  %v915_v26 = vadd.f32 %v3862_v24, %v5120_v32  ;;  %v2841_v32 = vld [vmem:[#allocation2 + $0x13a] sm:$0xff]  ;;  %v2557_v61 = vpack.c.bf16 %v2538_v49, %v2537_v8 }
 0x12a   : > { %v906_v54 = vpop.f32.mrf.mxu1  ;;  %v1180_v60 = vpop.f32.mrf.mxu0  ;;  %v2862_v4 = vpack.c.bf16 %v2842_v51, %v2841_v32 }
 0x12b   : > { %v5174_v16 = vadd.f32 %v3910_v59, %v915_v26  ;;  %v907_v18 = vadd.f32 %v906_v54, %v5124_v20  ;;  %v2843_v20 = vld [vmem:[#allocation2 + $0x152] sm:$0xff] }
 0x12c   : > { %v3865_v2 = vpop.f32.mrf.mxu1  ;;  %v3913_v28 = vpop.f32.mrf.mxu0  ;;  %4152 = vmatmul.mubr.bf16.gmra.mxu1 %v4971_v41  ;;  %4200 = vmatmul.mubr.bf16.gmra.mxu0 %v2860_v30  ;;  %v2863_v24 = vpack.c.bf16 %v2844_v13, %v2843_v20 }
 0x12d   : > { %v5178_v31 = vadd.f32 %v1180_v60, %v907_v18  ;;  %v928_v7 = vadd.f32 %v3865_v2, %v5051_v48  ;;  %4155 = vmatprep.mubr.bf16.mxu1 %v2555_v62  ;;  %4203 = vmatprep.mubr.bf16.mxu0 %v2861_v33  ;;  %v2845_v2 = vld [vmem:[#allocation2 + $0x16a] sm:$0xff] }
 0x12e   : > { %v919_v10 = vpop.f32.mrf.mxu1  ;;  %v1193_v46 = vpop.f32.mrf.mxu0 }
 0x12f   : > { %v5181_v14 = vadd.f32 %v3913_v28, %v928_v7  ;;  %v920_v41 = vadd.f32 %v919_v10, %v5059_v56  ;;  %v2539_v56 = vld [vmem:[#allocation2 + $0x169] sm:$0xff]  ;;  %v2846_v28 = vld [vmem:[#allocation2 + $0x172] sm:$0xff] }
 0x130   : > { %v3866_v40 = vpop.f32.mrf.mxu1  ;;  %v3914_v21 = vpop.f32.mrf.mxu0  ;;  %v2864_v10 = vpack.c.bf16 %v2846_v28, %v2845_v2 }
 0x131   : > { %v5184_v35 = vadd.f32 %v1193_v46, %v920_v41  ;;  %v931_v48 = vadd.f32 %v3866_v40, %v5063_v58  ;;  %v2540_v58 = vld [vmem:[#allocation2 + $0x171] sm:$0xff] }
 0x132   : > { %v922_v59 = vpop.f32.mrf.mxu1  ;;  %v1196_v30 = vpop.f32.mrf.mxu0  ;;  %v2558_v8 = vpack.c.bf16 %v2540_v58, %v2539_v56 }
 0x133   : > { %v5187_v26 = vadd.f32 %v3914_v21, %v931_v48  ;;  %v923_v62 = vadd.f32 %v922_v59, %v5067_v5  ;;  %v2849_v48 = vld [vmem:[#allocation2 + $0x19a] sm:$0xff] }
 0x134   : > { %v3869_v33 = vpop.f32.mrf.mxu1  ;;  %v3917_v54 = vpop.f32.mrf.mxu0  ;;  %4156 = vmatmul.mubr.bf16.gmra.mxu1 %v2556_v0  ;;  %4204 = vmatmul.mubr.bf16.gmra.mxu0 %v2862_v4  ;;  %v2543_v0 = vld [vmem:[#allocation2 + $0x199] sm:$0xff] }
 0x135   : > { %v5190_v60 = vadd.f32 %v1196_v30, %v923_v62  ;;  %v944_v18 = vadd.f32 %v3869_v33, %v5071_v11  ;;  %4159 = vmatprep.mubr.bf16.mxu1 %v2557_v61  ;;  %4207 = vmatprep.mubr.bf16.mxu0 %v2863_v24  ;;  %v2850_v61 = vld [vmem:[#allocation2 + $0x1a2] sm:$0xff] }
 0x136   : > { %v935_v44 = vpop.f32.mrf.mxu1  ;;  %v1209_v47 = vpop.f32.mrf.mxu0  ;;  %v2866_v56 = vpack.c.bf16 %v2850_v61, %v2849_v48 }
 0x137   : > { %v5193_v7 = vadd.f32 %v3917_v54, %v944_v18  ;;  %v936_v5 = vadd.f32 %v935_v44, %v5079_v55 }
 0x138   : > { %v3870_v32 = vpop.f32.mrf.mxu1  ;;  %v3918_v51 = vpop.f32.mrf.mxu0 }
 0x139   : > { %v5196_v46 = vadd.f32 %v1209_v47, %v936_v5  ;;  %v947_v49 = vadd.f32 %v3870_v32, %v5083_v29  ;;  %v2544_v29 = vld [vmem:[#allocation2 + $0x1a1] sm:$0xff] }
 0x13a   : > { %v938_v11 = vpop.f32.mrf.mxu1  ;;  %v1212_v20 = vpop.f32.mrf.mxu0  ;;  %v2560_v54 = vpack.c.bf16 %v2544_v29, %v2543_v0 }
 0x13b   : > { %v5199_v13 = vadd.f32 %v3918_v51, %v947_v49  ;;  %v939_v41 = vadd.f32 %v938_v11, %v5087_v34 }
 0x13c   : > { %v3873_v40 = vpop.f32.mrf.mxu1  ;;  %v3921_v21 = vpop.f32.mrf.mxu0  ;;  %4160 = vmatmul.mubr.bf16.gmra.mxu1 %v2558_v8  ;;  %4208 = vmatmul.mubr.bf16.gmra.mxu0 %v2864_v10 }
 0x13d   : > { %v5202_v55 = vadd.f32 %v1212_v20, %v939_v41  ;;  %v960_v4 = vadd.f32 %v3873_v40, %v5091_v63  ;;  %4163 = vmatprep.mubr.bf16.mxu1 %v4861_v9  ;;  %4211 = vmatprep.mubr.bf16.mxu0 %v5105_v25 }
 0x13e   : > { %v951_v24 = vpop.f32.mrf.mxu1  ;;  %v1225_v59 = vpop.f32.mrf.mxu0 }
 0x13f   : > { %v5207_v30 = vadd.f32 %v3921_v21, %v960_v4  ;;  %v952_v34 = vadd.f32 %v951_v24, %v5099_v45 }
 0x140   : > { %v3874_v62 = vpop.f32.mrf.mxu1  ;;  %v3922_v33 = vpop.f32.mrf.mxu0 }
 0x141   : > { %v5210_v18 = vadd.f32 %v1225_v59, %v952_v34  ;;  %v963_v63 = vadd.f32 %v3874_v62, %v5103_v50 }
 0x142   : > { %v954_v9 = vpop.f32.mrf.mxu1  ;;  %v1228_v58 = vpop.f32.mrf.mxu0 }
 0x143   : > { %v5213_v25 = vadd.f32 %v3922_v33, %v963_v63  ;;  %v955_v2 = vadd.f32 %v954_v9, %v5109_v38 }
 0x144   : > { %v3877_v28 = vpop.f32.mrf.mxu1  ;;  %v3925_v44 = vpop.f32.mrf.mxu0  ;;  %4164 = vmatmul.mubr.bf16.gmra.mxu1 %v2560_v54  ;;  %4212 = vmatmul.mubr.bf16.gmra.mxu0 %v2866_v56 }
 0x145   : > { %v5216_v47 = vadd.f32 %v1228_v58, %v955_v2  ;;  %v976_v45 = vadd.f32 %v3877_v28, %v5113_v6 }
 0x146   : > { %v967_v5 = vpop.f32.mrf.mxu1  ;;  %v1241_v32 = vpop.f32.mrf.mxu0 }
 0x147   : > { %v5219_v51 = vadd.f32 %v3925_v44, %v976_v45  ;;  %v968_v50 = vadd.f32 %v967_v5, %v5118_v57 }
 0x148   : > { %v3878_v8 = vpop.f32.mrf.mxu1  ;;  %v3926_v10 = vpop.f32.mrf.mxu0 }
 0x149   : > { %v5222_v49 = vadd.f32 %v1241_v32, %v968_v50  ;;  %v979_v38 = vadd.f32 %v3878_v8, %v5122_v39 }
 0x14a   : > { %v970_v11 = vpop.f32.mrf.mxu1  ;;  %v1244_v20 = vpop.f32.mrf.mxu0 }
 0x14b   : > { %v5225_v41 = vadd.f32 %v3926_v10, %v979_v38  ;;  %v971_v40 = vadd.f32 %v970_v11, %v5126_v23 }
 0x14c   : > { %v3945_v21 = vpop.f32.mrf.mxu1  ;;  %v3993_v6 = vpop.f32.mrf.mxu0 }
 0x14d   : > { %v5228_v0 = vadd.f32 %v1244_v20, %v971_v40  ;;  %v1564_v4 = vadd.f32 %v3945_v21, %v5129_v27 }
 0x14e   : > { %v1435_v29 = vpop.f32.mrf.mxu1  ;;  %v1741_v57 = vpop.f32.mrf.mxu0 }
 0x14f   : > { %v5231_v48 = vadd.f32 %v3993_v6, %v1564_v4  ;;  %v1562_v61 = vadd.f32 %v1435_v29, %v5132_v42 }
 0x150   : > { %v3946_v24 = vpop.f32.mrf.mxu1  ;;  %v3994_v39 = vpop.f32.mrf.mxu0 }
 0x151   : > { %v5234_v59 = vadd.f32 %v1741_v57, %v1562_v61  ;;  %v1565_v34 = vadd.f32 %v3946_v24, %v5135_v53 }
 0x152   : > { %v1438_v62 = vpop.f32.mrf.mxu1  ;;  %v1744_v23 = vpop.f32.mrf.mxu0 }
 0x153   : > { %v5237_v33 = vadd.f32 %v3994_v39, %v1565_v34  ;;  %v1563_v54 = vadd.f32 %v1438_v62, %v5138_v15 }
 0x154   : > { %v3949_v56 = vpop.f32.mrf.mxu1  ;;  %v3997_v27 = vpop.f32.mrf.mxu0 }
 0x155   : > { %v5240_v63 = vadd.f32 %v1744_v23, %v1563_v54  ;;  %v1568_v9 = vadd.f32 %v3949_v56, %v5141_v1 }
 0x156   : > { %v1451_v58 = vpop.f32.mrf.mxu1  ;;  %v1757_v42 = vpop.f32.mrf.mxu0 }
 0x157   : > { %v5243_v2 = vadd.f32 %v3997_v27, %v1568_v9  ;;  %v1566_v28 = vadd.f32 %v1451_v58, %v5144_v12 }
 0x158   : > { %v3950_v44 = vpop.f32.mrf.mxu1  ;;  %v3998_v53 = vpop.f32.mrf.mxu0 }
 0x159   : > { %v5246_v45 = vadd.f32 %v1757_v42, %v1566_v28  ;;  %v1569_v5 = vadd.f32 %v3950_v44, %v5147_v3 }
 0x15a   : > { %v1454_v32 = vpop.f32.mrf.mxu1  ;;  %v1760_v15 = vpop.f32.mrf.mxu0 }
 0x15b   : > { %v5249_v50 = vadd.f32 %v3998_v53, %v1569_v5  ;;  %v1567_v8 = vadd.f32 %v1454_v32, %v5150_v37 }
 0x15c   : > { %v3953_v10 = vpop.f32.mrf.mxu1  ;;  %v4001_v1 = vpop.f32.mrf.mxu0 }
 0x15d   : > { %v5252_v38 = vadd.f32 %v1760_v15, %v1567_v8  ;;  %v1572_v11 = vadd.f32 %v3953_v10, %v5154_v36 }
 0x15e   : > { %v1467_v20 = vpop.f32.mrf.mxu1  ;;  %v1773_v12 = vpop.f32.mrf.mxu0 }
 0x15f   : > { %v5255_v40 = vadd.f32 %v4001_v1, %v1572_v11  ;;  %v1570_v21 = vadd.f32 %v1467_v20, %v5157_v17 }
 0x160   : > { %v3954_v6 = vpop.f32.mrf.mxu1  ;;  %v4002_v3 = vpop.f32.mrf.mxu0 }
 0x161   : > { %v5258_v4 = vadd.f32 %v1773_v12, %v1570_v21  ;;  %v1573_v29 = vadd.f32 %v3954_v6, %v5160_v22 }
 0x162   : > { %v1470_v57 = vpop.f32.mrf.mxu1  ;;  %v1776_v37 = vpop.f32.mrf.mxu0 }
 0x163   : > { %v5261_v61 = vadd.f32 %v4002_v3, %v1573_v29  ;;  %v1571_v24 = vadd.f32 %v1470_v57, %v5164_v43 }
 0x164   : > { %v3957_v39 = vpop.f32.mrf.mxu1  ;;  %v4005_v36 = vpop.f32.mrf.mxu0 }
 0x165   : > { %v5264_v34 = vadd.f32 %v1776_v37, %v1571_v24  ;;  %v1576_v62 = vadd.f32 %v3957_v39, %v5168_v19 }
 0x166   : > { %v1483_v23 = vpop.f32.mrf.mxu1  ;;  %v1789_v17 = vpop.f32.mrf.mxu0 }
 0x167   : > { %v5267_v54 = vadd.f32 %v4005_v36, %v1576_v62  ;;  %v1574_v56 = vadd.f32 %v1483_v23, %v5171_v52 }
 0x168   : > { %v3958_v27 = vpop.f32.mrf.mxu1  ;;  %v4006_v22 = vpop.f32.mrf.mxu0 }
 0x169   : > { %v5270_v9 = vadd.f32 %v1789_v17, %v1574_v56  ;;  %v1577_v58 = vadd.f32 %v3958_v27, %v5174_v16 }
 0x16a   : > { %v1486_v42 = vpop.f32.mrf.mxu1  ;;  %v1792_v43 = vpop.f32.mrf.mxu0 }
 0x16b   : > { %v5273_v28 = vadd.f32 %v4006_v22, %v1577_v58  ;;  %v1575_v44 = vadd.f32 %v1486_v42, %v5178_v31 }
 0x16c   : > { %v3961_v53 = vpop.f32.mrf.mxu1  ;;  %v4009_v19 = vpop.f32.mrf.mxu0 }
 0x16d   : > { %v5276_v5 = vadd.f32 %v1792_v43, %v1575_v44  ;;  %v1580_v32 = vadd.f32 %v3961_v53, %v5181_v14 }
 0x16e   : > { %v1499_v15 = vpop.f32.mrf.mxu1  ;;  %v1805_v52 = vpop.f32.mrf.mxu0 }
 0x16f   : > { %v5279_v8 = vadd.f32 %v4009_v19, %v1580_v32  ;;  %v1578_v10 = vadd.f32 %v1499_v15, %v5184_v35 }
 0x170   : > { %v3962_v1 = vpop.f32.mrf.mxu1  ;;  %v4010_v16 = vpop.f32.mrf.mxu0 }
 0x171   : > { %v5282_v11 = vadd.f32 %v1805_v52, %v1578_v10  ;;  %v1581_v20 = vadd.f32 %v3962_v1, %v5187_v26 }
 0x172   : > { %v1502_v12 = vpop.f32.mrf.mxu1  ;;  %v1808_v31 = vpop.f32.mrf.mxu0 }
 0x173   : > { %v5285_v21 = vadd.f32 %v4010_v16, %v1581_v20  ;;  %v1579_v6 = vadd.f32 %v1502_v12, %v5190_v60 }
 0x174   : > { %v3965_v3 = vpop.f32.mrf.mxu1  ;;  %v4013_v14 = vpop.f32.mrf.mxu0 }
 0x175   : > { %5595 = vst [vmem:[#allocation3_spill] sm:$0xff] %v5285_v21  ;;  %v5288_v29 = vadd.f32 %v1808_v31, %v1579_v6  ;;  %v1584_v57 = vadd.f32 %v3965_v3, %v5193_v7 }
 0x176   : > { %v1515_v37 = vpop.f32.mrf.mxu1  ;;  %v1821_v35 = vpop.f32.mrf.mxu0 }
 0x177   : > { %5596 = vst [vmem:[#allocation4_spill] sm:$0xff] %v5288_v29  ;;  %v5291_v24 = vadd.f32 %v4013_v14, %v1584_v57  ;;  %v1582_v39 = vadd.f32 %v1515_v37, %v5196_v46 }
 0x178   : > { %v3966_v36 = vpop.f32.mrf.mxu1  ;;  %v4014_v26 = vpop.f32.mrf.mxu0 }
 0x179   : > { %5597 = vst [vmem:[#allocation5_spill] sm:$0xff] %v5291_v24  ;;  %v5294_v62 = vadd.f32 %v1821_v35, %v1582_v39  ;;  %v1585_v23 = vadd.f32 %v3966_v36, %v5199_v13 }
 0x17a   : > { %v1518_v17 = vpop.f32.mrf.mxu1  ;;  %v1824_v60 = vpop.f32.mrf.mxu0 }
 0x17b   : > { %5598 = vst [vmem:[#allocation6_spill] sm:$0xff] %v5294_v62  ;;  %v5297_v56 = vadd.f32 %v4014_v26, %v1585_v23  ;;  %v1583_v27 = vadd.f32 %v1518_v17, %v5202_v55 }
 0x17c   : > { %v3969_v22 = vpop.f32.mrf.mxu1  ;;  %v4017_v7 = vpop.f32.mrf.mxu0 }
 0x17d   : > { %5599 = vst [vmem:[#allocation7_spill] sm:$0xff] %v5297_v56  ;;  %v5300_v58 = vadd.f32 %v1824_v60, %v1583_v27  ;;  %v1588_v42 = vadd.f32 %v3969_v22, %v5207_v30 }
 0x17e   : > { %v1531_v43 = vpop.f32.mrf.mxu1  ;;  %v1837_v46 = vpop.f32.mrf.mxu0 }
 0x17f   : > { %5600 = vst [vmem:[#allocation8_spill] sm:$0xff] %v5300_v58  ;;  %v5303_v44 = vadd.f32 %v4017_v7, %v1588_v42  ;;  %v1586_v53 = vadd.f32 %v1531_v43, %v5210_v18 }
 0x180   : > { %v3970_v19 = vpop.f32.mrf.mxu1  ;;  %v4018_v13 = vpop.f32.mrf.mxu0 }
 0x181   : > { %5601 = vst [vmem:[#allocation9_spill] sm:$0xff] %v5303_v44  ;;  %v5306_v32 = vadd.f32 %v1837_v46, %v1586_v53  ;;  %v1589_v15 = vadd.f32 %v3970_v19, %v5213_v25 }
 0x182   : > { %v1534_v52 = vpop.f32.mrf.mxu1  ;;  %v1840_v55 = vpop.f32.mrf.mxu0 }
 0x183   : > { %5602 = vst [vmem:[#allocation10_spill] sm:$0xff] %v5306_v32  ;;  %v5309_v10 = vadd.f32 %v4018_v13, %v1589_v15  ;;  %v1587_v1 = vadd.f32 %v1534_v52, %v5216_v47 }
 0x184   : > { %v3973_v16 = vpop.f32.mrf.mxu1  ;;  %v4021_v30 = vpop.f32.mrf.mxu0 }
 0x185   : > { %5603 = vst [vmem:[#allocation11_spill] sm:$0xff] %v5309_v10  ;;  %v5312_v20 = vadd.f32 %v1840_v55, %v1587_v1  ;;  %v1592_v12 = vadd.f32 %v3973_v16, %v5219_v51 }
 0x186   : > { %v1547_v31 = vpop.f32.mrf.mxu1  ;;  %v1853_v18 = vpop.f32.mrf.mxu0 }
 0x187   : > { %5604 = vst [vmem:[#allocation12_spill] sm:$0xff] %v5312_v20  ;;  %v5315_v6 = vadd.f32 %v4021_v30, %v1592_v12  ;;  %v1590_v3 = vadd.f32 %v1547_v31, %v5222_v49 }
 0x188   : > { %v3974_v14 = vpop.f32.mrf.mxu1  ;;  %v4022_v25 = vpop.f32.mrf.mxu0 }
 0x189   : > { %5605 = vst [vmem:[#allocation13_spill] sm:$0xff] %v5315_v6  ;;  %v5318_v57 = vadd.f32 %v1853_v18, %v1590_v3  ;;  %v1593_v37 = vadd.f32 %v3974_v14, %v5225_v41 }
 0x18a   : > { %v1550_v35 = vpop.f32.mrf.mxu1  ;;  %v1856_v47 = vpop.f32.mrf.mxu0 }
 0x18b   : > { %5606 = vst [vmem:[#allocation14_spill] sm:$0xff] %v5318_v57  ;;  %v5321_v39 = vadd.f32 %v4022_v25, %v1593_v37  ;;  %v1591_v36 = vadd.f32 %v1550_v35, %v5228_v0 }
 0x18c   : > { %v4041_v26 = vpop.f32.mrf.mxu1  ;;  %v5324_v51 = vpop.f32.mrf.mxu0 }
 0x18d   : > { %5607 = vst [vmem:[#allocation15_spill] sm:$0xff] %v5321_v39  ;;  %v5326_v23 = vadd.f32 %v1856_v47, %v1591_v36 }
 0x18e   : > { %v2047_v17 = vpop.f32.mrf.mxu1  ;;  %v5328_v60 = vpop.f32.mrf.mxu0 }
 0x18f   : > { %5608 = vst [vmem:[#allocation16_spill] sm:$0xff] %v5326_v23 }
 0x190   : > { %v5330_v49 = vpop.f32.mrf.mxu1  ;;  %v5332_v27 = vpop.f32.mrf.mxu0 }
 0x192   : > { %v5334_v22 = vpop.f32.mrf.mxu1  ;;  %v5336_v41 = vpop.f32.mrf.mxu0 }
 0x194   : > { %v5338_v7 = vpop.f32.mrf.mxu1  ;;  %v5340_v42 = vpop.f32.mrf.mxu0 }
 0x196   : > { %v5342_v0 = vpop.f32.mrf.mxu1  ;;  %v5344_v43 = vpop.f32.mrf.mxu0 }
 0x198   : > { %v5346_v46 = vpop.f32.mrf.mxu1  ;;  %v5348_v53 = vpop.f32.mrf.mxu0 }
 0x19a   : > { %v5350_v19 = vpop.f32.mrf.mxu1  ;;  %v5352_v13 = vpop.f32.mrf.mxu0 }
 0x19c   : > { %v5354_v15 = vpop.f32.mrf.mxu1  ;;  %v5356_v52 = vpop.f32.mrf.mxu0 }
 0x19e   : > { %v5358_v55 = vpop.f32.mrf.mxu1  ;;  %v5360_v1 = vpop.f32.mrf.mxu0 }
 0x1a0   : > { %v5362_v16 = vpop.f32.mrf.mxu1  ;;  %v5364_v30 = vpop.f32.mrf.mxu0 }
 0x1a2   : > { %v5366_v12 = vpop.f32.mrf.mxu1  ;;  %v5368_v31 = vpop.f32.mrf.mxu0 }
 0x1a4   : > { %v5370_v18 = vpop.f32.mrf.mxu1  ;;  %v5372_v3 = vpop.f32.mrf.mxu0 }
 0x1a6   : > { %v5374_v14 = vpop.f32.mrf.mxu1  ;;  %v5376_v25 = vpop.f32.mrf.mxu0 }
 0x1a8   : > { %v5378_v37 = vpop.f32.mrf.mxu1  ;;  %v5380_v35 = vpop.f32.mrf.mxu0 }
 0x1aa   : > { %v5382_v47 = vpop.f32.mrf.mxu1  ;;  %v5384_v36 = vpop.f32.mrf.mxu0 }
 0x1ac   : > { %v5386_v23 = vpop.f32.mrf.mxu1  ;;  %v5388_v39 = vpop.f32.mrf.mxu0 }
 0x1ae   : > { %v5390_v57 = vpop.f32.mrf.mxu1  ;;  %v5392_v6 = vpop.f32.mrf.mxu0 }
 0x1af   : > { %5609 = vst [vmem:[#allocation17_spill] sm:$0xff] %v5392_v6 }
 0x1b0   : > { %v5394_v20 = vpop.f32.mrf.mxu1  ;;  %v5396_v10 = vpop.f32.mrf.mxu0 }
 0x1b1   : > { %5610 = vst [vmem:[#allocation18_spill] sm:$0xff] %v5394_v20  ;;  %5611 = vst [vmem:[#allocation19_spill] sm:$0xff] %v5396_v10 }
 0x1b2   : > { %v5398_v32 = vpop.f32.mrf.mxu1  ;;  %v5400_v44 = vpop.f32.mrf.mxu0 }
 0x1b3   : > { %5612 = vst [vmem:[#allocation20_spill] sm:$0xff] %v5398_v32  ;;  %5613 = vst [vmem:[#allocation21_spill] sm:$0xff] %v5400_v44 }
 0x1b4   : > { %v5402_v58 = vpop.f32.mrf.mxu1  ;;  %v5404_v56 = vpop.f32.mrf.mxu0 }
 0x1b5   : > { %5614 = vst [vmem:[#allocation22_spill] sm:$0xff] %v5402_v58  ;;  %5615 = vst [vmem:[#allocation23_spill] sm:$0xff] %v5404_v56 }
 0x1b6   : > { %v5406_v62 = vpop.f32.mrf.mxu1  ;;  %v5408_v24 = vpop.f32.mrf.mxu0 }
 0x1b7   : > { %5616 = vst [vmem:[#allocation24_spill] sm:$0xff] %v5406_v62  ;;  %5617 = vst [vmem:[#allocation25_spill] sm:$0xff] %v5408_v24 }
 0x1b8   : > { %v5410_v29 = vpop.f32.mrf.mxu1  ;;  %v5412_v21 = vpop.f32.mrf.mxu0 }
 0x1b9   : > { %5618 = vst [vmem:[#allocation26_spill] sm:$0xff] %v5410_v29  ;;  %5619 = vst [vmem:[#allocation27_spill] sm:$0xff] %v5412_v21 }
 0x1ba   : > { %v5414_v6 = vpop.f32.mrf.mxu1  ;;  %v5416_v20 = vpop.f32.mrf.mxu0 }
 0x1bb   : > { %5620 = vst [vmem:[#allocation28_spill] sm:$0xff] %v5414_v6  ;;  %5621 = vst [vmem:[#allocation29_spill] sm:$0xff] %v5416_v20 }
 0x1bc   : > { %v5418_v10 = vpop.f32.mrf.mxu1  ;;  %v5420_v32 = vpop.f32.mrf.mxu0 }
 0x1bd   : > { %5622 = vst [vmem:[#allocation30_spill] sm:$0xff] %v5418_v10  ;;  %5623 = vst [vmem:[#allocation31_spill] sm:$0xff] %v5420_v32 }
 0x1be   : > { %v5422_v44 = vpop.f32.mrf.mxu1  ;;  %v5424_v58 = vpop.f32.mrf.mxu0 }
 0x1bf   : > { %5624 = vst [vmem:[#allocation32_spill] sm:$0xff] %v5422_v44  ;;  %5625 = vst [vmem:[#allocation33_spill] sm:$0xff] %v5424_v58  ;;  %v2176_v44 = vadd.f32 %v4041_v26, %v5231_v48  ;;  %v2175_v48 = vadd.f32 %v5334_v22, %v5240_v63 }
 0x1c0   : > { %v5426_v56 = vpop.f32.mrf.mxu1  ;;  %v5428_v62 = vpop.f32.mrf.mxu0 }
 0x1c1   : > { %5626 = vst [vmem:[#allocation34_spill] sm:$0xff] %v5426_v56  ;;  %5627 = vst [vmem:[#allocation35_spill] sm:$0xff] %v5428_v62  ;;  %v2174_v62 = vadd.f32 %v2047_v17, %v5234_v59 }
 0x1c2   : > { %v5430_v24 = vpop.f32.mrf.mxu1  ;;  %v5432_v29 = vpop.f32.mrf.mxu0 }
 0x1c3   : > { %5628 = vst [vmem:[#allocation36_spill] sm:$0xff] %v5430_v24  ;;  %5629 = vst [vmem:[#allocation37_spill] sm:$0xff] %v5432_v29 }
 0x1c4   : > { %v5434_v21 = vpop.f32.mrf.mxu1  ;;  %v5436_v6 = vpop.f32.mrf.mxu0 }
 0x1c5   : > { %5630 = vst [vmem:[#allocation38_spill] sm:$0xff] %v5434_v21  ;;  %5631 = vst [vmem:[#allocation39_spill] sm:$0xff] %v5436_v6  ;;  %v2483_v21 = vadd.f32 %v5324_v51, %v2176_v44  ;;  %v2177_v6 = vadd.f32 %v5330_v49, %v5237_v33  ;;  %v2180_v51 = vadd.f32 %v5338_v7, %v5243_v2 }
 0x1c6   : > { %v5438_v20 = vpop.f32.mrf.mxu1  ;;  %v5440_v32 = vpop.f32.mrf.mxu0 }
 0x1c7   : > { %5632 = vst [vmem:[#allocation40_spill] sm:$0xff] %v5438_v20  ;;  %5633 = vst [vmem:[#allocation41_spill] sm:$0xff] %v5440_v32  ;;  %v2481_v32 = vadd.f32 %v5328_v60, %v2174_v62  ;;  %v2484_v33 = vadd.f32 %v5332_v27, %v2177_v6  ;;  %v2487_v6 = vadd.f32 %v5340_v42, %v2180_v51 }
 0x1c8   : > { %v5443_v58 = vpop.f32.mrf.mxu1  ;;  %v5445_v56 = vpop.f32.mrf.mxu0  ;;  %v2179_v27 = vadd.f32 %v5350_v19, %v5252_v38  ;;  %v2184_v42 = vadd.f32 %v5354_v15, %v5255_v40 }
 0x1c9   : > { %5634 = vst [vmem:[#allocation42_spill] sm:$0xff] %v5445_v56 }
 0x1ca   : > { %v5448_v24 = vpop.f32.mrf.mxu1  ;;  %v5450_v29 = vpop.f32.mrf.mxu0  ;;  %v2486_v19 = vadd.f32 %v5352_v13, %v2179_v27  ;;  %v2491_v15 = vadd.f32 %v5356_v52, %v2184_v42 }
 0x1cb   : > { %5635 = vst [vmem:[#allocation43_spill] sm:$0xff] %v5450_v29 }
 0x1cc   : > { %v4137_v20 = vpop.f32.mrf.mxu1  ;;  %v4185_v10 = vpop.f32.mrf.mxu0 }
 0x1cd   : > { %v2789_v26 = vadd.f32 %v4137_v20, %v2483_v21  ;;  %v2482_v21 = vadd.f32 %v5336_v41, %v2175_v48  ;;  %v2178_v20 = vadd.f32 %v5342_v0, %v5246_v45 }
 0x1ce   : > { %v2660_v59 = vpop.f32.mrf.mxu1  ;;  %v2966_v44 = vpop.f32.mrf.mxu0 }
 0x1cf   : > { %v3095_v62 = vadd.f32 %v4185_v10, %v2789_v26  ;;  %v2787_v17 = vadd.f32 %v2660_v59, %v2481_v32  ;;  %v2181_v32 = vadd.f32 %v5346_v46, %v5249_v50  ;;  %v2485_v45 = vadd.f32 %v5344_v43, %v2178_v20 }
 0x1d0   : > { %v4138_v60 = vpop.f32.mrf.mxu1  ;;  %v4186_v63 = vpop.f32.mrf.mxu0 }
 0x1d1   : > { %3127 = vst [vmem:[%s5463_s10 + $0x10] sm:$0xff] %v3095_v62  ;;  %v3093_v49 = vadd.f32 %v2966_v44, %v2787_v17  ;;  %v2790_v22 = vadd.f32 %v4138_v60, %v2484_v33  ;;  %v2488_v38 = vadd.f32 %v5348_v53, %v2181_v32  ;;  %v3197_v51 = vmul.f32 %v3095_v62, %v3095_v62 }
 0x1d2   : > { %v2663_v29 = vpop.f32.mrf.mxu1  ;;  %v2969_v56 = vpop.f32.mrf.mxu0 }
 0x1d3   : > { %3125 = vst [vmem:[%s5463_s10] sm:$0xff] %v3093_v49  ;;  %v3096_v2 = vadd.f32 %v4186_v63, %v2790_v22  ;;  %v2788_v10 = vadd.f32 %v2663_v29, %v2482_v21  ;;  %v3195_v26 = vmul.f32 %v3093_v49, %v3093_v49  ;;  %v2182_v63 = vadd.f32 %v5358_v55, %v5258_v4 }
 0x1d4   : > { %v4141_v41 = vpop.f32.mrf.mxu1  ;;  %v4189_v7 = vpop.f32.mrf.mxu0  ;;  %v2185_v21 = vadd.f32 %v5362_v16, %v5261_v61 }
 0x1d5   : > { %3128 = vst [vmem:[%s5463_s10 + $0x18] sm:$0xff] %v3096_v2  ;;  %v3094_v0 = vadd.f32 %v2969_v56, %v2788_v10  ;;  %v2793_v48 = vadd.f32 %v4141_v41, %v2487_v6  ;;  %v3198_v13 = vmul.f32 %v3096_v2, %v3096_v2  ;;  %v2183_v10 = vadd.f32 %v5366_v12, %v5264_v34 }
 0x1d6   : > { %v2676_v59 = vpop.f32.mrf.mxu1  ;;  %v2982_v29 = vpop.f32.mrf.mxu0 }
 0x1d7   : > { %3126 = vst [vmem:[%s5463_s10 + $0x8] sm:$0xff] %v3094_v0  ;;  %v3157_v44 = vadd.f32 %v3094_v0, %v3093_v49  ;;  %v3196_v50 = vmul.f32 %v3094_v0, %v3094_v0  ;;  %v3099_v46 = vadd.f32 %v4189_v7, %v2793_v48  ;;  %v2791_v33 = vadd.f32 %v2676_v59, %v2485_v45 }
 0x1d8   : > { %v4142_v43 = vpop.f32.mrf.mxu1  ;;  %v4190_v56 = vpop.f32.mrf.mxu0  ;;  %v2489_v7 = vadd.f32 %v5360_v1, %v2182_v63  ;;  %v2492_v45 = vadd.f32 %v5364_v30, %v2185_v21  ;;  %v2188_v59 = vadd.f32 %v5370_v18, %v5267_v54 }
 0x1d9   : > { %v3158_v17 = vadd.f32 %v3157_v44, %v3095_v62  ;;  %v3227_v60 = vadd.f32 %v3196_v50, %v3195_v26  ;;  %3131 = vst [vmem:[%s5463_s10 + $0x30] sm:$0xff] %v3099_v46  ;;  %v3097_v40 = vadd.f32 %v2982_v29, %v2791_v33  ;;  %v2794_v20 = vadd.f32 %v4142_v43, %v2488_v38 }
 0x1da   : > { %v2679_v53 = vpop.f32.mrf.mxu1  ;;  %v2985_v49 = vpop.f32.mrf.mxu0  ;;  %v2490_v26 = vadd.f32 %v5368_v31, %v2183_v10  ;;  %v2186_v29 = vadd.f32 %v5374_v14, %v5270_v9  ;;  %v3201_v50 = vmul.f32 %v3099_v46, %v3099_v46  ;;  %v2189_v43 = vadd.f32 %v5378_v37, %v5273_v28 }
 0x1db   : > { %v3228_v22 = vadd.f32 %v3227_v60, %v3197_v51  ;;  %3129 = vst [vmem:[%s5463_s10 + $0x20] sm:$0xff] %v3097_v40  ;;  %v3159_v6 = vadd.f32 %v3158_v17, %v3096_v2  ;;  %v2792_v62 = vadd.f32 %v2679_v53, %v2486_v19  ;;  %v3199_v52 = vmul.f32 %v3097_v40, %v3097_v40 }
 0x1dc   : > { %v3100_v32 = vadd.f32 %v4190_v56, %v2794_v20  ;;  %v4145_v27 = vpop.f32.mrf.mxu1  ;;  %v4193_v4 = vpop.f32.mrf.mxu0  ;;  %v2495_v60 = vadd.f32 %v5372_v3, %v2188_v59  ;;  %v2496_v20 = vadd.f32 %v5380_v35, %v2189_v43  ;;  %v2187_v53 = vadd.f32 %v5382_v47, %v5276_v5 }
 0x1dd   : > { %v3160_v55 = vadd.f32 %v3159_v6, %v3097_v40  ;;  %v3229_v41 = vadd.f32 %v3228_v22, %v3198_v13  ;;  %v3098_v61 = vadd.f32 %v2985_v49, %v2792_v62  ;;  %v2797_v16 = vadd.f32 %v4145_v27, %v2491_v15 }
 0x1de   : > { %3132 = vst [vmem:[%s5463_s10 + $0x38] sm:$0xff] %v3100_v32  ;;  %v2692_v0 = vpop.f32.mrf.mxu1  ;;  %v2998_v2 = vpop.f32.mrf.mxu0  ;;  %v3202_v56 = vmul.f32 %v3100_v32, %v3100_v32  ;;  %v2493_v40 = vadd.f32 %v5376_v25, %v2186_v29  ;;  %v2192_v49 = vadd.f32 %v5386_v23, %v5279_v8 }
 0x1df   : > { %v3230_v48 = vadd.f32 %v3229_v41, %v3199_v52  ;;  %3130 = vst [vmem:[%s5463_s10 + $0x28] sm:$0xff] %v3098_v61  ;;  %v3161_v42 = vadd.f32 %v3160_v55, %v3098_v61  ;;  %v3200_v34 = vmul.f32 %v3098_v61, %v3098_v61  ;;  %v3103_v12 = vadd.f32 %v4193_v4, %v2797_v16  ;;  %v5636_v61 = vld [vmem:[#allocation3_spill] sm:$0xff]  ;;  %v5637_v16 = vld [vmem:[#allocation18_spill] sm:$0xff] }
 0x1e0   : > { %v2795_v1 = vadd.f32 %v2692_v0, %v2489_v7  ;;  %v4146_v44 = vpop.f32.mrf.mxu1  ;;  %v4194_v30 = vpop.f32.mrf.mxu0  ;;  %v2190_v52 = vadd.f32 %v5390_v57, %v5282_v11  ;;  %v2494_v55 = vadd.f32 %v5384_v36, %v2187_v53  ;;  %v2499_v41 = vadd.f32 %v5388_v39, %v2192_v49  ;;  %v5647_v49 = vld [vmem:[#allocation7_spill] sm:$0xff] }
 0x1e1   : > { %v3162_v33 = vadd.f32 %v3161_v42, %v3099_v46  ;;  %v3231_v38 = vadd.f32 %v3230_v48, %v3200_v34  ;;  %3135 = vst [vmem:[%s5463_s10 + $0x50] sm:$0xff] %v3103_v12  ;;  %v2798_v19 = vadd.f32 %v4146_v44, %v2492_v45  ;;  %v2193_v7 = vadd.f32 %v5637_v16, %v5636_v61  ;;  %v5638_v42 = vld [vmem:[#allocation17_spill] sm:$0xff]  ;;  %v5651_v16 = vld [vmem:[#allocation8_spill] sm:$0xff] }
 0x1e2   : > { %v3101_v31 = vadd.f32 %v2998_v2, %v2795_v1  ;;  %v2695_v51 = vpop.f32.mrf.mxu1  ;;  %v3001_v54 = vpop.f32.mrf.mxu0  ;;  %v2497_v34 = vadd.f32 %v5638_v42, %v2190_v52  ;;  %v5649_v52 = vld [vmem:[#allocation23_spill] sm:$0xff] }
 0x1e3   : > { %v3232_v18 = vadd.f32 %v3231_v38, %v3201_v50  ;;  %v3163_v17 = vadd.f32 %v3162_v33, %v3100_v32  ;;  %v3104_v9 = vadd.f32 %v4194_v30, %v2798_v19  ;;  %v2796_v14 = vadd.f32 %v2695_v51, %v2490_v26  ;;  %v5640_v26 = vld [vmem:[#allocation20_spill] sm:$0xff]  ;;  %v5641_v33 = vld [vmem:[#allocation19_spill] sm:$0xff]  ;;  %v5643_v51 = vld [vmem:[#allocation22_spill] sm:$0xff] }
 0x1e4   : > { %3133 = vst [vmem:[%s5463_s10 + $0x40] sm:$0xff] %v3101_v31  ;;  %v4149_v46 = vpop.f32.mrf.mxu1  ;;  %v4197_v15 = vpop.f32.mrf.mxu0  ;;  %v3203_v21 = vmul.f32 %v3101_v31, %v3101_v31  ;;  %v3205_v32 = vmul.f32 %v3103_v12, %v3103_v12  ;;  %v2500_v38 = vadd.f32 %v5641_v33, %v2193_v7  ;;  %v5652_v7 = vld [vmem:[#allocation28_spill] sm:$0xff] }
 0x1e5   : > { %v3164_v63 = vadd.f32 %v3163_v17, %v3101_v31  ;;  %v3233_v28 = vadd.f32 %v3232_v18, %v3202_v56  ;;  %3136 = vst [vmem:[%s5463_s10 + $0x58] sm:$0xff] %v3104_v9  ;;  %v3102_v37 = vadd.f32 %v3001_v54, %v2796_v14  ;;  %v2801_v3 = vadd.f32 %v4149_v46, %v2495_v60  ;;  %v5642_v31 = vld [vmem:[#allocation5_spill] sm:$0xff] }
 0x1e6   : > { %v2708_v13 = vpop.f32.mrf.mxu1  ;;  %v3014_v25 = vpop.f32.mrf.mxu0  ;;  %v3206_v57 = vmul.f32 %v3104_v9, %v3104_v9  ;;  %v2196_v54 = vadd.f32 %v5643_v51, %v5642_v31 }
 0x1e7   : > { %v3234_v22 = vadd.f32 %v3233_v28, %v3203_v21  ;;  %3134 = vst [vmem:[%s5463_s10 + $0x48] sm:$0xff] %v3102_v37  ;;  %v3165_v6 = vadd.f32 %v3164_v63, %v3102_v37  ;;  %v3204_v62 = vmul.f32 %v3102_v37, %v3102_v37  ;;  %v2799_v10 = vadd.f32 %v2708_v13, %v2493_v40  ;;  %v5645_v21 = vld [vmem:[#allocation6_spill] sm:$0xff]  ;;  %v5646_v28 = vld [vmem:[#allocation24_spill] sm:$0xff] }
 0x1e8   : > { %v3107_v35 = vadd.f32 %v4197_v15, %v2801_v3  ;;  %v4150_v27 = vpop.f32.mrf.mxu1  ;;  %v4198_v5 = vpop.f32.mrf.mxu0  ;;  %v5644_v15 = vld [vmem:[#allocation21_spill] sm:$0xff]  ;;  %v2194_v37 = vadd.f32 %v5646_v28, %v5645_v21  ;;  %v5648_v3 = vld [vmem:[#allocation26_spill] sm:$0xff]  ;;  %v5661_v21 = vld [vmem:[#allocation31_spill] sm:$0xff] }
 0x1e9   : > { %v3166_v47 = vadd.f32 %v3165_v6, %v3103_v12  ;;  %v3235_v4 = vadd.f32 %v3234_v22, %v3204_v62  ;;  %v3105_v8 = vadd.f32 %v3014_v25, %v2799_v10  ;;  %v2802_v23 = vadd.f32 %v4150_v27, %v2496_v20  ;;  %v5639_v12 = vld [vmem:[#allocation4_spill] sm:$0xff] }
 0x1ea   : > { %3139 = vst [vmem:[%s5463_s10 + $0x70] sm:$0xff] %v3107_v35  ;;  %v2711_v45 = vpop.f32.mrf.mxu1  ;;  %v3017_v11 = vpop.f32.mrf.mxu0  ;;  %v2191_v59 = vadd.f32 %v5640_v26, %v5639_v12  ;;  %v2197_v13 = vadd.f32 %v5648_v3, %v5647_v49  ;;  %v3209_v25 = vmul.f32 %v3107_v35, %v3107_v35 }
 0x1eb   : > { %v3236_v0 = vadd.f32 %v3235_v4, %v3205_v32  ;;  %3137 = vst [vmem:[%s5463_s10 + $0x60] sm:$0xff] %v3105_v8  ;;  %v3167_v2 = vadd.f32 %v3166_v47, %v3104_v9  ;;  %v3108_v48 = vadd.f32 %v4198_v5, %v2802_v23  ;;  %v2800_v36 = vadd.f32 %v2711_v45, %v2494_v55 }
 0x1ec   : > { %v4153_v39 = vpop.f32.mrf.mxu1  ;;  %v4201_v29 = vpop.f32.mrf.mxu0  ;;  %v3207_v44 = vmul.f32 %v3105_v8, %v3105_v8  ;;  %v2498_v63 = vadd.f32 %v5644_v15, %v2191_v59  ;;  %v2503_v32 = vadd.f32 %v5649_v52, %v2196_v54  ;;  %v2195_v45 = vadd.f32 %v5652_v7, %v5651_v16  ;;  %v5654_v59 = vld [vmem:[#allocation9_spill] sm:$0xff] }
 0x1ed   : > { %v3168_v1 = vadd.f32 %v3167_v2, %v3105_v8  ;;  %v3237_v30 = vadd.f32 %v3236_v0, %v3206_v57  ;;  %3140 = vst [vmem:[%s5463_s10 + $0x78] sm:$0xff] %v3108_v48  ;;  %v2805_v50 = vadd.f32 %v4153_v39, %v2499_v41  ;;  %v3106_v19 = vadd.f32 %v3017_v11, %v2800_v36  ;;  %v5650_v41 = vld [vmem:[#allocation25_spill] sm:$0xff]  ;;  %v5653_v57 = vld [vmem:[#allocation27_spill] sm:$0xff] }
 0x1ee   : > { %v2724_v43 = vpop.f32.mrf.mxu1  ;;  %v3030_v56 = vpop.f32.mrf.mxu0  ;;  %v3210_v47 = vmul.f32 %v3108_v48, %v3108_v48  ;;  %v2501_v61 = vadd.f32 %v5650_v41, %v2194_v37  ;;  %v2504_v0 = vadd.f32 %v5653_v57, %v2197_v13 }
 0x1ef   : > { %v3238_v18 = vadd.f32 %v3237_v30, %v3207_v44  ;;  %v3111_v17 = vadd.f32 %v4201_v29, %v2805_v50  ;;  %v2803_v9 = vadd.f32 %v2724_v43, %v2497_v34  ;;  %3138 = vst [vmem:[%s5463_s10 + $0x68] sm:$0xff] %v3106_v19  ;;  %v3169_v14 = vadd.f32 %v3168_v1, %v3106_v19  ;;  %v5657_v43 = vld [vmem:[#allocation10_spill] sm:$0xff] }
 0x1f0   : > { %v3208_v60 = vmul.f32 %v3106_v19, %v3106_v19  ;;  %v4154_v40 = vpop.f32.mrf.mxu1  ;;  %v4202_v46 = vpop.f32.mrf.mxu0 }
 0x1f1   : > { %3143 = vst [vmem:[%s5463_s10 + $0x90] sm:$0xff] %v3111_v17  ;;  %v3109_v20 = vadd.f32 %v3030_v56, %v2803_v9  ;;  %v2806_v53 = vadd.f32 %v4154_v40, %v2500_v38  ;;  %v3170_v22 = vadd.f32 %v3169_v14, %v3107_v35  ;;  %v5656_v38 = vld [vmem:[#allocation29_spill] sm:$0xff]  ;;  %v5658_v56 = vld [vmem:[#allocation32_spill] sm:$0xff]  ;;  %v5660_v9 = vld [vmem:[#allocation34_spill] sm:$0xff] }
 0x1f2   : > { %v3239_v6 = vadd.f32 %v3238_v18, %v3208_v60  ;;  %v2727_v62 = vpop.f32.mrf.mxu1  ;;  %v3033_v10 = vpop.f32.mrf.mxu0  ;;  %v2502_v19 = vadd.f32 %v5656_v38, %v2195_v45  ;;  %v2198_v31 = vadd.f32 %v5658_v56, %v5657_v43  ;;  %v5659_v18 = vld [vmem:[#allocation11_spill] sm:$0xff]  ;;  %v3213_v60 = vmul.f32 %v3111_v17, %v3111_v17 }
 0x1f3   : > { %3141 = vst [vmem:[%s5463_s10 + $0x80] sm:$0xff] %v3109_v20  ;;  %v3112_v27 = vadd.f32 %v4202_v46, %v2806_v53  ;;  %v2804_v5 = vadd.f32 %v2727_v62, %v2498_v63  ;;  %v3171_v8 = vadd.f32 %v3170_v22, %v3108_v48  ;;  %v3211_v42 = vmul.f32 %v3109_v20, %v3109_v20  ;;  %v5655_v48 = vld [vmem:[#allocation30_spill] sm:$0xff]  ;;  %v5662_v22 = vld [vmem:[#allocation33_spill] sm:$0xff]  ;;  %v5663_v62 = vld [vmem:[#allocation12_spill] sm:$0xff] }
 0x1f4   : > { %v3240_v4 = vadd.f32 %v3239_v6, %v3209_v25  ;;  %v4157_v23 = vpop.f32.mrf.mxu1  ;;  %v4205_v55 = vpop.f32.mrf.mxu0  ;;  %v2200_v36 = vadd.f32 %v5655_v48, %v5654_v59  ;;  %v2201_v14 = vadd.f32 %v5660_v9, %v5659_v18  ;;  %v2505_v6 = vadd.f32 %v5662_v22, %v2198_v31 }
 0x1f5   : > { %3144 = vst [vmem:[%s5463_s10 + $0x98] sm:$0xff] %v3112_v27  ;;  %v3110_v35 = vadd.f32 %v3033_v10, %v2804_v5  ;;  %v2809_v11 = vadd.f32 %v4157_v23, %v2503_v32  ;;  %v3172_v2 = vadd.f32 %v3171_v8, %v3109_v20  ;;  %v3214_v53 = vmul.f32 %v3112_v27, %v3112_v27  ;;  %v5664_v10 = vld [vmem:[#allocation36_spill] sm:$0xff]  ;;  %v5665_v5 = vld [vmem:[#allocation35_spill] sm:$0xff] }
 0x1f6   : > { %v3241_v34 = vadd.f32 %v3240_v4, %v3210_v47  ;;  %v2740_v12 = vpop.f32.mrf.mxu1  ;;  %v3046_v26 = vpop.f32.mrf.mxu0  ;;  %v2507_v28 = vadd.f32 %v5661_v21, %v2200_v36  ;;  %v2199_v52 = vadd.f32 %v5664_v10, %v5663_v62  ;;  %v2508_v47 = vadd.f32 %v5665_v5, %v2201_v14  ;;  %v5676_v10 = vld [vmem:[#allocation43_spill] sm:$0xff] }
 0x1f7   : > { %3142 = vst [vmem:[%s5463_s10 + $0x88] sm:$0xff] %v3110_v35  ;;  %v3212_v39 = vmul.f32 %v3110_v35, %v3110_v35  ;;  %v3115_v29 = vadd.f32 %v4205_v55, %v2809_v11  ;;  %v2807_v1 = vadd.f32 %v2740_v12, %v2501_v61  ;;  %v3173_v30 = vadd.f32 %v3172_v2, %v3110_v35  ;;  %v5666_v61 = vld [vmem:[#allocation13_spill] sm:$0xff]  ;;  %v5669_v12 = vld [vmem:[#allocation14_spill] sm:$0xff] }
 0x1f8   : > { %v3242_v44 = vadd.f32 %v3241_v34, %v3211_v42  ;;  %v4158_v50 = vpop.f32.mrf.mxu1  ;;  %v4206_v33 = vpop.f32.mrf.mxu0  ;;  %v5668_v42 = vld [vmem:[#allocation37_spill] sm:$0xff] }
 0x1f9   : > { %3147 = vst [vmem:[%s5463_s10 + $0xb0] sm:$0xff] %v3115_v29  ;;  %v3113_v51 = vadd.f32 %v3046_v26, %v2807_v1  ;;  %v2810_v54 = vadd.f32 %v4158_v50, %v2504_v0  ;;  %v3174_v40 = vadd.f32 %v3173_v30, %v3111_v17  ;;  %v2506_v34 = vadd.f32 %v5668_v42, %v2199_v52  ;;  %v5670_v26 = vld [vmem:[#allocation40_spill] sm:$0xff] }
 0x1fa   : > { %v3243_v46 = vadd.f32 %v3242_v44, %v3212_v39  ;;  %v2743_v15 = vpop.f32.mrf.mxu1  ;;  %v3049_v63 = vpop.f32.mrf.mxu0  ;;  %v2202_v59 = vadd.f32 %v5670_v26, %v5669_v12  ;;  %v3217_v39 = vmul.f32 %v3115_v29, %v3115_v29 }
 0x1fb   : > { %3145 = vst [vmem:[%s5463_s10 + $0xa0] sm:$0xff] %v3113_v51  ;;  %v3116_v37 = vadd.f32 %v4206_v33, %v2810_v54  ;;  %v2808_v20 = vadd.f32 %v2743_v15, %v2502_v19  ;;  %v3175_v3 = vadd.f32 %v3174_v40, %v3112_v27  ;;  %v3215_v8 = vmul.f32 %v3113_v51, %v3113_v51  ;;  %v5667_v27 = vld [vmem:[#allocation38_spill] sm:$0xff]  ;;  %v5671_v33 = vld [vmem:[#allocation39_spill] sm:$0xff]  ;;  %v5674_v40 = vld [vmem:[#allocation16_spill] sm:$0xff] }
 0x1fc   : > { %v3244_v49 = vadd.f32 %v3243_v46, %v3213_v60  ;;  %v4161_v13 = vpop.f32.mrf.mxu1  ;;  %v4209_v25 = vpop.f32.mrf.mxu0  ;;  %v2204_v16 = vadd.f32 %v5667_v27, %v5666_v61  ;;  %v5672_v19 = vld [vmem:[#allocation15_spill] sm:$0xff]  ;;  %v5673_v60 = vld [vmem:[#allocation41_spill] sm:$0xff]  ;;  %v2203_v46 = vadd.f32 %v5448_v24, %v5674_v40 }
 0x1fd   : > { %3148 = vst [vmem:[%s5463_s10 + $0xb8] sm:$0xff] %v3116_v37  ;;  %v3114_v17 = vadd.f32 %v3049_v63, %v2808_v20  ;;  %v2813_v32 = vadd.f32 %v4161_v13, %v2507_v28  ;;  %v3176_v4 = vadd.f32 %v3175_v3, %v3113_v51  ;;  %v2205_v43 = vadd.f32 %v5443_v58, %v5672_v19 }
 0x1fe   : > { %v3245_v23 = vadd.f32 %v3244_v49, %v3214_v53  ;;  %v2756_v55 = vpop.f32.mrf.mxu1  ;;  %v3062_v41 = vpop.f32.mrf.mxu0  ;;  %v2511_v38 = vadd.f32 %v5671_v33, %v2204_v16  ;;  %v3218_v51 = vmul.f32 %v3116_v37, %v3116_v37  ;;  %v5675_v49 = vld [vmem:[#allocation42_spill] sm:$0xff]  ;;  %v2510_v52 = vadd.f32 %v5676_v10, %v2203_v46 }
 0x1ff   : > { %3146 = vst [vmem:[%s5463_s10 + $0xa8] sm:$0xff] %v3114_v17  ;;  %v3216_v7 = vmul.f32 %v3114_v17, %v3114_v17  ;;  %v3119_v45 = vadd.f32 %v4209_v25, %v2813_v32  ;;  %v2811_v35 = vadd.f32 %v2756_v55, %v2505_v6  ;;  %v3177_v57 = vadd.f32 %v3176_v4, %v3114_v17 }
 0x200   : > { %v3246_v11 = vadd.f32 %v3245_v23, %v3215_v8  ;;  %v4162_v0 = vpop.f32.mrf.mxu1  ;;  %v4210_v2 = vpop.f32.mrf.mxu0  ;;  %v2512_v3 = vadd.f32 %v5675_v49, %v2205_v43 }
 0x201   : > { %3151 = vst [vmem:[%s5463_s10 + $0xd0] sm:$0xff] %v3119_v45  ;;  %v3117_v48 = vadd.f32 %v3062_v41, %v2811_v35  ;;  %v2814_v36 = vadd.f32 %v4162_v0, %v2508_v47  ;;  %v3178_v1 = vadd.f32 %v3177_v57, %v3115_v29  ;;  %v2509_v29 = vadd.f32 %v5673_v60, %v2202_v59 }
 0x202   : > { %v3247_v44 = vadd.f32 %v3246_v11, %v3216_v7  ;;  %v2759_v30 = vpop.f32.mrf.mxu1  ;;  %v3065_v50 = vpop.f32.mrf.mxu0  ;;  %v3221_v5 = vmul.f32 %v3119_v45, %v3119_v45 }
 0x203   : > { %3149 = vst [vmem:[%s5463_s10 + $0xc0] sm:$0xff] %v3117_v48  ;;  %v3120_v56 = vadd.f32 %v4210_v2, %v2814_v36  ;;  %v2812_v31 = vadd.f32 %v2759_v30, %v2506_v34  ;;  %v3179_v18 = vadd.f32 %v3178_v1, %v3116_v37  ;;  %v3219_v58 = vmul.f32 %v3117_v48, %v3117_v48 }
 0x204   : > { %v3248_v54 = vadd.f32 %v3247_v44, %v3217_v39  ;;  %v4165_v9 = vpop.f32.mrf.mxu1  ;;  %v4213_v14 = vpop.f32.mrf.mxu0 }
 0x205   : > { %3152 = vst [vmem:[%s5463_s10 + $0xd8] sm:$0xff] %v3120_v56  ;;  %v3118_v15 = vadd.f32 %v3065_v50, %v2812_v31  ;;  %v2817_v63 = vadd.f32 %v4165_v9, %v2511_v38  ;;  %v3180_v21 = vadd.f32 %v3179_v18, %v3117_v48  ;;  %v3222_v41 = vmul.f32 %v3120_v56, %v3120_v56 }
 0x206   : > { %v3249_v28 = vadd.f32 %v3248_v54, %v3218_v51  ;;  %v2772_v20 = vpop.f32.mrf.mxu1  ;;  %v3078_v53 = vpop.f32.mrf.mxu0 }
 0x207   : > { %3150 = vst [vmem:[%s5463_s10 + $0xc8] sm:$0xff] %v3118_v15  ;;  %v3220_v37 = vmul.f32 %v3118_v15, %v3118_v15  ;;  %v3123_v13 = vadd.f32 %v4213_v14, %v2817_v63  ;;  %v2815_v25 = vadd.f32 %v2772_v20, %v2509_v29  ;;  %v3181_v6 = vadd.f32 %v3180_v21, %v3118_v15 }
 0x208   : > { %v3250_v22 = vadd.f32 %v3249_v28, %v3219_v58  ;;  %v4166_v62 = vpop.f32.mrf.mxu1  ;;  %v4214_v24 = vpop.f32.mrf.mxu0 }
 0x209   : > { %3155 = vst [vmem:[%s5463_s10 + $0xf0] sm:$0xff] %v3123_v13  ;;  %v3121_v17 = vadd.f32 %v3078_v53, %v2815_v25  ;;  %v2818_v32 = vadd.f32 %v4166_v62, %v2512_v3  ;;  %v3182_v47 = vadd.f32 %v3181_v6, %v3119_v45  ;;  %v3225_v45 = vmul.f32 %v3123_v13, %v3123_v13 }
 0x20a   : > { %v3251_v4 = vadd.f32 %v3250_v22, %v3220_v37  ;;  %v2775_v8 = vpop.f32.mrf.mxu1  ;;  %v3081_v16 = vpop.f32.mrf.mxu0 }
 0x20b   : > { %3153 = vst [vmem:[%s5463_s10 + $0xe0] sm:$0xff] %v3121_v17  ;;  %v3124_v23 = vadd.f32 %v4214_v24, %v2818_v32  ;;  %v2816_v55 = vadd.f32 %v2775_v8, %v2510_v52  ;;  %v3183_v27 = vadd.f32 %v3182_v47, %v3120_v56  ;;  %v3223_v11 = vmul.f32 %v3121_v17, %v3121_v17 }
 0x20c   : > { %v3252_v61 = vadd.f32 %v3251_v4, %v3221_v5 }
 0x20d   : > { %3156 = vst [vmem:[%s5463_s10 + $0xf8] sm:$0xff] %v3124_v23  ;;  %v3122_v7 = vadd.f32 %v3081_v16, %v2816_v55  ;;  %v3184_v35 = vadd.f32 %v3183_v27, %v3121_v17  ;;  %v3226_v26 = vmul.f32 %v3124_v23, %v3124_v23 }
 0x20e   : > { %v3253_v57 = vadd.f32 %v3252_v61, %v3222_v41 }
 0x20f   : > { %3154 = vst [vmem:[%s5463_s10 + $0xe8] sm:$0xff] %v3122_v7  ;;  %v3224_v0 = vmul.f32 %v3122_v7, %v3122_v7  ;;  %v3185_v42 = vadd.f32 %v3184_v35, %v3122_v7 }
 0x210   : > { %v3254_v2 = vadd.f32 %v3253_v57, %v3223_v11 }
 0x211   : > { %v3186_v34 = vadd.f32 %v3185_v42, %v3123_v13 }
 0x212   : > { %v3255_v12 = vadd.f32 %v3254_v2, %v3224_v0 }
 0x213   : > { %v3187_v59 = vadd.f32 %v3186_v34, %v3124_v23 }
 0x214   : > { %v3256_v48 = vadd.f32 %v3255_v12, %v3225_v45 }
 0x215   : > { %v3188_v36 = vrot.slane %v3187_v59, 4 }
 0x216   : > { %v3257_v39 = vadd.f32 %v3256_v48, %v3226_v26 }
 0x217   : > { %v3189_v1 = vadd.f32 %v3188_v36, %v3187_v59 }
 0x218   : > { %v3258_v44 = vrot.slane %v3257_v39, 4 }
 0x219   : > { %v3190_v30 = vrot.slane %v3189_v1, 2 }
 0x21a   : > { %v3259_v50 = vadd.f32 %v3258_v44, %v3257_v39 }
 0x21b   : > { %v3191_v33 = vadd.f32 %v3190_v30, %v3189_v1 }
 0x21c   : > { %v3260_v38 = vrot.slane %v3259_v50, 2 }
 0x21d   : > { %v3192_v19 = vrot.slane %v3191_v33, 1 }
 0x21e   : > { %v3261_v43 = vadd.f32 %v3260_v38, %v3259_v50 }
 0x21f   : > { %v3193_v56 = vadd.f32 %v3192_v19, %v3191_v33 }
 0x220   : > { %v3262_v31 = vrot.slane %v3261_v43, 1 }
 0x221   : > { %3194 = vst [vmem:[%s208_s13] sm:$0x1] %v3193_v56 }
 0x222   : > { %v3263_v51 = vadd.f32 %v3262_v31, %v3261_v43 }
 0x224   : > { %3264 = vst [vmem:[%s208_s13 + $0x1] sm:$0x1] %v3263_v51 }
 0x225 PF: > { %s15_s15 = sadd.s32 1, %s4319_s15  }
 0x226   : > { %p12_p4 = scmp.ge.s32.totalorder %s15_s15, 4  }
 0x228   :  { %14 = sbr.rel (!%p12_p4) target bundleno = 1 (0x1), region = 84 }

</bundles_post_ra>
